<compile_context>
chip_gen: v5e
topology: v5e:2x2
jax: 0.10.0
libtpu: 0.0.40
codegen_flags: <defaults>
</compile_context>

<pallas_src>
import functools

import jax
import jax.numpy as jnp
from jax.experimental import pallas as pl
from jax.experimental.pallas import tpu as pltpu

LANE = 128
_EPS = 1e-5      # BatchNorm2d default eps
_SLOPE = 0.1     # LeakyReLU negative_slope


def _round_up(x, m):
    return (x + m - 1) // m * m


# ----------------------------------------------------------------------------
# Kernel 1: fused [prev-layer BN + LeakyReLU] -> 3x3 "same" conv (+bias)
#           -> per-image channel statistics of the raw conv output.
# One batch element per grid step.
# ----------------------------------------------------------------------------
def _fused_conv_kernel(x_ref, scale_ref, shift_ref, w_ref, b_ref,
                       o_ref, stats_ref, *, apply_act):
    # x_ref     : (1, H, W, Cin_p)   raw (pre-BN) output of previous conv, or network input
    # scale_ref : (1, Cin_p)         folded BN scale  = gamma * rsqrt(var + eps)
    # shift_ref : (1, Cin_p)         folded BN shift  = beta - mean * scale
    # w_ref     : (9*Cin_p, Cout_p)  conv weights, (ky, kx, cin) flattened, bf16
    # b_ref     : (1, Cout_p)        conv bias, f32
    # o_ref     : (1, H, W, Cout_p)  raw conv output (pre-BN), f32
    # stats_ref : (1, 2, Cout_p)     [channel sum, channel sum-of-squares] over H*W
    _, H, W, cin = x_ref.shape
    cout = o_ref.shape[-1]

    # --- previous layer's BatchNorm + LeakyReLU, fused into the load (f32 math) ---
    x = x_ref[0].astype(jnp.float32)                       # (H, W, Cin_p)
    if apply_act:
        sc = scale_ref[...].reshape(1, 1, cin)
        sh = shift_ref[...].reshape(1, 1, cin)
        x = x * sc + sh
        x = jnp.where(x > 0, x, _SLOPE * x)
    x = x.astype(jnp.bfloat16)                             # bf16 for the MXU

    # --- build the 1-pixel zero halo in VMEM (no padded HBM copy per layer) ---
    zr = jnp.zeros((1, W, cin), jnp.bfloat16)
    zc = jnp.zeros((H + 2, 1, cin), jnp.bfloat16)
    xp = jnp.concatenate([zr, x, zr], axis=0)              # (H+2, W,   Cin_p)
    xp = jnp.concatenate([zc, xp, zc], axis=1)             # (H+2, W+2, Cin_p)

    # --- im2col: one lane-dense (H*W, 9*Cin_p) x (9*Cin_p, Cout_p) contraction ---
    taps = [xp[ky:ky + H, kx:kx + W, :]
            for ky in range(3) for kx in range(3)]
    patches = jnp.concatenate(taps, axis=-1).reshape(H * W, 9 * cin)
    acc = jnp.dot(patches, w_ref[...], preferred_element_type=jnp.float32)
    acc = acc + b_ref[...]                                 # (H*W, Cout_p), f32

    o_ref[...] = acc.reshape(1, H, W, cout).astype(o_ref.dtype)

    # --- per-image BN statistics of this layer's raw output (one pass) ---
    s1 = jnp.sum(acc, axis=0, keepdims=True)               # (1, Cout_p)
    s2 = jnp.sum(acc * acc, axis=0, keepdims=True)         # (1, Cout_p)
    stats_ref[...] = jnp.concatenate([s1, s2], axis=0).reshape(1, 2, cout)


def _fused_conv(x, scale, shift, w2d, b, *, apply_act):
    N, H, W, cin_p = x.shape
    cout_p = w2d.shape[-1]
    kernel = functools.partial(_fused_conv_kernel, apply_act=apply_act)
    return pl.pallas_call(
        kernel,
        out_shape=(jax.ShapeDtypeStruct((N, H, W, cout_p), jnp.float32),
                   jax.ShapeDtypeStruct((N, 2, cout_p), jnp.float32)),
        grid=(N,),
        in_specs=[
            pl.BlockSpec((1, H, W, cin_p), lambda n: (n, 0, 0, 0)),
            pl.BlockSpec((1, cin_p), lambda n: (0, 0)),
            pl.BlockSpec((1, cin_p), lambda n: (0, 0)),
            pl.BlockSpec((9 * cin_p, cout_p), lambda n: (0, 0)),
            pl.BlockSpec((1, cout_p), lambda n: (0, 0)),
        ],
        out_specs=(
            pl.BlockSpec((1, H, W, cout_p), lambda n: (n, 0, 0, 0)),
            pl.BlockSpec((1, 2, cout_p), lambda n: (n, 0, 0)),
        ),
        compiler_params=pltpu.CompilerParams(
            dimension_semantics=("parallel",)),
    )(x, scale, shift, w2d, b)


# ----------------------------------------------------------------------------
# Kernel 2 (epilogue): final BN (folded affine) + LeakyReLU.
# ----------------------------------------------------------------------------
def _bn_act_kernel(x_ref, scale_ref, shift_ref, o_ref):
    _, H, W, C = x_ref.shape
    x = x_ref[...].astype(jnp.float32)                     # (1, H, W, C)
    sc = scale_ref[...].reshape(1, 1, 1, C)
    sh = shift_ref[...].reshape(1, 1, 1, C)
    y = x * sc + sh
    o_ref[...] = jnp.where(y > 0, y, _SLOPE * y).astype(o_ref.dtype)


def _bn_act(x, scale, shift):
    N, H, W, C = x.shape
    return pl.pallas_call(
        _bn_act_kernel,
        out_shape=jax.ShapeDtypeStruct((N, H, W, C), jnp.float32),
        grid=(N,),
        in_specs=[
            pl.BlockSpec((1, H, W, C), lambda n: (n, 0, 0, 0)),
            pl.BlockSpec((1, C), lambda n: (0, 0)),
            pl.BlockSpec((1, C), lambda n: (0, 0)),
        ],
        out_specs=pl.BlockSpec((1, H, W, C), lambda n: (n, 0, 0, 0)),
        compiler_params=pltpu.CompilerParams(
            dimension_semantics=("parallel",)),
    )(x, scale, shift)


# ----------------------------------------------------------------------------
# Fold BatchNorm (train-mode batch statistics, biased variance) into scale/shift.
# stats: (N, 2, Cp) per-image [sum, sumsq]; count = N*H*W.
# ----------------------------------------------------------------------------
def _fold_bn(stats, count, gamma_p, beta_p):
    s = jnp.sum(stats.astype(jnp.float32), axis=0)          # (2, Cp)
    mean = s[0] / count
    var = jnp.maximum(s[1] / count - mean * mean, 0.0)       # biased variance
    scale = gamma_p * jax.lax.rsqrt(var + _EPS)
    shift = beta_p - mean * scale
    return scale.reshape(1, -1), shift.reshape(1, -1)


# ----------------------------------------------------------------------------
# Parameters (HWIO conv weights; BatchNorm2d default gamma=1, beta=0).
# ----------------------------------------------------------------------------
def make_params(in_channels, out_channels, mid_channels=None, seed=0):
    if not mid_channels:
        mid_channels = out_channels
    chans = [(in_channels, mid_channels),
             (mid_channels, mid_channels),
             (mid_channels, out_channels)]
    key = jax.random.PRNGKey(seed)
    params = []
    for cin, cout in chans:
        key, kw, kb = jax.random.split(key, 3)
        w = 0.1 * jax.random.normal(kw, (3, 3, cin, cout), jnp.float32)  # HWIO
        b = 0.1 * jax.random.normal(kb, (cout,), jnp.float32)
        gamma = jnp.ones((cout,), jnp.float32)
        beta = jnp.zeros((cout,), jnp.float32)
        params.append((w, b, gamma, beta))
    return params


# ----------------------------------------------------------------------------
# TripleConv forward: (conv3x3 -> BN(train stats) -> LeakyReLU(0.1)) * 3
# NCHW in / NCHW out (PyTorch convention).
# NOTE: running_mean/running_var are not tracked (forward uses batch stats only).
# ----------------------------------------------------------------------------
@jax.jit
def triple_conv(x_nchw, params):
    N, c_in, H, W = x_nchw.shape
    count = float(N * H * W)

    # NCHW -> NHWC, channels zero-padded to a lane-dense multiple of 128.
    x = jnp.transpose(x_nchw, (0, 2, 3, 1)).astype(jnp.float32)
    cin_p0 = _round_up(c_in, LANE)
    x = jnp.pad(x, ((0, 0), (0, 0), (0, 0), (0, cin_p0 - c_in)))

    y = x
    stats = None
    gamma_prev = beta_prev = None
    for li, (w, b, gamma, beta) in enumerate(params):
        cin, cout = w.shape[2], w.shape[3]
        cin_pl, cout_pl = _round_up(cin, LANE), _round_up(cout, LANE)

        # Pad + flatten weights to (9*Cin_p, Cout_p) bf16; bias to (1, Cout_p) f32.
        w_p = jnp.pad(w, ((0, 0), (0, 0), (0, cin_pl - cin), (0, cout_pl - cout)))
        w2d = w_p.reshape(9 * cin_pl, cout_pl).astype(jnp.bfloat16)
        b_p = jnp.pad(b, (0, cout_pl - cout)).reshape(1, cout_pl).astype(jnp.float32)

        if li == 0:
            scale = jnp.ones((1, cin_pl), jnp.float32)
            shift = jnp.zeros((1, cin_pl), jnp.float32)
        else:
            gamma_p = jnp.pad(gamma_prev, (0, cin_pl - gamma_prev.shape[0]))
            beta_p = jnp.pad(beta_prev, (0, cin_pl - beta_prev.shape[0]))
            scale, shift = _fold_bn(stats, count, gamma_p, beta_p)

        y, stats = _fused_conv(y, scale, shift, w2d, b_p, apply_act=(li > 0))
        gamma_prev, beta_prev = gamma, beta

    # Final BN + LeakyReLU epilogue.
    cout = gamma_prev.shape[0]
    cout_p = _round_up(cout, LANE)
    gamma_p = jnp.pad(gamma_prev, (0, cout_p - cout))
    beta_p = jnp.pad(beta_prev, (0, cout_p - cout))
    scale, shift = _fold_bn(stats, count, gamma_p, beta_p)
    out = _bn_act(y, scale, shift)

    out = out[..., :cout]                          # drop channel padding
    return jnp.transpose(out, (0, 3, 1, 2))        # NHWC -> NCHW


if __name__ == "__main__":
    N, Cin, Cout, H, W = 2, 4, 8, 16, 16
    key = jax.random.PRNGKey(0)
    x = jax.random.normal(key, (N, Cin, H, W), jnp.float32)
    params = make_params(Cin, Cout)

    out = triple_conv(x, params)
    jax.block_until_ready(out)
    assert out.shape == (N, Cout, H, W), out.shape
    assert bool(jnp.all(jnp.isfinite(out))), "non-finite output"
    print("KERNEL_OK")
</pallas_src>

<mosaic_0001>
module attributes {stable_mosaic.version = 11 : i64} {
  func.func @_fused_conv_kernel(%arg0: i32, %arg1: memref<1x16x16x128xf32, #tpu.memory_space<vmem>>, %arg2: memref<1x128xf32, #tpu.memory_space<vmem>>, %arg3: memref<1x128xf32, #tpu.memory_space<vmem>>, %arg4: memref<1152x128xbf16, #tpu.memory_space<vmem>>, %arg5: memref<1x128xf32, #tpu.memory_space<vmem>>, %arg6: memref<1x16x16x128xf32, #tpu.memory_space<vmem>>, %arg7: memref<1x2x128xf32, #tpu.memory_space<vmem>>) attributes {dimension_semantics = [#tpu.dimension_semantics<parallel>], iteration_bounds = array<i64: 2>, scalar_prefetch = 0 : i64, scratch_operands = 0 : i64, tpu.core_type = #tpu.core_type<tc>, window_params = [{transform_indices = @transform_0, window_bounds = array<i64: 1, 16, 16, 128>}, {pipeline_mode = #tpu.pipeline_mode<synchronous>, transform_indices = @transform_1, window_bounds = array<i64: 1, 128>}, {pipeline_mode = #tpu.pipeline_mode<synchronous>, transform_indices = @transform_2, window_bounds = array<i64: 1, 128>}, {pipeline_mode = #tpu.pipeline_mode<synchronous>, transform_indices = @transform_3, window_bounds = array<i64: 1152, 128>}, {pipeline_mode = #tpu.pipeline_mode<synchronous>, transform_indices = @transform_4, window_bounds = array<i64: 1, 128>}, {transform_indices = @transform_5, window_bounds = array<i64: 1, 16, 16, 128>}, {transform_indices = @transform_6, window_bounds = array<i64: 1, 2, 128>}]} {
    %c0 = arith.constant 0 : index
    %c0_0 = arith.constant 0 : index
    %c0_1 = arith.constant 0 : index
    %c0_2 = arith.constant 0 : index
    %0 = vector.load %arg1[%c0, %c0_0, %c0_1, %c0_2] : memref<1x16x16x128xf32, #tpu.memory_space<vmem>>, vector<1x16x16x128xf32>
    %1 = vector.shape_cast %0 : vector<1x16x16x128xf32> to vector<16x16x128xf32>
    %2 = arith.truncf %1 : vector<16x16x128xf32> to vector<16x16x128xbf16>
    %cst = arith.constant 0.000000e+00 : bf16
    %3 = vector.broadcast %cst : bf16 to vector<1x16x128xbf16>
    %cst_3 = arith.constant 0.000000e+00 : bf16
    %4 = vector.broadcast %cst_3 : bf16 to vector<18x1x128xbf16>
    %5 = tpu.concatenate %3, %2, %3 in 0 : vector<1x16x128xbf16>, vector<16x16x128xbf16>, vector<1x16x128xbf16> -> vector<18x16x128xbf16>
    %6 = tpu.concatenate %4, %5, %4 in 1 : vector<18x1x128xbf16>, vector<18x16x128xbf16>, vector<18x1x128xbf16> -> vector<18x18x128xbf16>
    %7 = vector.extract_strided_slice %6 {offsets = [0, 0, 0], sizes = [16, 16, 128], strides = [1, 1, 1]} : vector<18x18x128xbf16> to vector<16x16x128xbf16>
    %8 = vector.extract_strided_slice %6 {offsets = [0, 1, 0], sizes = [16, 16, 128], strides = [1, 1, 1]} : vector<18x18x128xbf16> to vector<16x16x128xbf16>
    %9 = vector.extract_strided_slice %6 {offsets = [0, 2, 0], sizes = [16, 16, 128], strides = [1, 1, 1]} : vector<18x18x128xbf16> to vector<16x16x128xbf16>
    %10 = vector.extract_strided_slice %6 {offsets = [1, 0, 0], sizes = [16, 16, 128], strides = [1, 1, 1]} : vector<18x18x128xbf16> to vector<16x16x128xbf16>
    %11 = vector.extract_strided_slice %6 {offsets = [1, 1, 0], sizes = [16, 16, 128], strides = [1, 1, 1]} : vector<18x18x128xbf16> to vector<16x16x128xbf16>
    %12 = vector.extract_strided_slice %6 {offsets = [1, 2, 0], sizes = [16, 16, 128], strides = [1, 1, 1]} : vector<18x18x128xbf16> to vector<16x16x128xbf16>
    %13 = vector.extract_strided_slice %6 {offsets = [2, 0, 0], sizes = [16, 16, 128], strides = [1, 1, 1]} : vector<18x18x128xbf16> to vector<16x16x128xbf16>
    %14 = vector.extract_strided_slice %6 {offsets = [2, 1, 0], sizes = [16, 16, 128], strides = [1, 1, 1]} : vector<18x18x128xbf16> to vector<16x16x128xbf16>
    %15 = vector.extract_strided_slice %6 {offsets = [2, 2, 0], sizes = [16, 16, 128], strides = [1, 1, 1]} : vector<18x18x128xbf16> to vector<16x16x128xbf16>
    %16 = tpu.concatenate %7, %8, %9, %10, %11, %12, %13, %14, %15 in 2 : vector<16x16x128xbf16>, vector<16x16x128xbf16>, vector<16x16x128xbf16>, vector<16x16x128xbf16>, vector<16x16x128xbf16>, vector<16x16x128xbf16>, vector<16x16x128xbf16>, vector<16x16x128xbf16>, vector<16x16x128xbf16> -> vector<16x16x1152xbf16>
    %17 = vector.shape_cast %16 : vector<16x16x1152xbf16> to vector<256x1152xbf16>
    %c0_4 = arith.constant 0 : index
    %c0_5 = arith.constant 0 : index
    %18 = vector.load %arg4[%c0_4, %c0_5] : memref<1152x128xbf16, #tpu.memory_space<vmem>>, vector<1152x128xbf16>
    %cst_6 = arith.constant dense<0.000000e+00> : vector<256x128xf32>
    %19 = tpu.matmul %17, %18, %cst_6 {dimension_numbers = #tpu.dot_dimension_numbers<[1], [0], [0], [1], [0, 0, 1, 1], [], []>} : vector<256x1152xbf16>, vector<1152x128xbf16>, vector<256x128xf32> -> vector<256x128xf32>
    %c0_7 = arith.constant 0 : index
    %c0_8 = arith.constant 0 : index
    %20 = vector.load %arg5[%c0_7, %c0_8] : memref<1x128xf32, #tpu.memory_space<vmem>>, vector<1x128xf32>
    %21 = vector.broadcast %20 : vector<1x128xf32> to vector<256x128xf32>
    %22 = arith.addf %19, %21 : vector<256x128xf32>
    %23 = vector.shape_cast %22 : vector<256x128xf32> to vector<1x16x16x128xf32>
    %c0_9 = arith.constant 0 : index
    %c0_10 = arith.constant 0 : index
    %c0_11 = arith.constant 0 : index
    %c0_12 = arith.constant 0 : index
    %24 = vector.load %arg6[%c0_9, %c0_10, %c0_11, %c0_12] : memref<1x16x16x128xf32, #tpu.memory_space<vmem>>, vector<1x16x16x128xf32>
    tpu.vector_store %arg6[%c0_9, %c0_10, %c0_11, %c0_12], %23 {strides = array<i32>} : memref<1x16x16x128xf32, #tpu.memory_space<vmem>>, vector<1x16x16x128xf32>,
    %cst_13 = arith.constant dense<0.000000e+00> : vector<128xf32>
    %25 = vector.multi_reduction <add>, %22, %cst_13 [0] : vector<256x128xf32> to vector<128xf32>
    %26 = vector.shape_cast %25 : vector<128xf32> to vector<1x128xf32>
    %27 = arith.mulf %22, %22 : vector<256x128xf32>
    %cst_14 = arith.constant dense<0.000000e+00> : vector<128xf32>
    %28 = vector.multi_reduction <add>, %27, %cst_14 [0] : vector<256x128xf32> to vector<128xf32>
    %29 = vector.shape_cast %28 : vector<128xf32> to vector<1x128xf32>
    %30 = tpu.concatenate %26, %29 in 0 : vector<1x128xf32>, vector<1x128xf32> -> vector<2x128xf32>
    %31 = vector.shape_cast %30 : vector<2x128xf32> to vector<1x2x128xf32>
    %c0_15 = arith.constant 0 : index
    %c0_16 = arith.constant 0 : index
    %c0_17 = arith.constant 0 : index
    %32 = vector.load %arg7[%c0_15, %c0_16, %c0_17] : memref<1x2x128xf32, #tpu.memory_space<vmem>>, vector<1x2x128xf32>
    tpu.vector_store %arg7[%c0_15, %c0_16, %c0_17], %31 {strides = array<i32>} : memref<1x2x128xf32, #tpu.memory_space<vmem>>, vector<1x2x128xf32>,
    return
  }
  func.func @transform_0(%arg0: i32) -> (i32, i32, i32, i32) {
    %c0_i32 = arith.constant 0 : i32
    %c0_i32_0 = arith.constant 0 : i32
    %c0_i32_1 = arith.constant 0 : i32
    %c0_i32_2 = arith.constant 0 : i32
    return %arg0, %c0_i32, %c0_i32_0, %c0_i32_1 : i32, i32, i32, i32
  }
  func.func @transform_1(%arg0: i32) -> (i32, i32) {
    %c0_i32 = arith.constant 0 : i32
    %c0_i32_0 = arith.constant 0 : i32
    %c0_i32_1 = arith.constant 0 : i32
    return %c0_i32, %c0_i32_0 : i32, i32
  }
  func.func @transform_2(%arg0: i32) -> (i32, i32) {
    %c0_i32 = arith.constant 0 : i32
    %c0_i32_0 = arith.constant 0 : i32
    %c0_i32_1 = arith.constant 0 : i32
    return %c0_i32, %c0_i32_0 : i32, i32
  }
  func.func @transform_3(%arg0: i32) -> (i32, i32) {
    %c0_i32 = arith.constant 0 : i32
    %c0_i32_0 = arith.constant 0 : i32
    %c0_i32_1 = arith.constant 0 : i32
    return %c0_i32, %c0_i32_0 : i32, i32
  }
  func.func @transform_4(%arg0: i32) -> (i32, i32) {
    %c0_i32 = arith.constant 0 : i32
    %c0_i32_0 = arith.constant 0 : i32
    %c0_i32_1 = arith.constant 0 : i32
    return %c0_i32, %c0_i32_0 : i32, i32
  }
  func.func @transform_5(%arg0: i32) -> (i32, i32, i32, i32) {
    %c0_i32 = arith.constant 0 : i32
    %c0_i32_0 = arith.constant 0 : i32
    %c0_i32_1 = arith.constant 0 : i32
    %c0_i32_2 = arith.constant 0 : i32
    return %arg0, %c0_i32, %c0_i32_0, %c0_i32_1 : i32, i32, i32, i32
  }
  func.func @transform_6(%arg0: i32) -> (i32, i32, i32) {
    %c0_i32 = arith.constant 0 : i32
    %c0_i32_0 = arith.constant 0 : i32
    %c0_i32_1 = arith.constant 0 : i32
    return %arg0, %c0_i32, %c0_i32_0 : i32, i32, i32
  }
}

module attributes {stable_mosaic.version = 11 : i64} {
  func.func @_fused_conv_kernel(%arg0: i32, %arg1: memref<1x16x16x128xf32, #tpu.memory_space<vmem>>, %arg2: memref<1x128xf32, #tpu.memory_space<vmem>>, %arg3: memref<1x128xf32, #tpu.memory_space<vmem>>, %arg4: memref<1152x128xbf16, #tpu.memory_space<vmem>>, %arg5: memref<1x128xf32, #tpu.memory_space<vmem>>, %arg6: memref<1x16x16x128xf32, #tpu.memory_space<vmem>>, %arg7: memref<1x2x128xf32, #tpu.memory_space<vmem>>) attributes {dimension_semantics = [#tpu.dimension_semantics<parallel>], iteration_bounds = array<i64: 2>, scalar_prefetch = 0 : i64, scratch_operands = 0 : i64, tpu.core_type = #tpu.core_type<tc>, window_params = [{transform_indices = @transform_0, window_bounds = array<i64: 1, 16, 16, 128>}, {pipeline_mode = #tpu.pipeline_mode<synchronous>, transform_indices = @transform_1, window_bounds = array<i64: 1, 128>}, {pipeline_mode = #tpu.pipeline_mode<synchronous>, transform_indices = @transform_2, window_bounds = array<i64: 1, 128>}, {pipeline_mode = #tpu.pipeline_mode<synchronous>, transform_indices = @transform_3, window_bounds = array<i64: 1152, 128>}, {pipeline_mode = #tpu.pipeline_mode<synchronous>, transform_indices = @transform_4, window_bounds = array<i64: 1, 128>}, {transform_indices = @transform_5, window_bounds = array<i64: 1, 16, 16, 128>}, {transform_indices = @transform_6, window_bounds = array<i64: 1, 2, 128>}]} {
    %c0 = arith.constant 0 : index
    %c0_0 = arith.constant 0 : index
    %c0_1 = arith.constant 0 : index
    %c0_2 = arith.constant 0 : index
    %0 = vector.load %arg1[%c0, %c0_0, %c0_1, %c0_2] : memref<1x16x16x128xf32, #tpu.memory_space<vmem>>, vector<1x16x16x128xf32>
    %1 = vector.shape_cast %0 : vector<1x16x16x128xf32> to vector<16x16x128xf32>
    %c0_3 = arith.constant 0 : index
    %c0_4 = arith.constant 0 : index
    %2 = vector.load %arg2[%c0_3, %c0_4] : memref<1x128xf32, #tpu.memory_space<vmem>>, vector<1x128xf32>
    %3 = vector.shape_cast %2 : vector<1x128xf32> to vector<1x1x128xf32>
    %c0_5 = arith.constant 0 : index
    %c0_6 = arith.constant 0 : index
    %4 = vector.load %arg3[%c0_5, %c0_6] : memref<1x128xf32, #tpu.memory_space<vmem>>, vector<1x128xf32>
    %5 = vector.shape_cast %4 : vector<1x128xf32> to vector<1x1x128xf32>
    %6 = vector.broadcast %3 : vector<1x1x128xf32> to vector<16x16x128xf32>
    %7 = arith.mulf %1, %6 : vector<16x16x128xf32>
    %8 = vector.broadcast %5 : vector<1x1x128xf32> to vector<16x16x128xf32>
    %9 = arith.addf %7, %8 : vector<16x16x128xf32>
    %cst = arith.constant 0.000000e+00 : f32
    %10 = vector.broadcast %cst : f32 to vector<16x16x128xf32>
    %11 = arith.cmpf ogt, %9, %10 : vector<16x16x128xf32>
    %cst_7 = arith.constant 1.000000e-01 : f32
    %12 = vector.broadcast %cst_7 : f32 to vector<16x16x128xf32>
    %13 = arith.mulf %12, %9 : vector<16x16x128xf32>
    %14 = arith.select %11, %9, %13 : vector<16x16x128xi1>, vector<16x16x128xf32>
    %15 = arith.truncf %14 : vector<16x16x128xf32> to vector<16x16x128xbf16>
    %cst_8 = arith.constant 0.000000e+00 : bf16
    %16 = vector.broadcast %cst_8 : bf16 to vector<1x16x128xbf16>
    %cst_9 = arith.constant 0.000000e+00 : bf16
    %17 = vector.broadcast %cst_9 : bf16 to vector<18x1x128xbf16>
    %18 = tpu.concatenate %16, %15, %16 in 0 : vector<1x16x128xbf16>, vector<16x16x128xbf16>, vector<1x16x128xbf16> -> vector<18x16x128xbf16>
    %19 = tpu.concatenate %17, %18, %17 in 1 : vector<18x1x128xbf16>, vector<18x16x128xbf16>, vector<18x1x128xbf16> -> vector<18x18x128xbf16>
    %20 = vector.extract_strided_slice %19 {offsets = [0, 0, 0], sizes = [16, 16, 128], strides = [1, 1, 1]} : vector<18x18x128xbf16> to vector<16x16x128xbf16>
    %21 = vector.extract_strided_slice %19 {offsets = [0, 1, 0], sizes = [16, 16, 128], strides = [1, 1, 1]} : vector<18x18x128xbf16> to vector<16x16x128xbf16>
    %22 = vector.extract_strided_slice %19 {offsets = [0, 2, 0], sizes = [16, 16, 128], strides = [1, 1, 1]} : vector<18x18x128xbf16> to vector<16x16x128xbf16>
    %23 = vector.extract_strided_slice %19 {offsets = [1, 0, 0], sizes = [16, 16, 128], strides = [1, 1, 1]} : vector<18x18x128xbf16> to vector<16x16x128xbf16>
    %24 = vector.extract_strided_slice %19 {offsets = [1, 1, 0], sizes = [16, 16, 128], strides = [1, 1, 1]} : vector<18x18x128xbf16> to vector<16x16x128xbf16>
    %25 = vector.extract_strided_slice %19 {offsets = [1, 2, 0], sizes = [16, 16, 128], strides = [1, 1, 1]} : vector<18x18x128xbf16> to vector<16x16x128xbf16>
    %26 = vector.extract_strided_slice %19 {offsets = [2, 0, 0], sizes = [16, 16, 128], strides = [1, 1, 1]} : vector<18x18x128xbf16> to vector<16x16x128xbf16>
    %27 = vector.extract_strided_slice %19 {offsets = [2, 1, 0], sizes = [16, 16, 128], strides = [1, 1, 1]} : vector<18x18x128xbf16> to vector<16x16x128xbf16>
    %28 = vector.extract_strided_slice %19 {offsets = [2, 2, 0], sizes = [16, 16, 128], strides = [1, 1, 1]} : vector<18x18x128xbf16> to vector<16x16x128xbf16>
    %29 = tpu.concatenate %20, %21, %22, %23, %24, %25, %26, %27, %28 in 2 : vector<16x16x128xbf16>, vector<16x16x128xbf16>, vector<16x16x128xbf16>, vector<16x16x128xbf16>, vector<16x16x128xbf16>, vector<16x16x128xbf16>, vector<16x16x128xbf16>, vector<16x16x128xbf16>, vector<16x16x128xbf16> -> vector<16x16x1152xbf16>
    %30 = vector.shape_cast %29 : vector<16x16x1152xbf16> to vector<256x1152xbf16>
    %c0_10 = arith.constant 0 : index
    %c0_11 = arith.constant 0 : index
    %31 = vector.load %arg4[%c0_10, %c0_11] : memref<1152x128xbf16, #tpu.memory_space<vmem>>, vector<1152x128xbf16>
    %cst_12 = arith.constant dense<0.000000e+00> : vector<256x128xf32>
    %32 = tpu.matmul %30, %31, %cst_12 {dimension_numbers = #tpu.dot_dimension_numbers<[1], [0], [0], [1], [0, 0, 1, 1], [], []>} : vector<256x1152xbf16>, vector<1152x128xbf16>, vector<256x128xf32> -> vector<256x128xf32>
    %c0_13 = arith.constant 0 : index
    %c0_14 = arith.constant 0 : index
    %33 = vector.load %arg5[%c0_13, %c0_14] : memref<1x128xf32, #tpu.memory_space<vmem>>, vector<1x128xf32>
    %34 = vector.broadcast %33 : vector<1x128xf32> to vector<256x128xf32>
    %35 = arith.addf %32, %34 : vector<256x128xf32>
    %36 = vector.shape_cast %35 : vector<256x128xf32> to vector<1x16x16x128xf32>
    %c0_15 = arith.constant 0 : index
    %c0_16 = arith.constant 0 : index
    %c0_17 = arith.constant 0 : index
    %c0_18 = arith.constant 0 : index
    %37 = vector.load %arg6[%c0_15, %c0_16, %c0_17, %c0_18] : memref<1x16x16x128xf32, #tpu.memory_space<vmem>>, vector<1x16x16x128xf32>
    tpu.vector_store %arg6[%c0_15, %c0_16, %c0_17, %c0_18], %36 {strides = array<i32>} : memref<1x16x16x128xf32, #tpu.memory_space<vmem>>, vector<1x16x16x128xf32>,
    %cst_19 = arith.constant dense<0.000000e+00> : vector<128xf32>
    %38 = vector.multi_reduction <add>, %35, %cst_19 [0] : vector<256x128xf32> to vector<128xf32>
    %39 = vector.shape_cast %38 : vector<128xf32> to vector<1x128xf32>
    %40 = arith.mulf %35, %35 : vector<256x128xf32>
    %cst_20 = arith.constant dense<0.000000e+00> : vector<128xf32>
    %41 = vector.multi_reduction <add>, %40, %cst_20 [0] : vector<256x128xf32> to vector<128xf32>
    %42 = vector.shape_cast %41 : vector<128xf32> to vector<1x128xf32>
    %43 = tpu.concatenate %39, %42 in 0 : vector<1x128xf32>, vector<1x128xf32> -> vector<2x128xf32>
    %44 = vector.shape_cast %43 : vector<2x128xf32> to vector<1x2x128xf32>
    %c0_21 = arith.constant 0 : index
    %c0_22 = arith.constant 0 : index
    %c0_23 = arith.constant 0 : index
    %45 = vector.load %arg7[%c0_21, %c0_22, %c0_23] : memref<1x2x128xf32, #tpu.memory_space<vmem>>, vector<1x2x128xf32>
    tpu.vector_store %arg7[%c0_21, %c0_22, %c0_23], %44 {strides = array<i32>} : memref<1x2x128xf32, #tpu.memory_space<vmem>>, vector<1x2x128xf32>,
    return
  }
  func.func @transform_0(%arg0: i32) -> (i32, i32, i32, i32) {
    %c0_i32 = arith.constant 0 : i32
    %c0_i32_0 = arith.constant 0 : i32
    %c0_i32_1 = arith.constant 0 : i32
    %c0_i32_2 = arith.constant 0 : i32
    return %arg0, %c0_i32, %c0_i32_0, %c0_i32_1 : i32, i32, i32, i32
  }
  func.func @transform_1(%arg0: i32) -> (i32, i32) {
    %c0_i32 = arith.constant 0 : i32
    %c0_i32_0 = arith.constant 0 : i32
    %c0_i32_1 = arith.constant 0 : i32
    return %c0_i32, %c0_i32_0 : i32, i32
  }
  func.func @transform_2(%arg0: i32) -> (i32, i32) {
    %c0_i32 = arith.constant 0 : i32
    %c0_i32_0 = arith.constant 0 : i32
    %c0_i32_1 = arith.constant 0 : i32
    return %c0_i32, %c0_i32_0 : i32, i32
  }
  func.func @transform_3(%arg0: i32) -> (i32, i32) {
    %c0_i32 = arith.constant 0 : i32
    %c0_i32_0 = arith.constant 0 : i32
    %c0_i32_1 = arith.constant 0 : i32
    return %c0_i32, %c0_i32_0 : i32, i32
  }
  func.func @transform_4(%arg0: i32) -> (i32, i32) {
    %c0_i32 = arith.constant 0 : i32
    %c0_i32_0 = arith.constant 0 : i32
    %c0_i32_1 = arith.constant 0 : i32
    return %c0_i32, %c0_i32_0 : i32, i32
  }
  func.func @transform_5(%arg0: i32) -> (i32, i32, i32, i32) {
    %c0_i32 = arith.constant 0 : i32
    %c0_i32_0 = arith.constant 0 : i32
    %c0_i32_1 = arith.constant 0 : i32
    %c0_i32_2 = arith.constant 0 : i32
    return %arg0, %c0_i32, %c0_i32_0, %c0_i32_1 : i32, i32, i32, i32
  }
  func.func @transform_6(%arg0: i32) -> (i32, i32, i32) {
    %c0_i32 = arith.constant 0 : i32
    %c0_i32_0 = arith.constant 0 : i32
    %c0_i32_1 = arith.constant 0 : i32
    return %arg0, %c0_i32, %c0_i32_0 : i32, i32, i32
  }
}

module attributes {stable_mosaic.version = 11 : i64} {
  func.func @_bn_act_kernel(%arg0: i32, %arg1: memref<1x16x16x128xf32, #tpu.memory_space<vmem>>, %arg2: memref<1x128xf32, #tpu.memory_space<vmem>>, %arg3: memref<1x128xf32, #tpu.memory_space<vmem>>, %arg4: memref<1x16x16x128xf32, #tpu.memory_space<vmem>>) attributes {dimension_semantics = [#tpu.dimension_semantics<parallel>], iteration_bounds = array<i64: 2>, scalar_prefetch = 0 : i64, scratch_operands = 0 : i64, tpu.core_type = #tpu.core_type<tc>, window_params = [{transform_indices = @transform_0, window_bounds = array<i64: 1, 16, 16, 128>}, {pipeline_mode = #tpu.pipeline_mode<synchronous>, transform_indices = @transform_1, window_bounds = array<i64: 1, 128>}, {pipeline_mode = #tpu.pipeline_mode<synchronous>, transform_indices = @transform_2, window_bounds = array<i64: 1, 128>}, {transform_indices = @transform_3, window_bounds = array<i64: 1, 16, 16, 128>}]} {
    %c0 = arith.constant 0 : index
    %c0_0 = arith.constant 0 : index
    %c0_1 = arith.constant 0 : index
    %c0_2 = arith.constant 0 : index
    %0 = vector.load %arg1[%c0, %c0_0, %c0_1, %c0_2] : memref<1x16x16x128xf32, #tpu.memory_space<vmem>>, vector<1x16x16x128xf32>
    %c0_3 = arith.constant 0 : index
    %c0_4 = arith.constant 0 : index
    %1 = vector.load %arg2[%c0_3, %c0_4] : memref<1x128xf32, #tpu.memory_space<vmem>>, vector<1x128xf32>
    %2 = vector.shape_cast %1 : vector<1x128xf32> to vector<1x1x1x128xf32>
    %c0_5 = arith.constant 0 : index
    %c0_6 = arith.constant 0 : index
    %3 = vector.load %arg3[%c0_5, %c0_6] : memref<1x128xf32, #tpu.memory_space<vmem>>, vector<1x128xf32>
    %4 = vector.shape_cast %3 : vector<1x128xf32> to vector<1x1x1x128xf32>
    %5 = vector.broadcast %2 : vector<1x1x1x128xf32> to vector<1x16x16x128xf32>
    %6 = arith.mulf %0, %5 : vector<1x16x16x128xf32>
    %7 = vector.broadcast %4 : vector<1x1x1x128xf32> to vector<1x16x16x128xf32>
    %8 = arith.addf %6, %7 : vector<1x16x16x128xf32>
    %cst = arith.constant 0.000000e+00 : f32
    %9 = vector.broadcast %cst : f32 to vector<1x16x16x128xf32>
    %10 = arith.cmpf ogt, %8, %9 : vector<1x16x16x128xf32>
    %cst_7 = arith.constant 1.000000e-01 : f32
    %11 = vector.broadcast %cst_7 : f32 to vector<1x16x16x128xf32>
    %12 = arith.mulf %11, %8 : vector<1x16x16x128xf32>
    %13 = arith.select %10, %8, %12 : vector<1x16x16x128xi1>, vector<1x16x16x128xf32>
    %c0_8 = arith.constant 0 : index
    %c0_9 = arith.constant 0 : index
    %c0_10 = arith.constant 0 : index
    %c0_11 = arith.constant 0 : index
    %14 = vector.load %arg4[%c0_8, %c0_9, %c0_10, %c0_11] : memref<1x16x16x128xf32, #tpu.memory_space<vmem>>, vector<1x16x16x128xf32>
    tpu.vector_store %arg4[%c0_8, %c0_9, %c0_10, %c0_11], %13 {strides = array<i32>} : memref<1x16x16x128xf32, #tpu.memory_space<vmem>>, vector<1x16x16x128xf32>,
    return
  }
  func.func @transform_0(%arg0: i32) -> (i32, i32, i32, i32) {
    %c0_i32 = arith.constant 0 : i32
    %c0_i32_0 = arith.constant 0 : i32
    %c0_i32_1 = arith.constant 0 : i32
    %c0_i32_2 = arith.constant 0 : i32
    return %arg0, %c0_i32, %c0_i32_0, %c0_i32_1 : i32, i32, i32, i32
  }
  func.func @transform_1(%arg0: i32) -> (i32, i32) {
    %c0_i32 = arith.constant 0 : i32
    %c0_i32_0 = arith.constant 0 : i32
    %c0_i32_1 = arith.constant 0 : i32
    return %c0_i32, %c0_i32_0 : i32, i32
  }
  func.func @transform_2(%arg0: i32) -> (i32, i32) {
    %c0_i32 = arith.constant 0 : i32
    %c0_i32_0 = arith.constant 0 : i32
    %c0_i32_1 = arith.constant 0 : i32
    return %c0_i32, %c0_i32_0 : i32, i32
  }
  func.func @transform_3(%arg0: i32) -> (i32, i32, i32, i32) {
    %c0_i32 = arith.constant 0 : i32
    %c0_i32_0 = arith.constant 0 : i32
    %c0_i32_1 = arith.constant 0 : i32
    %c0_i32_2 = arith.constant 0 : i32
    return %arg0, %c0_i32, %c0_i32_0, %c0_i32_1 : i32, i32, i32, i32
  }
}

</mosaic_0001>

<bundles_post_ra>
// kernel: triple_conv.7
= control target key start
LH: loop header
LB: loop body
LE: loop exit
PB: predicated region body
PF: predicated region fallthrough
CT: control target
= control target key end

     0   :  { %s509_s12 = smov 0   ;;  %s672_s0 = inlined_call_operand.vmem [shape: f32[2,16,16,128], index: 0, kind: input, shape index: {}]   ;;  %s673_s1 = inlined_call_operand.vmem [shape: f32[1,128], index: 1, kind: input, shape index: {}]   ;;  %s674_s2 = inlined_call_operand.vmem [shape: f32[1,128], index: 2, kind: input, shape index: {}]   ;;  %s675_s3 = inlined_call_operand.vmem [shape: f32[2,16,16,128], index: 3, kind: output, shape index: {}]  }
   0x1 LB: > { %s458_s13 = sadd.s32 4294967295, %s487_s12   ;;  %p462_p0 = scmp.ge.s32.totalorder %s487_s12, 1  ;;  %s487_s12 = sphi %s509_s12, %s13_s12  }
   0x2   : > { %p137_p1 = scmp.lt.s32.totalorder %s487_s12, 3 }
   0x4   : > { %p138_p2 = pnand %p462_p0, %p137_p1 }
   0x5   : > { %p161_p3 = scmp.lt.s32.totalorder (!%p138_p2), %s458_s13, 1 }
   0x6   : > { %141 = sbr.rel (%p138_p2) target bundleno = 59 (0x3b), region = 32 }
   0xb   : > { %s677_s13 = smov (!%p161_p3, %s458_s13), 1  ;;  %v522_v0 = vld [vmem:[%s673_s1] ss:$0 sm:$0xff] }
   0xc   : > { %s469_s16 = sshll.u32 %s677_s13, 8  ;;  %v533_v1 = vld [vmem:[%s674_s2] ss:$0 sm:$0xff] }
   0xd   : > { %s528_s19 = scalar_lea.vmem %s672_s0, %s469_s16  ;;  %s561_s24 = scalar_lea.vmem %s675_s3, %s469_s16 }
   0xe   : > { %v171_v2 = vld [vmem:[%s528_s19] sm:$0xff]  ;;  %v172_v3 = vld [vmem:[%s528_s19 + $0x8] sm:$0xff]  ;;  %v173_v4 = vld [vmem:[%s528_s19 + $0x10] sm:$0xff] }
   0xf   : > { %v208_v5 = vmul.f32 %v522_v0, %v171_v2  ;;  %v209_v6 = vmul.f32 %v522_v0, %v172_v3  ;;  %v210_v7 = vmul.f32 %v522_v0, %v173_v4  ;;  %v174_v8 = vld [vmem:[%s528_s19 + $0x18] sm:$0xff]  ;;  %v175_v9 = vld [vmem:[%s528_s19 + $0x20] sm:$0xff]  ;;  %v176_v10 = vld [vmem:[%s528_s19 + $0x28] sm:$0xff] }
  0x10   : > { %v211_v11 = vmul.f32 %v522_v0, %v174_v8  ;;  %v212_v12 = vmul.f32 %v522_v0, %v175_v9  ;;  %v213_v13 = vmul.f32 %v522_v0, %v176_v10  ;;  %v177_v14 = vld [vmem:[%s528_s19 + $0x30] sm:$0xff]  ;;  %v178_v15 = vld [vmem:[%s528_s19 + $0x38] sm:$0xff]  ;;  %v179_v24 = vld [vmem:[%s528_s19 + $0x40] sm:$0xff] }
  0x11   : > { %v243_v16 = vadd.f32 %v533_v1, %v208_v5  ;;  %v244_v17 = vadd.f32 %v533_v1, %v209_v6  ;;  %v245_v18 = vadd.f32 %v533_v1, %v210_v7  ;;  %v214_v19 = vmul.f32 %v522_v0, %v177_v14  ;;  %v180_v32 = vld [vmem:[%s528_s19 + $0x48] sm:$0xff]  ;;  %v181_v33 = vld [vmem:[%s528_s19 + $0x50] sm:$0xff]  ;;  %v182_v34 = vld [vmem:[%s528_s19 + $0x58] sm:$0xff] }
  0x12   : > { %v246_v20 = vadd.f32 %v533_v1, %v211_v11  ;;  %v247_v21 = vadd.f32 %v533_v1, %v212_v12  ;;  %v248_v22 = vadd.f32 %v533_v1, %v213_v13  ;;  %v215_v23 = vmul.f32 %v522_v0, %v178_v15  ;;  %v183_v46 = vld [vmem:[%s528_s19 + $0x60] sm:$0xff]  ;;  %v184_v53 = vld [vmem:[%s528_s19 + $0x68] sm:$0xff]  ;;  %v185_v57 = vld [vmem:[%s528_s19 + $0x70] sm:$0xff] }
  0x13   : > { %vm275_vm0 = vcmp.gt.f32.partialorder %v243_v16, 0.0  ;;  %v307_v25 = vmul.f32 0.1, %v243_v16  ;;  %vm276_vm1 = vcmp.gt.f32.partialorder %v244_v17, 0.0  ;;  %v308_v26 = vmul.f32 0.1, %v244_v17 }
  0x14   : > { %vm277_vm2 = vcmp.gt.f32.partialorder %v245_v18, 0.0  ;;  %v309_v27 = vmul.f32 0.1, %v245_v18  ;;  %vm278_vm3 = vcmp.gt.f32.partialorder %v246_v20, 0.0  ;;  %v310_v28 = vmul.f32 0.1, %v246_v20 }
  0x15   : > { %v339_v29 = vsel %vm275_vm0, %v243_v16, %v307_v25  ;;  %v340_v30 = vsel %vm276_vm1, %v244_v17, %v308_v26  ;;  %vm279_vm4 = vcmp.gt.f32.partialorder %v247_v21, 0.0  ;;  %v311_v31 = vmul.f32 0.1, %v247_v21  ;;  %v186_v58 = vld [vmem:[%s528_s19 + $0x78] sm:$0xff]  ;;  %v187_v61 = vld [vmem:[%s528_s19 + $0x80] sm:$0xff]  ;;  %v188_v7 = vld [vmem:[%s528_s19 + $0x88] sm:$0xff] }
  0x16   : > { %371 = vst [vmem:[%s561_s24] sm:$0xff] %v339_v29  ;;  %v341_v35 = vsel %vm277_vm2, %v245_v18, %v309_v27  ;;  %v342_v36 = vsel %vm278_vm3, %v246_v20, %v310_v28  ;;  %vm280_vm5 = vcmp.gt.f32.partialorder %v248_v22, 0.0  ;;  %v312_v37 = vmul.f32 0.1, %v248_v22  ;;  %v189_v8 = vld [vmem:[%s528_s19 + $0x90] sm:$0xff]  ;;  %v191_v29 = vld [vmem:[%s528_s19 + $0xa0] sm:$0xff] }
  0x17   : > { %372 = vst [vmem:[%s561_s24 + $0x8] sm:$0xff] %v340_v30  ;;  %v343_v38 = vsel %vm279_vm4, %v247_v21, %v311_v31  ;;  %v249_v39 = vadd.f32 %v533_v1, %v214_v19  ;;  %v250_v40 = vadd.f32 %v533_v1, %v215_v23  ;;  %v216_v41 = vmul.f32 %v522_v0, %v179_v24  ;;  %v192_v30 = vld [vmem:[%s528_s19 + $0xa8] sm:$0xff]  ;;  %v193_v31 = vld [vmem:[%s528_s19 + $0xb0] sm:$0xff] }
  0x18   : > { %373 = vst [vmem:[%s561_s24 + $0x10] sm:$0xff] %v341_v35  ;;  %v344_v42 = vsel %vm280_vm5, %v248_v22, %v312_v37  ;;  %v217_v43 = vmul.f32 %v522_v0, %v180_v32  ;;  %v218_v44 = vmul.f32 %v522_v0, %v181_v33  ;;  %v219_v45 = vmul.f32 %v522_v0, %v182_v34  ;;  %v190_v22 = vld [vmem:[%s528_s19 + $0x98] sm:$0xff] }
  0x19   : > { %374 = vst [vmem:[%s561_s24 + $0x18] sm:$0xff] %v342_v36  ;;  %vm281_vm6 = vcmp.gt.f32.partialorder %v249_v39, 0.0  ;;  %v313_v47 = vmul.f32 0.1, %v249_v39  ;;  %vm282_vm7 = vcmp.gt.f32.partialorder %v250_v40, 0.0  ;;  %v251_v48 = vadd.f32 %v533_v1, %v216_v41  ;;  %v194_v35 = vld [vmem:[%s528_s19 + $0xb8] sm:$0xff] }
  0x1a   : > { %375 = vst [vmem:[%s561_s24 + $0x20] sm:$0xff] %v343_v38  ;;  %v314_v49 = vmul.f32 0.1, %v250_v40  ;;  %v252_v50 = vadd.f32 %v533_v1, %v217_v43  ;;  %v253_v51 = vadd.f32 %v533_v1, %v218_v44  ;;  %v254_v52 = vadd.f32 %v533_v1, %v219_v45  ;;  %v195_v36 = vld [vmem:[%s528_s19 + $0xc0] sm:$0xff] }
  0x1b   : > { %376 = vst [vmem:[%s561_s24 + $0x28] sm:$0xff] %v344_v42  ;;  %v345_v54 = vsel %vm281_vm6, %v249_v39, %v313_v47  ;;  %vm283_vm8 = vcmp.gt.f32.partialorder %v251_v48, 0.0  ;;  %v315_v55 = vmul.f32 0.1, %v251_v48  ;;  %v220_v56 = vmul.f32 %v522_v0, %v183_v46 }
  0x1c   : > { %377 = vst [vmem:[%s561_s24 + $0x30] sm:$0xff] %v345_v54  ;;  %v346_v59 = vsel %vm282_vm7, %v250_v40, %v314_v49  ;;  %vm284_vm9 = vcmp.gt.f32.partialorder %v252_v50, 0.0  ;;  %v316_v60 = vmul.f32 0.1, %v252_v50  ;;  %vm285_vm10 = vcmp.gt.f32.partialorder %v253_v51, 0.0  ;;  %v196_v40 = vld [vmem:[%s528_s19 + $0xc8] sm:$0xff] }
  0x1d   : > { %378 = vst [vmem:[%s561_s24 + $0x38] sm:$0xff] %v346_v59  ;;  %v347_v62 = vsel %vm283_vm8, %v251_v48, %v315_v55  ;;  %v317_v63 = vmul.f32 0.1, %v253_v51  ;;  %vm286_vm11 = vcmp.gt.f32.partialorder %v254_v52, 0.0  ;;  %v318_v2 = vmul.f32 0.1, %v254_v52 }
  0x1e   : > { %379 = vst [vmem:[%s561_s24 + $0x40] sm:$0xff] %v347_v62  ;;  %v348_v3 = vsel %vm284_vm9, %v252_v50, %v316_v60  ;;  %v255_v4 = vadd.f32 %v533_v1, %v220_v56  ;;  %v221_v5 = vmul.f32 %v522_v0, %v184_v53  ;;  %v222_v6 = vmul.f32 %v522_v0, %v185_v57  ;;  %v197_v56 = vld [vmem:[%s528_s19 + $0xd0] sm:$0xff]  ;;  %v198_v57 = vld [vmem:[%s528_s19 + $0xd8] sm:$0xff]  ;;  %v199_v62 = vld [vmem:[%s528_s19 + $0xe0] sm:$0xff] }
  0x1f   : > { %380 = vst [vmem:[%s561_s24 + $0x48] sm:$0xff] %v348_v3  ;;  %v349_v9 = vsel %vm285_vm10, %v253_v51, %v317_v63  ;;  %v350_v10 = vsel %vm286_vm11, %v254_v52, %v318_v2  ;;  %v223_v11 = vmul.f32 %v522_v0, %v186_v58  ;;  %v224_v12 = vmul.f32 %v522_v0, %v187_v61  ;;  %v200_v63 = vld [vmem:[%s528_s19 + $0xe8] sm:$0xff] }
  0x20   : > { %381 = vst [vmem:[%s561_s24 + $0x50] sm:$0xff] %v349_v9  ;;  %vm287_vm12 = vcmp.gt.f32.partialorder %v255_v4, 0.0  ;;  %v319_v13 = vmul.f32 0.1, %v255_v4  ;;  %v256_v14 = vadd.f32 %v533_v1, %v221_v5  ;;  %v257_v15 = vadd.f32 %v533_v1, %v222_v6  ;;  %v201_v9 = vld [vmem:[%s528_s19 + $0xf0] sm:$0xff] }
  0x21   : > { %382 = vst [vmem:[%s561_s24 + $0x58] sm:$0xff] %v350_v10  ;;  %v258_v16 = vadd.f32 %v533_v1, %v223_v11  ;;  %v259_v17 = vadd.f32 %v533_v1, %v224_v12  ;;  %v225_v18 = vmul.f32 %v522_v0, %v188_v7  ;;  %v226_v19 = vmul.f32 %v522_v0, %v189_v8 }
  0x22   : > { %v351_v20 = vsel %vm287_vm12, %v255_v4, %v319_v13  ;;  %vm288_vm13 = vcmp.gt.f32.partialorder %v256_v14, 0.0  ;;  %v320_v21 = vmul.f32 0.1, %v256_v14  ;;  %vm289_vm14 = vcmp.gt.f32.partialorder %v257_v15, 0.0 }
  0x23   : > { %383 = vst [vmem:[%s561_s24 + $0x60] sm:$0xff] %v351_v20  ;;  %v321_v23 = vmul.f32 0.1, %v257_v15  ;;  %vm290_vm15 = vcmp.gt.f32.partialorder %v258_v16, 0.0  ;;  %v322_v24 = vmul.f32 0.1, %v258_v16  ;;  %v260_v25 = vadd.f32 %v533_v1, %v225_v18 }
  0x24   : > { %v352_v26 = vsel %vm288_vm13, %v256_v14, %v320_v21  ;;  %vm291_vm0 = vcmp.gt.f32.partialorder %v259_v17, 0.0  ;;  %v323_v27 = vmul.f32 0.1, %v259_v17  ;;  %v261_v28 = vadd.f32 %v533_v1, %v226_v19  ;;  %v202_v14 = vld [vmem:[%s528_s19 + $0xf8] sm:$0xff] }
  0x25   : > { %384 = vst [vmem:[%s561_s24 + $0x68] sm:$0xff] %v352_v26  ;;  %v353_v32 = vsel %vm289_vm14, %v257_v15, %v321_v23  ;;  %v354_v33 = vsel %vm290_vm15, %v258_v16, %v322_v24  ;;  %vm292_vm1 = vcmp.gt.f32.partialorder %v260_v25, 0.0  ;;  %v324_v34 = vmul.f32 0.1, %v260_v25 }
  0x26   : > { %385 = vst [vmem:[%s561_s24 + $0x70] sm:$0xff] %v353_v32  ;;  %v355_v37 = vsel %vm291_vm0, %v259_v17, %v323_v27  ;;  %vm293_vm2 = vcmp.gt.f32.partialorder %v261_v28, 0.0  ;;  %v325_v38 = vmul.f32 0.1, %v261_v28  ;;  %v227_v39 = vmul.f32 %v522_v0, %v190_v22 }
  0x27   : > { %386 = vst [vmem:[%s561_s24 + $0x78] sm:$0xff] %v354_v33  ;;  %v356_v41 = vsel %vm292_vm1, %v260_v25, %v324_v34  ;;  %v228_v42 = vmul.f32 %v522_v0, %v191_v29  ;;  %v229_v43 = vmul.f32 %v522_v0, %v192_v30  ;;  %v230_v44 = vmul.f32 %v522_v0, %v193_v31 }
  0x28   : > { %387 = vst [vmem:[%s561_s24 + $0x80] sm:$0xff] %v355_v37  ;;  %v357_v45 = vsel %vm293_vm2, %v261_v28, %v325_v38  ;;  %v262_v46 = vadd.f32 %v533_v1, %v227_v39  ;;  %v231_v47 = vmul.f32 %v522_v0, %v194_v35  ;;  %v232_v48 = vmul.f32 %v522_v0, %v195_v36 }
  0x29   : > { %388 = vst [vmem:[%s561_s24 + $0x88] sm:$0xff] %v356_v41  ;;  %v263_v49 = vadd.f32 %v533_v1, %v228_v42  ;;  %v264_v50 = vadd.f32 %v533_v1, %v229_v43  ;;  %v265_v51 = vadd.f32 %v533_v1, %v230_v44  ;;  %v233_v52 = vmul.f32 %v522_v0, %v196_v40 }
  0x2a   : > { %389 = vst [vmem:[%s561_s24 + $0x90] sm:$0xff] %v357_v45  ;;  %vm294_vm3 = vcmp.gt.f32.partialorder %v262_v46, 0.0  ;;  %v326_v53 = vmul.f32 0.1, %v262_v46  ;;  %v266_v54 = vadd.f32 %v533_v1, %v231_v47  ;;  %v267_v55 = vadd.f32 %v533_v1, %v232_v48 }
  0x2b   : > { %vm295_vm4 = vcmp.gt.f32.partialorder %v263_v49, 0.0  ;;  %v327_v58 = vmul.f32 0.1, %v263_v49  ;;  %vm296_vm5 = vcmp.gt.f32.partialorder %v264_v50, 0.0  ;;  %v328_v59 = vmul.f32 0.1, %v264_v50 }
  0x2c   : > { %v358_v60 = vsel %vm294_vm3, %v262_v46, %v326_v53  ;;  %vm297_vm6 = vcmp.gt.f32.partialorder %v265_v51, 0.0  ;;  %v329_v61 = vmul.f32 0.1, %v265_v51  ;;  %vm298_vm7 = vcmp.gt.f32.partialorder %v266_v54, 0.0 }
  0x2d   : > { %390 = vst [vmem:[%s561_s24 + $0x98] sm:$0xff] %v358_v60  ;;  %v359_v2 = vsel %vm295_vm4, %v263_v49, %v327_v58  ;;  %v360_v3 = vsel %vm296_vm5, %v264_v50, %v328_v59  ;;  %v330_v4 = vmul.f32 0.1, %v266_v54  ;;  %vm299_vm8 = vcmp.gt.f32.partialorder %v267_v55, 0.0 }
  0x2e   : > { %391 = vst [vmem:[%s561_s24 + $0xa0] sm:$0xff] %v359_v2  ;;  %v361_v5 = vsel %vm297_vm6, %v265_v51, %v329_v61  ;;  %v331_v6 = vmul.f32 0.1, %v267_v55  ;;  %v268_v7 = vadd.f32 %v533_v1, %v233_v52  ;;  %v234_v8 = vmul.f32 %v522_v0, %v197_v56 }
  0x2f   : > { %392 = vst [vmem:[%s561_s24 + $0xa8] sm:$0xff] %v360_v3  ;;  %v362_v10 = vsel %vm298_vm7, %v266_v54, %v330_v4  ;;  %v235_v11 = vmul.f32 %v522_v0, %v198_v57  ;;  %v236_v12 = vmul.f32 %v522_v0, %v199_v62  ;;  %v237_v13 = vmul.f32 %v522_v0, %v200_v63 }
  0x30   : > { %393 = vst [vmem:[%s561_s24 + $0xb0] sm:$0xff] %v361_v5  ;;  %v363_v15 = vsel %vm299_vm8, %v267_v55, %v331_v6  ;;  %vm300_vm9 = vcmp.gt.f32.partialorder %v268_v7, 0.0  ;;  %v332_v16 = vmul.f32 0.1, %v268_v7  ;;  %v269_v17 = vadd.f32 %v533_v1, %v234_v8 }
  0x31   : > { %394 = vst [vmem:[%s561_s24 + $0xb8] sm:$0xff] %v362_v10  ;;  %v270_v18 = vadd.f32 %v533_v1, %v235_v11  ;;  %v271_v19 = vadd.f32 %v533_v1, %v236_v12  ;;  %v272_v20 = vadd.f32 %v533_v1, %v237_v13  ;;  %v238_v21 = vmul.f32 %v522_v0, %v201_v9 }
  0x32   : > { %395 = vst [vmem:[%s561_s24 + $0xc0] sm:$0xff] %v363_v15  ;;  %v364_v22 = vsel %vm300_vm9, %v268_v7, %v332_v16  ;;  %vm301_vm10 = vcmp.gt.f32.partialorder %v269_v17, 0.0  ;;  %v333_v23 = vmul.f32 0.1, %v269_v17  ;;  %v239_v24 = vmul.f32 %v522_v0, %v202_v14 }
  0x33   : > { %396 = vst [vmem:[%s561_s24 + $0xc8] sm:$0xff] %v364_v22  ;;  %vm302_vm11 = vcmp.gt.f32.partialorder %v270_v18, 0.0  ;;  %v334_v25 = vmul.f32 0.1, %v270_v18  ;;  %vm303_vm12 = vcmp.gt.f32.partialorder %v271_v19, 0.0  ;;  %vm304_vm13 = vcmp.gt.f32.partialorder %v272_v20, 0.0 }
  0x34   : > { %v365_v26 = vsel %vm301_vm10, %v269_v17, %v333_v23  ;;  %v335_v27 = vmul.f32 0.1, %v271_v19  ;;  %v336_v28 = vmul.f32 0.1, %v272_v20  ;;  %v273_v29 = vadd.f32 %v533_v1, %v238_v21 }
  0x35   : > { %397 = vst [vmem:[%s561_s24 + $0xd0] sm:$0xff] %v365_v26  ;;  %v366_v30 = vsel %vm302_vm11, %v270_v18, %v334_v25  ;;  %v274_v31 = vadd.f32 %v533_v1, %v239_v24 }
  0x36   : > { %398 = vst [vmem:[%s561_s24 + $0xd8] sm:$0xff] %v366_v30  ;;  %v367_v0 = vsel %vm303_vm12, %v271_v19, %v335_v27  ;;  %v368_v32 = vsel %vm304_vm13, %v272_v20, %v336_v28  ;;  %vm305_vm14 = vcmp.gt.f32.partialorder %v273_v29, 0.0  ;;  %v337_v33 = vmul.f32 0.1, %v273_v29 }
  0x37   : > { %399 = vst [vmem:[%s561_s24 + $0xe0] sm:$0xff] %v367_v0  ;;  %vm306_vm15 = vcmp.gt.f32.partialorder %v274_v31, 0.0  ;;  %v338_v34 = vmul.f32 0.1, %v274_v31 }
  0x38   : > { %400 = vst [vmem:[%s561_s24 + $0xe8] sm:$0xff] %v368_v32  ;;  %v369_v35 = vsel %vm305_vm14, %v273_v29, %v337_v33 }
  0x39   : > { %401 = vst [vmem:[%s561_s24 + $0xf0] sm:$0xff] %v369_v35  ;;  %v370_v36 = vsel %vm306_vm15, %v274_v31, %v338_v34 }
  0x3a   : > { %402 = vst [vmem:[%s561_s24 + $0xf8] sm:$0xff] %v370_v36 }
  0x3b PF: > { %s13_s12 = sadd.s32 1, %s487_s12  }
  0x3c   : > { %p10_p4 = scmp.ge.s32.totalorder %s13_s12, 4  }
  0x3e   :  { %12 = sbr.rel (!%p10_p4) target bundleno = 1 (0x1), region = 62 }

// kernel: triple_conv.5
= control target key start
LH: loop header
LB: loop body
LE: loop exit
PB: predicated region body
PF: predicated region fallthrough
CT: control target
= control target key end

     0   :  { %s3155_s21 = smov 0   ;;  %s4245_s0 = inlined_call_operand.vmem [shape: f32[2,16,16,128], index: 0, kind: input, shape index: {}]   ;;  %s4246_s1 = inlined_call_operand.vmem [shape: f32[1,128], index: 1, kind: input, shape index: {}]   ;;  %s4247_s2 = inlined_call_operand.vmem [shape: f32[1,128], index: 2, kind: input, shape index: {}]   ;;  %s4248_s3 = inlined_call_operand.vmem [shape: bf16[1152,128], index: 3, kind: input, shape index: {}]   ;;  %s4249_s4 = inlined_call_operand.vmem [shape: f32[1,128], index: 4, kind: input, shape index: {}]   ;;  %s4250_s5 = inlined_call_operand.vmem [shape: f32[2,16,16,128], index: 5, kind: output, shape index: {0}]   ;;  %s4251_s6 = inlined_call_operand.vmem [shape: f32[2,2,128], index: 6, kind: output, shape index: {1}]  }
   0x1 LB: > { %s2699_s22 = sadd.s32 4294967295, %s3117_s21   ;;  %p2703_p0 = scmp.ge.s32.totalorder %s3117_s21, 1  ;;  %s3117_s21 = sphi %s3155_s21, %s17_s21  }
   0x2   : > { %p215_p1 = scmp.lt.s32.totalorder %s3117_s21, 3 }
   0x4   : > { %p216_p2 = pnand %p2703_p0, %p215_p1 }
   0x6   : > { %219 = sbr.rel (%p216_p2) target bundleno = 773 (0x305), region = 40 }
   0xb   : > { %v3008_v0 = vld [vmem:[%s4248_s3 + $0x38] sm:$0xff]  ;;  %p249_p3 = scmp.lt.s32.totalorder %s2699_s22, 1  ;;  %v3007_v1 = vld [vmem:[%s4248_s3 + $0x30] sm:$0xff]  ;;  %v3174_v2 = vld [vmem:[%s4246_s1] ss:$0 sm:$0xff]  ;;  %v3119_v26 = vmov 0  }
   0xc   : > { %3073 = vmatpush.bf16.msra.mxu1 %v3008_v0  ;;  %3074 = vmatpush.bf16.msra.mxu2 %v3008_v0  ;;  %v3006_v3 = vld [vmem:[%s4248_s3 + $0x28] sm:$0xff]  ;;  %v3190_v4 = vld [vmem:[%s4247_s2] ss:$0 sm:$0xff]  ;;  %v3215_v27 = vrot.slane %v3119_v26, 7  ;;  %v3004_v35 = vld [vmem:[%s4248_s3 + $0x18] sm:$0xff]  ;;  %vm729_vm6 = vcmask 1040384  }
   0xd   : > { %s4351_s22 = smov (!%p249_p3, %s2699_s22), 1  ;;  %3075 = vmatpush.bf16.msra.mxu3 %v3008_v0  ;;  %1671 = vmatpush.bf16.msra.mxu0 %v3008_v0  ;;  %v3005_v22 = vld [vmem:[%s4248_s3 + $0x20] sm:$0xff]  ;;  %vm730_vm7 = vsmask.f32 256  ;;  %v3003_v53 = vld [vmem:[%s4248_s3 + $0x10] sm:$0xff] }
   0xe   : > { %s2999_s29 = sshll.u32 %s4351_s22, 8  ;;  %vm3246_vm10 = vmand %vm729_vm6, %vm730_vm7 }
   0xf   : > { %s3185_s10 = scalar_lea.vmem %s4245_s0, %s2999_s29  ;;  %s4142_s18 = scalar_lea.vmem %s4250_s5, %s2999_s29 }
  0x10   : > { %3076 = vmatpush.bf16.msra.mxu1 %v3007_v1  ;;  %3077 = vmatpush.bf16.msra.mxu2 %v3007_v1  ;;  %v270_v5 = vld [vmem:[%s3185_s10 + $0x30] sm:$0xff]  ;;  %v271_v6 = vld [vmem:[%s3185_s10 + $0x38] sm:$0xff]  ;;  %v272_v17 = vld [vmem:[%s3185_s10 + $0x40] sm:$0xff]  ;;  %s2708_s29 = sshll.u32 %s4351_s22, 1 }
  0x11   : > { %v278_v7 = vld [vmem:[%s3185_s10 + $0x70] sm:$0xff]  ;;  %3078 = vmatpush.bf16.msra.mxu3 %v3007_v1  ;;  %1672 = vmatpush.bf16.msra.mxu0 %v3007_v1  ;;  %v307_v8 = vmul.f32 %v3174_v2, %v270_v5  ;;  %v308_v9 = vmul.f32 %v3174_v2, %v271_v6  ;;  %v279_v10 = vld [vmem:[%s3185_s10 + $0x78] sm:$0xff]  ;;  %v309_v21 = vmul.f32 %v3174_v2, %v272_v17  ;;  %v273_v28 = vld [vmem:[%s3185_s10 + $0x48] sm:$0xff]  ;;  %s262_s23 = scalar_lea.vmem %s4251_s6, %s2708_s29 }
  0x12   : > { %v315_v11 = vmul.f32 %v3174_v2, %v278_v7  ;;  %v286_v12 = vld [vmem:[%s3185_s10 + $0xb0] sm:$0xff]  ;;  %v287_v13 = vld [vmem:[%s3185_s10 + $0xb8] sm:$0xff]  ;;  %v316_v14 = vmul.f32 %v3174_v2, %v279_v10  ;;  %v310_v43 = vmul.f32 %v3174_v2, %v273_v28  ;;  %v280_v48 = vld [vmem:[%s3185_s10 + $0x80] sm:$0xff] }
  0x13   : > { %v323_v15 = vmul.f32 %v3174_v2, %v286_v12  ;;  %v324_v16 = vmul.f32 %v3174_v2, %v287_v13  ;;  %v342_v18 = vadd.f32 %v3190_v4, %v307_v8  ;;  %v343_v19 = vadd.f32 %v3190_v4, %v308_v9  ;;  %v281_v58 = vld [vmem:[%s3185_s10 + $0x88] sm:$0xff] }
  0x14   : > { %v350_v20 = vadd.f32 %v3190_v4, %v315_v11  ;;  %3079 = vmatpush.bf16.msra.mxu1 %v3006_v3  ;;  %3080 = vmatpush.bf16.msra.mxu2 %v3006_v3  ;;  %v351_v23 = vadd.f32 %v3190_v4, %v316_v14  ;;  %v344_v52 = vadd.f32 %v3190_v4, %v309_v21  ;;  %v3002_v7 = vld [vmem:[%s4248_s3 + $0x8] sm:$0xff] }
  0x15   : > { %v358_v24 = vadd.f32 %v3190_v4, %v323_v15  ;;  %v359_v25 = vadd.f32 %v3190_v4, %v324_v16  ;;  %3081 = vmatpush.bf16.msra.mxu3 %v3006_v3  ;;  %1673 = vmatpush.bf16.msra.mxu0 %v3006_v3  ;;  %vm374_vm0 = vcmp.gt.f32.partialorder %v342_v18, 0.0  ;;  %vm375_vm1 = vcmp.gt.f32.partialorder %v343_v19, 0.0 }
  0x16   : > { %v406_v29 = vmul.f32 0.1, %v342_v18  ;;  %v407_v30 = vmul.f32 0.1, %v343_v19  ;;  %vm382_vm2 = vcmp.gt.f32.partialorder %v350_v20, 0.0  ;;  %vm383_vm3 = vcmp.gt.f32.partialorder %v351_v23, 0.0 }
  0x17   : > { %v414_v31 = vmul.f32 0.1, %v350_v20  ;;  %v415_v32 = vmul.f32 0.1, %v351_v23  ;;  %vm390_vm4 = vcmp.gt.f32.partialorder %v358_v24, 0.0  ;;  %vm391_vm5 = vcmp.gt.f32.partialorder %v359_v25, 0.0 }
  0x18   : > { %v438_v33 = vsel %vm374_vm0, %v342_v18, %v406_v29  ;;  %v439_v34 = vsel %vm375_vm1, %v343_v19, %v407_v30  ;;  %3082 = vmatpush.bf16.msra.mxu1 %v3005_v22  ;;  %3083 = vmatpush.bf16.msra.mxu2 %v3005_v22  ;;  %v422_v39 = vmul.f32 0.1, %v358_v24  ;;  %v423_v42 = vmul.f32 0.1, %v359_v25  ;;  %v288_v19 = vld [vmem:[%s3185_s10 + $0xc0] sm:$0xff] }
  0x19   : > { %v470_v36 = vpack.c.bf16 %v438_v33, %v438_v33  ;;  %v471_v37 = vpack.c.bf16 %v439_v34, %v439_v34  ;;  %v446_v38 = vsel %vm382_vm2, %v350_v20, %v414_v31  ;;  %3084 = vmatpush.bf16.msra.mxu3 %v3005_v22  ;;  %1674 = vmatpush.bf16.msra.mxu0 %v3005_v22  ;;  %vm376_vm8 = vcmp.gt.f32.partialorder %v344_v52, 0.0  ;;  %v264_v34 = vld [vmem:[%s3185_s10] sm:$0xff] }
  0x1a   : > { %v447_v40 = vsel %vm383_vm3, %v351_v23, %v415_v32  ;;  %v478_v41 = vpack.c.bf16 %v446_v38, %v446_v38  ;;  %v454_v47 = vsel %vm390_vm4, %v358_v24, %v422_v39  ;;  %v455_v50 = vsel %vm391_vm5, %v359_v25, %v423_v42  ;;  %v289_v24 = vld [vmem:[%s3185_s10 + $0xc8] sm:$0xff]  ;;  %v3001_v25 = vld [vmem:[%s4248_s3] sm:$0xff]  ;;  %v3032_v38 = vld [vmem:[%s4248_s3 + $0xf8] sm:$0xff] }
  0x1b   : > { %v534_v44 = vunpack.c.l.b16 %v470_v36  ;;  %v535_v45 = vunpack.c.l.b16 %v471_v37  ;;  %v479_v46 = vpack.c.bf16 %v447_v40, %v447_v40  ;;  %v486_v51 = vpack.c.bf16 %v454_v47, %v454_v47  ;;  %v3024_v37 = vld [vmem:[%s4248_s3 + $0xb8] sm:$0xff] }
  0x1c   : > { %v542_v49 = vunpack.c.l.b16 %v478_v41  ;;  %3085 = vmatpush.bf16.msra.mxu1 %v3004_v35  ;;  %3086 = vmatpush.bf16.msra.mxu2 %v3004_v35  ;;  %v487_v56 = vpack.c.bf16 %v455_v50, %v455_v50  ;;  %v345_v57 = vadd.f32 %v3190_v4, %v310_v43  ;;  %v408_v60 = vmul.f32 0.1, %v344_v52 }
  0x1d   : > { %v563_v54 = vpack.c.b16 %v535_v45, %v534_v44  ;;  %v543_v55 = vunpack.c.l.b16 %v479_v46  ;;  %3087 = vmatpush.bf16.msra.mxu3 %v3004_v35  ;;  %1675 = vmatpush.bf16.msra.mxu0 %v3004_v35  ;;  %v550_v59 = vunpack.c.l.b16 %v486_v51  ;;  %v317_v61 = vmul.f32 %v3174_v2, %v280_v48  ;;  %v3016_v46 = vld [vmem:[%s4248_s3 + $0x78] sm:$0xff] }
  0x1e   : > { %v551_v1 = vunpack.c.l.b16 %v487_v56  ;;  %vm377_vm9 = vcmp.gt.f32.partialorder %v345_v57, 0.0  ;;  %v409_v3 = vmul.f32 0.1, %v345_v57  ;;  %v440_v5 = vsel %vm376_vm8, %v344_v52, %v408_v60  ;;  %v3023_v52 = vld [vmem:[%s4248_s3 + $0xb0] sm:$0xff] }
  0x1f   : > { %v605_v62 = vshrl.u32 %v563_v54, 16  ;;  %v608_v63 = vshll.u32 %v563_v54, 16  ;;  %v567_v0 = vpack.c.b16 %v543_v55, %v542_v49  ;;  %v318_v6 = vmul.f32 %v3174_v2, %v281_v58  ;;  %v265_v49 = vld [vmem:[%s3185_s10 + $0x8] sm:$0xff]  ;;  %v3040_v54 = vld [vmem:[%s4248_s3 + $0x138] sm:$0xff]  ;;  %v274_v60 = vld [vmem:[%s3185_s10 + $0x50] sm:$0xff] }
  0x20   : > { %3088 = vmatpush.bf16.msra.mxu1 %v3003_v53  ;;  %3089 = vmatpush.bf16.msra.mxu2 %v3003_v53  ;;  %v571_v11 = vpack.c.b16 %v551_v1, %v550_v59  ;;  %v441_v12 = vsel %vm377_vm9, %v345_v57, %v409_v3  ;;  %v472_v13 = vpack.c.bf16 %v440_v5, %v440_v5  ;;  %v3261_v29 = vsel %vm3246_vm10, 0, %v3215_v27 }
  0x21   : > { %v3237_v8 = vrot.slane %v605_v62, 7  ;;  %v633_v9 = vshrl.u32 %v567_v0, 16  ;;  %v636_v10 = vshll.u32 %v567_v0, 16  ;;  %3090 = vmatpush.bf16.msra.mxu3 %v3003_v53  ;;  %1676 = vmatpush.bf16.msra.mxu0 %v3003_v53  ;;  %v352_v14 = vadd.f32 %v3190_v4, %v317_v61  ;;  %4278 = vst [vmem:[#allocation2_spill] sm:$0xff] %v3261_v29  ;;  %v3031_v53 = vld [vmem:[%s4248_s3 + $0xf0] sm:$0xff] }
  0x22   : > { %v661_v17 = vshrl.u32 %v571_v11, 16  ;;  %v664_v18 = vshll.u32 %v571_v11, 16  ;;  %v473_v21 = vpack.c.bf16 %v441_v12, %v441_v12  ;;  %v536_v22 = vunpack.c.l.b16 %v472_v13  ;;  %v3039_v11 = vld [vmem:[%s4248_s3 + $0x130] sm:$0xff] }
  0x23   : > { %v610_v15 = vor.u32 %v608_v63, %v3237_v8  ;;  %v3241_v16 = vrot.slane %v633_v9, 7  ;;  %v353_v23 = vadd.f32 %v3190_v4, %v318_v6  ;;  %vm384_vm11 = vcmp.gt.f32.partialorder %v352_v14, 0.0  ;;  %v275_v6 = vld [vmem:[%s3185_s10 + $0x58] sm:$0xff] }
  0x24   : > { %3091 = vmatpush.bf16.msra.mxu1 %v3002_v7  ;;  %3092 = vmatpush.bf16.msra.mxu2 %v3002_v7  ;;  %v3256_v28 = vrot.slane %v661_v17, 7  ;;  %v416_v30 = vmul.f32 0.1, %v352_v14  ;;  %v537_v31 = vunpack.c.l.b16 %v473_v21  ;;  %v325_v33 = vmul.f32 %v3174_v2, %v288_v19  ;;  %v3030_v19 = vld [vmem:[%s4248_s3 + $0xe8] sm:$0xff] }
  0x25   : > { %v638_v26 = vor.u32 %v636_v10, %v3241_v16  ;;  %3093 = vmatpush.bf16.msra.mxu3 %v3002_v7  ;;  %1677 = vmatpush.bf16.msra.mxu0 %v3002_v7  ;;  %vm385_vm12 = vcmp.gt.f32.partialorder %v353_v23, 0.0  ;;  %v417_v32 = vmul.f32 0.1, %v353_v23  ;;  %v3267_v35 = vsel %vm3246_vm10, 0, %v610_v15  ;;  %v3015_v7 = vld [vmem:[%s4248_s3 + $0x70] sm:$0xff]  ;;  %v3022_v15 = vld [vmem:[%s4248_s3 + $0xa8] sm:$0xff] }
  0x26   : > { %v666_v36 = vor.u32 %v664_v18, %v3256_v28  ;;  %v448_v39 = vsel %vm384_vm11, %v352_v14, %v416_v30  ;;  %v326_v40 = vmul.f32 %v3174_v2, %v289_v24  ;;  %v564_v41 = vpack.c.b16 %v537_v31, %v536_v22 }
  0x27   : > { %v449_v42 = vsel %vm385_vm12, %v353_v23, %v417_v32  ;;  %v480_v43 = vpack.c.bf16 %v448_v39, %v448_v39  ;;  %v360_v44 = vadd.f32 %v3190_v4, %v325_v33  ;;  %v3281_v45 = vsel %vm3246_vm10, 0, %v638_v26  ;;  %v3014_v33 = vld [vmem:[%s4248_s3 + $0x68] sm:$0xff]  ;;  %v3021_v39 = vld [vmem:[%s4248_s3 + $0xa0] sm:$0xff] }
  0x28   : > { %3094 = vmatpush.bf16.msra.mxu1 %v3001_v25  ;;  %3095 = vmatpush.bf16.msra.mxu2 %v3001_v25  ;;  %4279 = vst [vmem:[#allocation3_spill] sm:$0xff] %v3281_v45  ;;  %v481_v47 = vpack.c.bf16 %v449_v42, %v449_v42  ;;  %v361_v48 = vadd.f32 %v3190_v4, %v326_v40  ;;  %v3291_v51 = vsel %vm3246_vm10, 0, %v666_v36  ;;  %v612_v55 = vshrl.u32 %v564_v41, 16  ;;  %v3029_v40 = vld [vmem:[%s4248_s3 + $0xe0] sm:$0xff]  ;;  %v282_v42 = vld [vmem:[%s3185_s10 + $0x90] sm:$0xff] }
  0x29   : > { %v301_v50 = vmul.f32 %v3174_v2, %v264_v34  ;;  %3096 = vmatpush.bf16.msra.mxu3 %v3001_v25  ;;  %1678 = vmatpush.bf16.msra.mxu0 %v3001_v25  ;;  %4280 = vst [vmem:[#allocation4_spill] sm:$0xff] %v3291_v51  ;;  %v544_v56 = vunpack.c.l.b16 %v480_v43  ;;  %vm392_vm13 = vcmp.gt.f32.partialorder %v360_v44, 0.0  ;;  %v424_v58 = vmul.f32 0.1, %v360_v44  ;;  %v3038_v34 = vld [vmem:[%s4248_s3 + $0x128] sm:$0xff] }
  0x2a   : > { %v545_v57 = vunpack.c.l.b16 %v481_v47  ;;  %vm393_vm14 = vcmp.gt.f32.partialorder %v361_v48, 0.0  ;;  %v425_v59 = vmul.f32 0.1, %v361_v48  ;;  %v3305_v61 = vrot.slane %v612_v55, 7  ;;  %v3013_v55 = vld [vmem:[%s4248_s3 + $0x60] sm:$0xff] }
  0x2b   : > { %1699 = vmatmul.bf16.vlgmr.msra.gmra.mxu1 %v3267_v35  ;;  %1719 = vmatmul.bf16.vlgmr.msra.gmra.mxu2 %v3281_v45  ;;  %v615_v62 = vshll.u32 %v564_v41, 16  ;;  %v302_v63 = vmul.f32 %v3174_v2, %v265_v49  ;;  %v336_v0 = vadd.f32 %v3190_v4, %v301_v50  ;;  %v456_v3 = vsel %vm392_vm13, %v360_v44, %v424_v58  ;;  %v290_v49 = vld [vmem:[%s3185_s10 + $0xd0] sm:$0xff]  ;;  %v291_v58 = vld [vmem:[%s3185_s10 + $0xd8] sm:$0xff] }
  0x2c   : > { %1849 = vmatpush.bf16.msrb.mxu2 %v3024_v37  ;;  %1739 = vmatmul.bf16.vlgmr.msra.gmra.mxu3 %v3291_v51  ;;  %v568_v1 = vpack.c.b16 %v545_v57, %v544_v56  ;;  %v457_v5 = vsel %vm393_vm14, %v361_v48, %v425_v59  ;;  %v488_v9 = vpack.c.bf16 %v456_v3, %v456_v3  ;;  %v283_v48 = vld [vmem:[%s3185_s10 + $0x98] sm:$0xff]  ;;  %v3037_v59 = vld [vmem:[%s4248_s3 + $0x120] sm:$0xff] }
  0x2d   : > { %1938 = vmatpush.bf16.msrb.mxu3 %v3032_v38  ;;  %1679 = vmatmul.bf16.vlgmr.msra.gmra.mxu0 %v3261_v29  ;;  %v489_v10 = vpack.c.bf16 %v457_v5, %v457_v5  ;;  %vm368_vm15 = vcmp.gt.f32.partialorder %v336_v0, 0.0  ;;  %v311_v12 = vmul.f32 %v3174_v2, %v274_v60  ;;  %v337_v17 = vadd.f32 %v3190_v4, %v302_v63  ;;  %v3028_v3 = vld [vmem:[%s4248_s3 + $0xd8] sm:$0xff] }
  0x2e   : > { %1760 = vmatpush.bf16.msrb.mxu1 %v3016_v46  ;;  %2027 = vmatpush.bf16.msrb.mxu0 %v3040_v54  ;;  %v640_v13 = vshrl.u32 %v568_v1, 16  ;;  %v643_v14 = vshll.u32 %v568_v1, 16  ;;  %v400_v18 = vmul.f32 0.1, %v336_v0  ;;  %v617_v21 = vor.u32 %v615_v62, %v3305_v61  ;;  %v3020_v1 = vld [vmem:[%s4248_s3 + $0x98] sm:$0xff] }
  0x2f   : > { %v552_v22 = vunpack.c.l.b16 %v488_v9  ;;  %v553_v23 = vunpack.c.l.b16 %v489_v10  ;;  %v312_v24 = vmul.f32 %v3174_v2, %v275_v6  ;;  %vm369_vm0 = vcmp.gt.f32.partialorder %v337_v17, 0.0 }
  0x30   : > { %1850 = vmatpush.bf16.msrb.mxu2 %v3023_v52  ;;  %v3329_v25 = vrot.slane %v640_v13, 7  ;;  %v401_v26 = vmul.f32 0.1, %v337_v17  ;;  %v432_v30 = vsel %vm368_vm15, %v336_v0, %v400_v18  ;;  %v346_v36 = vadd.f32 %v3190_v4, %v311_v12 }
  0x31   : > { %1939 = vmatpush.bf16.msrb.mxu3 %v3031_v53  ;;  %v572_v31 = vpack.c.b16 %v553_v23, %v552_v22  ;;  %v464_v32 = vpack.c.bf16 %v432_v30, %v432_v30  ;;  %v347_v41 = vadd.f32 %v3190_v4, %v312_v24  ;;  %v3352_v50 = vsel %vm3246_vm10, 0, %v617_v21  ;;  %v267_v21 = vld [vmem:[%s3185_s10 + $0x18] sm:$0xff]  ;;  %v3019_v30 = vld [vmem:[%s4248_s3 + $0x90] sm:$0xff] }
  0x32   : > { %1761 = vmatpush.bf16.msrb.mxu1 %v3015_v7  ;;  %2028 = vmatpush.bf16.msrb.mxu0 %v3039_v11  ;;  %v645_v37 = vor.u32 %v643_v14, %v3329_v25  ;;  %v433_v38 = vsel %vm369_vm0, %v337_v17, %v401_v26  ;;  %4281 = vst [vmem:[#allocation5_spill] sm:$0xff] %v3352_v50  ;;  %vm378_vm1 = vcmp.gt.f32.partialorder %v346_v36, 0.0  ;;  %v410_v52 = vmul.f32 0.1, %v346_v36  ;;  %v266_v14 = vld [vmem:[%s3185_s10 + $0x10] sm:$0xff]  ;;  %v3012_v22 = vld [vmem:[%s4248_s3 + $0x58] sm:$0xff] }
  0x33   : > { %v668_v43 = vshrl.u32 %v572_v31, 16  ;;  %v671_v44 = vshll.u32 %v572_v31, 16  ;;  %v465_v46 = vpack.c.bf16 %v433_v38, %v433_v38  ;;  %v528_v47 = vunpack.c.l.b16 %v464_v32  ;;  %v3036_v23 = vld [vmem:[%s4248_s3 + $0x118] sm:$0xff]  ;;  %v3027_v31 = vld [vmem:[%s4248_s3 + $0xd0] sm:$0xff] }
  0x34   : > { %1851 = vmatpush.bf16.msrb.mxu2 %v3022_v15  ;;  %vm379_vm2 = vcmp.gt.f32.partialorder %v347_v41, 0.0  ;;  %v411_v56 = vmul.f32 0.1, %v347_v41  ;;  %v319_v57 = vmul.f32 %v3174_v2, %v282_v42  ;;  %v3366_v60 = vsel %vm3246_vm10, 0, %v645_v37 }
  0x35   : > { %1940 = vmatpush.bf16.msrb.mxu3 %v3030_v19  ;;  %v3354_v53 = vrot.slane %v668_v43, 7  ;;  %v529_v54 = vunpack.c.l.b16 %v465_v46  ;;  %v442_v62 = vsel %vm378_vm1, %v346_v36, %v410_v52  ;;  %v320_v63 = vmul.f32 %v3174_v2, %v283_v48  ;;  %v277_v52 = vld [vmem:[%s3185_s10 + $0x68] sm:$0xff] }
  0x36   : > { %1762 = vmatpush.bf16.msrb.mxu1 %v3014_v33  ;;  %2029 = vmatpush.bf16.msrb.mxu0 %v3038_v34  ;;  %v327_v0 = vmul.f32 %v3174_v2, %v290_v49  ;;  %v443_v7 = vsel %vm379_vm2, %v347_v41, %v411_v56  ;;  %v474_v9 = vpack.c.bf16 %v442_v62, %v442_v62  ;;  %v276_v49 = vld [vmem:[%s3185_s10 + $0x60] sm:$0xff] }
  0x37   : > { %v673_v5 = vor.u32 %v671_v44, %v3354_v53  ;;  %v560_v6 = vpack.c.b16 %v529_v54, %v528_v47  ;;  %v475_v10 = vpack.c.bf16 %v443_v7, %v443_v7  ;;  %v354_v11 = vadd.f32 %v3190_v4, %v319_v57  ;;  %v3011_v44 = vld [vmem:[%s4248_s3 + $0x50] sm:$0xff] }
  0x38   : > { %1852 = vmatpush.bf16.msrb.mxu2 %v3021_v39  ;;  %v355_v12 = vadd.f32 %v3190_v4, %v320_v63  ;;  %v328_v13 = vmul.f32 %v3174_v2, %v291_v58  ;;  %v538_v19 = vunpack.c.l.b16 %v474_v9  ;;  %v362_v34 = vadd.f32 %v3190_v4, %v327_v0 }
  0x39   : > { %1941 = vmatpush.bf16.msrb.mxu3 %v3029_v40  ;;  %v3384_v15 = vsel %vm3246_vm10, 0, %v673_v5  ;;  %v584_v17 = vshrl.u32 %v560_v6, 16  ;;  %v587_v18 = vshll.u32 %v560_v6, 16  ;;  %v539_v24 = vunpack.c.l.b16 %v475_v10 }
  0x3a   : > { %1763 = vmatpush.bf16.msrb.mxu1 %v3013_v55  ;;  %2030 = vmatpush.bf16.msrb.mxu0 %v3037_v59  ;;  %vm386_vm3 = vcmp.gt.f32.partialorder %v354_v11, 0.0  ;;  %vm387_vm4 = vcmp.gt.f32.partialorder %v355_v12, 0.0  ;;  %v418_v26 = vmul.f32 0.1, %v354_v11  ;;  %v419_v33 = vmul.f32 0.1, %v355_v12 }
  0x3b   : > { %1704 = vmatmul.bf16.gmra.mxu1 %v3352_v50  ;;  %1724 = vmatmul.bf16.gmra.mxu2 %v3366_v60  ;;  %v3401_v32 = vrot.slane %v584_v17, 7  ;;  %v363_v36 = vadd.f32 %v3190_v4, %v328_v13  ;;  %v565_v37 = vpack.c.b16 %v539_v24, %v538_v19  ;;  %v303_v39 = vmul.f32 %v3174_v2, %v266_v14  ;;  %v284_v19 = vld [vmem:[%s3185_s10 + $0xa0] sm:$0xff] }
  0x3c   : > { %1853 = vmatpush.bf16.msrb.mxu2 %v3020_v1  ;;  %1744 = vmatmul.bf16.gmra.mxu3 %v3384_v15  ;;  %v450_v38 = vsel %vm386_vm3, %v354_v11, %v418_v26  ;;  %v304_v40 = vmul.f32 %v3174_v2, %v267_v21  ;;  %v451_v42 = vsel %vm387_vm4, %v355_v12, %v419_v33  ;;  %vm394_vm5 = vcmp.gt.f32.partialorder %v362_v34, 0.0  ;;  %v3018_v21 = vld [vmem:[%s4248_s3 + $0x88] sm:$0xff] }
  0x3d   : > { %1942 = vmatpush.bf16.msrb.mxu3 %v3028_v3  ;;  %v589_v41 = vor.u32 %v587_v18, %v3401_v32  ;;  %v482_v43 = vpack.c.bf16 %v450_v38, %v450_v38  ;;  %v619_v46 = vshrl.u32 %v565_v37, 16  ;;  %v622_v47 = vshll.u32 %v565_v37, 16  ;;  %v285_v38 = vld [vmem:[%s3185_s10 + $0xa8] sm:$0xff] }
  0x3e   : > { %1764 = vmatpush.bf16.msrb.mxu1 %v3012_v22  ;;  %2031 = vmatpush.bf16.msrb.mxu0 %v3036_v23  ;;  %v483_v48 = vpack.c.bf16 %v451_v42, %v451_v42  ;;  %vm395_vm7 = vcmp.gt.f32.partialorder %v363_v36, 0.0  ;;  %v426_v56 = vmul.f32 0.1, %v362_v34  ;;  %v427_v57 = vmul.f32 0.1, %v363_v36 }
  0x3f   : > { %v3417_v54 = vsel %vm3246_vm10, 0, %v589_v41  ;;  %v546_v55 = vunpack.c.l.b16 %v482_v43  ;;  %v3420_v58 = vrot.slane %v619_v46, 7  ;;  %v338_v62 = vadd.f32 %v3190_v4, %v303_v39  ;;  %v292_v43 = vld [vmem:[%s3185_s10 + $0xe0] sm:$0xff] }
  0x40   : > { %1854 = vmatpush.bf16.msrb.mxu2 %v3019_v30  ;;  %1684 = vmatmul.bf16.gmra.mxu0 %v3417_v54  ;;  %v547_v59 = vunpack.c.l.b16 %v483_v48  ;;  %v339_v63 = vadd.f32 %v3190_v4, %v304_v40  ;;  %v458_v0 = vsel %vm394_vm5, %v362_v34, %v426_v56  ;;  %v459_v1 = vsel %vm395_vm7, %v363_v36, %v427_v57 }
  0x41   : > { %1943 = vmatpush.bf16.msrb.mxu3 %v3027_v31  ;;  %v313_v3 = vmul.f32 %v3174_v2, %v276_v49  ;;  %v314_v5 = vmul.f32 %v3174_v2, %v277_v52  ;;  %v624_v6 = vor.u32 %v622_v47, %v3420_v58  ;;  %v490_v9 = vpack.c.bf16 %v458_v0, %v458_v0  ;;  %v3026_v49 = vld [vmem:[%s4248_s3 + $0xc8] sm:$0xff]  ;;  %v3035_v52 = vld [vmem:[%s4248_s3 + $0x110] sm:$0xff] }
  0x42   : > { %1765 = vmatpush.bf16.msrb.mxu1 %v3011_v44  ;;  %v569_v7 = vpack.c.b16 %v547_v59, %v546_v55  ;;  %v491_v10 = vpack.c.bf16 %v459_v1, %v459_v1  ;;  %vm370_vm8 = vcmp.gt.f32.partialorder %v338_v62, 0.0  ;;  %vm371_vm9 = vcmp.gt.f32.partialorder %v339_v63, 0.0  ;;  %2032 = vmatpush.bf16.msrb.mxu0 %v3035_v52 }
  0x43   : > { %v402_v11 = vmul.f32 0.1, %v338_v62  ;;  %v403_v12 = vmul.f32 0.1, %v339_v63  ;;  %v3430_v13 = vsel %vm3246_vm10, 0, %v624_v6  ;;  %v554_v18 = vunpack.c.l.b16 %v490_v9 }
  0x44   : > { %4282 = vst [vmem:[#allocation6_spill] sm:$0xff] %v3430_v13  ;;  %v647_v14 = vshrl.u32 %v569_v7, 16  ;;  %v650_v17 = vshll.u32 %v569_v7, 16  ;;  %v555_v22 = vunpack.c.l.b16 %v491_v10  ;;  %v348_v26 = vadd.f32 %v3190_v4, %v313_v3  ;;  %1855 = vmatpush.bf16.msrb.mxu2 %v3018_v21 }
  0x45   : > { %v434_v23 = vsel %vm370_vm8, %v338_v62, %v402_v11  ;;  %v435_v24 = vsel %vm371_vm9, %v339_v63, %v403_v12  ;;  %v349_v34 = vadd.f32 %v3190_v4, %v314_v5  ;;  %v321_v39 = vmul.f32 %v3174_v2, %v284_v19  ;;  %v3010_v62 = vld [vmem:[%s4248_s3 + $0x48] sm:$0xff]  ;;  %v3017_v63 = vld [vmem:[%s4248_s3 + $0x80] sm:$0xff]  ;;  %1944 = vmatpush.bf16.msrb.mxu3 %v3026_v49 }
  0x46   : > { %v3437_v30 = vrot.slane %v647_v14, 7  ;;  %v466_v31 = vpack.c.bf16 %v434_v23, %v434_v23  ;;  %v467_v33 = vpack.c.bf16 %v435_v24, %v435_v24  ;;  %v573_v36 = vpack.c.b16 %v555_v22, %v554_v18  ;;  %v293_v5 = vld [vmem:[%s3185_s10 + $0xe8] sm:$0xff]  ;;  %1766 = vmatpush.bf16.msrb.mxu1 %v3010_v62  ;;  %v3025_v18 = vld [vmem:[%s4248_s3 + $0xc0] sm:$0xff]  ;;  %v3056_v62 = vld [vmem:[%s4248_s3 + $0x1b8] sm:$0xff] }
  0x47   : > { %vm380_vm11 = vcmp.gt.f32.partialorder %v348_v26, 0.0  ;;  %v412_v37 = vmul.f32 0.1, %v348_v26  ;;  %vm381_vm12 = vcmp.gt.f32.partialorder %v349_v34, 0.0  ;;  %v413_v47 = vmul.f32 0.1, %v349_v34 }
  0x48   : > { %v652_v40 = vor.u32 %v650_v17, %v3437_v30  ;;  %v530_v41 = vunpack.c.l.b16 %v466_v31  ;;  %v531_v42 = vunpack.c.l.b16 %v467_v33  ;;  %v675_v44 = vshrl.u32 %v573_v36, 16  ;;  %1856 = vmatpush.bf16.msrb.mxu2 %v3017_v63  ;;  %v3034_v19 = vld [vmem:[%s4248_s3 + $0x108] sm:$0xff]  ;;  %v3009_v31 = vld [vmem:[%s4248_s3 + $0x40] sm:$0xff] }
  0x49   : > { %v678_v46 = vshll.u32 %v573_v36, 16  ;;  %v444_v48 = vsel %vm380_vm11, %v348_v26, %v412_v37  ;;  %v322_v59 = vmul.f32 %v3174_v2, %v285_v38  ;;  %v445_v1 = vsel %vm381_vm12, %v349_v34, %v413_v47  ;;  %v268_v26 = vld [vmem:[%s3185_s10 + $0x20] sm:$0xff]  ;;  %1945 = vmatpush.bf16.msrb.mxu3 %v3025_v18  ;;  %2033 = vmatpush.bf16.msrb.mxu0 %v3034_v19 }
  0x4a   : > { %v3452_v55 = vsel %vm3246_vm10, 0, %v652_v40  ;;  %v561_v56 = vpack.c.b16 %v531_v42, %v530_v41  ;;  %v476_v57 = vpack.c.bf16 %v444_v48, %v444_v48  ;;  %v3463_v0 = vrot.slane %v675_v44, 7  ;;  %1767 = vmatpush.bf16.msrb.mxu1 %v3009_v31 }
  0x4b   : > { %1709 = vmatmul.bf16.gmra.mxu1 %v3430_v13  ;;  %1729 = vmatmul.bf16.gmra.mxu2 %v3452_v55  ;;  %v356_v3 = vadd.f32 %v3190_v4, %v321_v39  ;;  %v329_v6 = vmul.f32 %v3174_v2, %v292_v43  ;;  %v477_v10 = vpack.c.bf16 %v445_v1, %v445_v1  ;;  %v269_v43 = vld [vmem:[%s3185_s10 + $0x28] sm:$0xff]  ;;  %vm766_vm3 = vsmask.f32 7424 }
  0x4c   : > { %v591_v7 = vshrl.u32 %v561_v56, 16  ;;  %v594_v9 = vshll.u32 %v561_v56, 16  ;;  %v540_v11 = vunpack.c.l.b16 %v476_v57  ;;  %v680_v12 = vor.u32 %v678_v46, %v3463_v0  ;;  %v3033_v46 = vld [vmem:[%s4248_s3 + $0x100] sm:$0xff]  ;;  %2205 = vmatpush.bf16.msra.mxu2 %v3056_v62 }
  0x4d   : > { %v357_v14 = vadd.f32 %v3190_v4, %v322_v59  ;;  %vm388_vm13 = vcmp.gt.f32.partialorder %v356_v3, 0.0  ;;  %v420_v17 = vmul.f32 0.1, %v356_v3  ;;  %v541_v22 = vunpack.c.l.b16 %v477_v10  ;;  %2034 = vmatpush.bf16.msrb.mxu0 %v3033_v46 }
  0x4e   : > { %v3477_v21 = vrot.slane %v591_v7, 7  ;;  %v330_v23 = vmul.f32 %v3174_v2, %v293_v5  ;;  %v364_v24 = vadd.f32 %v3190_v4, %v329_v6  ;;  %v3487_v33 = vsel %vm3246_vm10, 0, %v680_v12 }
  0x4f   : > { %vm389_vm14 = vcmp.gt.f32.partialorder %v357_v14, 0.0  ;;  %v421_v34 = vmul.f32 0.1, %v357_v14  ;;  %v452_v36 = vsel %vm388_vm13, %v356_v3, %v420_v17  ;;  %1749 = vmatmul.bf16.gmra.mxu3 %v3487_v33  ;;  %v566_v38 = vpack.c.b16 %v541_v22, %v540_v11 }
  0x50   : > { %v596_v37 = vor.u32 %v594_v9, %v3477_v21  ;;  %v484_v39 = vpack.c.bf16 %v452_v36, %v452_v36  ;;  %v365_v40 = vadd.f32 %v3190_v4, %v330_v23  ;;  %vm396_vm15 = vcmp.gt.f32.partialorder %v364_v24, 0.0 }
  0x51   : > { %v453_v41 = vsel %vm389_vm14, %v357_v14, %v421_v34  ;;  %v428_v42 = vmul.f32 0.1, %v364_v24  ;;  %v305_v44 = vmul.f32 %v3174_v2, %v268_v26  ;;  %v626_v48 = vshrl.u32 %v566_v38, 16  ;;  %v3064_v26 = vld [vmem:[%s4248_s3 + $0x1f8] sm:$0xff] }
  0x52   : > { %v3499_v47 = vsel %vm3246_vm10, 0, %v596_v37  ;;  %v629_v49 = vshll.u32 %v566_v38, 16  ;;  %v485_v52 = vpack.c.bf16 %v453_v41, %v453_v41  ;;  %v548_v56 = vunpack.c.l.b16 %v484_v39  ;;  %v3072_v37 = vld [vmem:[%s4248_s3 + $0x238] sm:$0xff]  ;;  %2294 = vmatpush.bf16.msra.mxu3 %v3064_v26 }
  0x53   : > { %1689 = vmatmul.bf16.gmra.mxu0 %v3499_v47  ;;  %vm397_vm0 = vcmp.gt.f32.partialorder %v365_v40, 0.0  ;;  %v429_v57 = vmul.f32 0.1, %v365_v40  ;;  %v460_v59 = vsel %vm396_vm15, %v364_v24, %v428_v42  ;;  %v3506_v63 = vrot.slane %v626_v48, 7 }
  0x54   : > { %v549_v1 = vunpack.c.l.b16 %v485_v52  ;;  %v492_v3 = vpack.c.bf16 %v460_v59, %v460_v59  ;;  %v306_v5 = vmul.f32 %v3174_v2, %v269_v43  ;;  %v340_v7 = vadd.f32 %v3190_v4, %v305_v44  ;;  %2383 = vmatpush.bf16.msra.mxu0 %v3072_v37 }
  0x55   : > { %v461_v6 = vsel %vm397_vm0, %v365_v40, %v429_v57  ;;  %v631_v9 = vor.u32 %v629_v49, %v3506_v63  ;;  %v770_v39 = vshll.u32 %v3261_v29, 16  ;;  %v749_v46 = vsel %vm3246_vm10, %v3215_v27, 0 }
  0x56   : > { %v570_v10 = vpack.c.b16 %v549_v1, %v548_v56  ;;  %v493_v11 = vpack.c.bf16 %v461_v6, %v461_v6  ;;  %v556_v12 = vunpack.c.l.b16 %v492_v3  ;;  %v341_v14 = vadd.f32 %v3190_v4, %v306_v5  ;;  %v3048_v4 = vld [vmem:[%s4248_s3 + $0x178] sm:$0xff] }
  0x57   : > { %vm372_vm1 = vcmp.gt.f32.partialorder %v340_v7, 0.0  ;;  %v404_v17 = vmul.f32 0.1, %v340_v7  ;;  %v3514_v18 = vsel %vm3246_vm10, 0, %v631_v9  ;;  %2116 = vmatpush.bf16.msra.mxu1 %v3048_v4  ;;  %v768_v56 = vshrl.u32 %v3261_v29, 16 }
  0x58   : > { %4283 = vst [vmem:[#allocation7_spill] sm:$0xff] %v3514_v18  ;;  %v654_v19 = vshrl.u32 %v570_v10, 16  ;;  %v657_v2 = vshll.u32 %v570_v10, 16  ;;  %v557_v22 = vunpack.c.l.b16 %v493_v11  ;;  %vm373_vm2 = vcmp.gt.f32.partialorder %v341_v14, 0.0 }
  0x59   : > { %v405_v23 = vmul.f32 0.1, %v341_v14  ;;  %v436_v24 = vsel %vm372_vm1, %v340_v7, %v404_v17  ;;  %v772_v62 = vrot.slane %v770_v39, 1  ;;  %v775_v1 = vshll.u32 %v749_v46, 16  ;;  %v3063_v39 = vld [vmem:[%s4248_s3 + $0x1f0] sm:$0xff] }
  0x5a   : > { %v3522_v31 = vrot.slane %v654_v19, 7  ;;  %v574_v34 = vpack.c.b16 %v557_v22, %v556_v12  ;;  %v468_v36 = vpack.c.bf16 %v436_v24, %v436_v24  ;;  %v1009_v17 = vrot.slane %v749_v46, 1  ;;  %2295 = vmatpush.bf16.msra.mxu3 %v3063_v39 }
  0x5b   : > { %1714 = vmatmul.bf16.gmra.mxu1 %v3514_v18  ;;  %v437_v38 = vsel %vm373_vm2, %v341_v14, %v405_v23  ;;  %v773_v7 = vor.u32 %v772_v62, %v768_v56  ;;  %v777_v9 = vrot.slane %v775_v1, 1  ;;  %v1008_v14 = vrot.slane %v3261_v29, 1 }
  0x5c   : > { %v659_v40 = vor.u32 %v657_v2, %v3522_v31  ;;  %v682_v41 = vshrl.u32 %v574_v34, 16  ;;  %v685_v42 = vshll.u32 %v574_v34, 16  ;;  %v469_v43 = vpack.c.bf16 %v437_v38, %v437_v38 }
  0x5d   : > { %v532_v44 = vunpack.c.l.b16 %v468_v36  ;;  %v3552_v12 = vsel %vm766_vm3, %v773_v7, %v777_v9  ;;  %vm1007_vm4 = vcmask 1046528   ;;  %v782_v19 = vshll.u32 %v3417_v54, 16  ;;  %v3055_v36 = vld [vmem:[%s4248_s3 + $0x1b0] sm:$0xff] }
  0x5e   : > { %v3535_v48 = vsel %vm3246_vm10, 0, %v659_v40  ;;  %v3537_v49 = vrot.slane %v682_v41, 7  ;;  %v533_v52 = vunpack.c.l.b16 %v469_v43  ;;  %4284 = vst [vmem:[#allocation8_spill] sm:$0xff] %v3552_v12  ;;  %v750_v2 = vsel %vm3246_vm10, %v3401_v32, 0  ;;  %2206 = vmatpush.bf16.msra.mxu2 %v3055_v36  ;;  %v3047_v40 = vld [vmem:[%s4248_s3 + $0x170] sm:$0xff] }
  0x5f   : > { %1734 = vmatmul.bf16.gmra.mxu2 %v3535_v48  ;;  %v3562_v22 = vsel %vm1007_vm4, %v1008_v14, %v1009_v17  ;;  %v780_v23 = vshrl.u32 %v3417_v54, 16  ;;  %v784_v24 = vrot.slane %v782_v19, 1  ;;  %v787_v26 = vshll.u32 %v750_v2, 16  ;;  %v3071_v41 = vld [vmem:[%s4248_s3 + $0x230] sm:$0xff]  ;;  %2117 = vmatpush.bf16.msra.mxu1 %v3047_v40  ;;  %v3054_v19 = vld [vmem:[%s4248_s3 + $0x1a8] sm:$0xff] }
  0x60   : > { %v687_v57 = vor.u32 %v685_v42, %v3537_v49  ;;  %v562_v59 = vpack.c.b16 %v533_v52, %v532_v44  ;;  %4285 = vst [vmem:[#allocation9_spill] sm:$0xff] %v3562_v22  ;;  %v1011_v37 = vrot.slane %v3417_v54, 1  ;;  %v1012_v38 = vrot.slane %v750_v2, 1  ;;  %2384 = vmatpush.bf16.msra.mxu0 %v3071_v41 }
  0x61   : > { %v785_v4 = vor.u32 %v784_v24, %v780_v23  ;;  %v789_v34 = vrot.slane %v787_v26, 1  ;;  %v794_v42 = vshll.u32 %v3499_v47, 16  ;;  %v792_v44 = vshrl.u32 %v3499_v47, 16  ;;  %v3062_v24 = vld [vmem:[%s4248_s3 + $0x1e8] sm:$0xff] }
  0x62   : > { %v3544_v3 = vsel %vm3246_vm10, 0, %v687_v57  ;;  %v598_v27 = vshrl.u32 %v562_v59, 16  ;;  %v601_v5 = vshll.u32 %v562_v59, 16  ;;  %v3586_v43 = vsel %vm1007_vm4, %v1011_v37, %v1012_v38  ;;  %2207 = vmatpush.bf16.msra.mxu2 %v3054_v19  ;;  %v3046_v26 = vld [vmem:[%s4248_s3 + $0x168] sm:$0xff]  ;;  %2296 = vmatpush.bf16.msra.mxu3 %v3062_v24 }
  0x63   : > { %1754 = vmatmul.bf16.gmra.mxu3 %v3544_v3  ;;  %v790_v32 = vsel %vm766_vm3, %v785_v4, %v789_v34  ;;  %v796_v46 = vrot.slane %v794_v42, 1  ;;  %v3070_v4 = vld [vmem:[%s4248_s3 + $0x228] sm:$0xff]  ;;  %v818_v34 = vshll.u32 %v3267_v35, 16  ;;  %v753_v36 = vsel %vm3246_vm10, %v3237_v8, 0  ;;  %2118 = vmatpush.bf16.msra.mxu1 %v3046_v26 }
  0x64   : > { %v600_v6 = vrot.slane %v598_v27, 7  ;;  %2385 = vmatpush.bf16.msra.mxu0 %v3070_v4  ;;  %v816_v37 = vshrl.u32 %v3267_v35, 16  ;;  %v823_v39 = vshll.u32 %v753_v36, 16  ;;  %v1023_v26 = vrot.slane %v3352_v50, 1 }
  0x65   : > { %v797_v56 = vor.u32 %v796_v46, %v792_v44  ;;  %v820_v38 = vrot.slane %v818_v34, 1  ;;  %v1021_v44 = vrot.slane %v753_v36, 1  ;;  %v3061_v34 = vld [vmem:[%s4248_s3 + $0x1e0] sm:$0xff] }
  0x66   : > { %v603_v10 = vor.u32 %v601_v5, %v600_v6  ;;  %v752_v27 = vsel %vm3246_vm10, %v600_v6, 0  ;;  %v825_v41 = vrot.slane %v823_v39, 1  ;;  %v3045_v36 = vld [vmem:[%s4248_s3 + $0x160] sm:$0xff]  ;;  %v755_v39 = vsel %vm3246_vm10, %v3420_v58, 0  ;;  %2297 = vmatpush.bf16.msra.mxu3 %v3061_v34 }
  0x67   : > { %v1018_v23 = vrot.slane %v752_v27, 1  ;;  %v821_v40 = vor.u32 %v820_v38, %v816_v37  ;;  %v3069_v37 = vld [vmem:[%s4248_s3 + $0x220] sm:$0xff]  ;;  %v842_v38 = vshll.u32 %v3430_v13, 16  ;;  %2119 = vmatpush.bf16.msra.mxu1 %v3045_v36  ;;  %v1027_v34 = vrot.slane %v755_v39, 1 }
  0x68   : > { %v3549_v11 = vsel %vm3246_vm10, 0, %v603_v10  ;;  %v811_v10 = vshll.u32 %v752_v27, 16  ;;  %2386 = vmatpush.bf16.msra.mxu0 %v3069_v37  ;;  %v854_v37 = vshll.u32 %v3514_v18, 16 }
  0x69   : > { %1694 = vmatmul.bf16.gmra.mxu0 %v3549_v11  ;;  %v806_v1 = vshll.u32 %v3549_v11, 16  ;;  %v804_v7 = vshrl.u32 %v3549_v11, 16  ;;  %v1017_v2 = vrot.slane %v3549_v11, 1  ;;  %v3635_v42 = vsel %vm766_vm3, %v821_v40, %v825_v41 }
  0x6a   : > { %v813_v17 = vrot.slane %v811_v10, 1 }
  0x6b   : > { %1768 = vmatmul.bf16.vlgmr.msrb.gmra.mxu1 %v3552_v12  ;;  %v808_v9 = vrot.slane %v806_v1, 1 }
  0x6d   : > { %v809_v14 = vor.u32 %v808_v9, %v804_v7 }
  0x6f   : > { %1857 = vmatmul.bf16.vlgmr.msrb.gmra.mxu2 %v3562_v22  ;;  %v3610_v6 = vsel %vm766_vm3, %v809_v14, %v813_v17 }
  0x73   : > { %1946 = vmatmul.bf16.vlgmr.msrb.gmra.mxu3 %v3417_v54  ;;  %v751_v54 = vsel %vm3246_vm10, %v3477_v21, 0  ;;  %v1014_v21 = vrot.slane %v3499_v47, 1 }
  0x74   : > { %v799_v52 = vshll.u32 %v751_v54, 16  ;;  %v1015_v62 = vrot.slane %v751_v54, 1  ;;  %v1020_v54 = vrot.slane %v3267_v35, 1 }
  0x76   : > { %v801_v57 = vrot.slane %v799_v52, 1  ;;  %v3601_v5 = vsel %vm1007_vm4, %v1014_v21, %v1015_v62  ;;  %v830_v52 = vshll.u32 %v3352_v50, 16  ;;  %v828_v21 = vshrl.u32 %v3352_v50, 16 }
  0x78   : > { %v3592_v59 = vsel %vm766_vm3, %v797_v56, %v801_v57  ;;  %v754_v56 = vsel %vm3246_vm10, %v3305_v61, 0  ;;  %v3649_v57 = vsel %vm1007_vm4, %v1020_v54, %v1021_v44  ;;  %v832_v62 = vrot.slane %v830_v52, 1  ;;  %v3053_v61 = vld [vmem:[%s4248_s3 + $0x1a0] sm:$0xff] }
  0x79   : > { %2035 = vmatmul.bf16.vlgmr.msrb.gmra.mxu0 %v790_v32  ;;  %v835_v1 = vshll.u32 %v754_v56, 16  ;;  %2208 = vmatpush.bf16.msra.mxu2 %v3053_v61  ;;  %v1024_v4 = vrot.slane %v754_v56, 1  ;;  %v840_v54 = vshrl.u32 %v3430_v13, 16  ;;  %v844_v44 = vrot.slane %v842_v38, 1 }
  0x7a   : > { %v833_v10 = vor.u32 %v832_v62, %v828_v21  ;;  %v847_v52 = vshll.u32 %v755_v39, 16  ;;  %v756_v38 = vsel %vm3246_vm10, %v3506_v63, 0 }
  0x7b   : > { %1773 = vmatmul.bf16.gmra.mxu1 %v790_v32  ;;  %v3629_v32 = vsel %vm1007_vm4, %v1017_v2, %v1018_v23  ;;  %v837_v14 = vrot.slane %v835_v1, 1  ;;  %v3691_v40 = vsel %vm1007_vm4, %v1023_v26, %v1024_v4  ;;  %v845_v58 = vor.u32 %v844_v44, %v840_v54 }
  0x7c   : > { %4289 = vst [vmem:[#allocation13_spill] sm:$0xff] %v3691_v40  ;;  %v849_v1 = vrot.slane %v847_v52, 1  ;;  %v1026_v4 = vrot.slane %v3430_v13, 1  ;;  %v852_v44 = vshrl.u32 %v3514_v18, 16  ;;  %v856_v52 = vrot.slane %v854_v37, 1 }
  0x7d   : > { %v3666_v19 = vsel %vm766_vm3, %v833_v10, %v837_v14 }
  0x7e   : > { %4287 = vst [vmem:[#allocation11_spill] sm:$0xff] %v3666_v19  ;;  %v3705_v10 = vsel %vm766_vm3, %v845_v58, %v849_v1  ;;  %v3723_v54 = vsel %vm1007_vm4, %v1026_v4, %v1027_v34  ;;  %v859_v58 = vshll.u32 %v756_v38, 16  ;;  %v857_v12 = vor.u32 %v856_v52, %v852_v44  ;;  %v3052_v34 = vld [vmem:[%s4248_s3 + $0x198] sm:$0xff] }
  0x7f   : > { %1862 = vmatmul.bf16.gmra.mxu2 %v3586_v43  ;;  %4291 = vst [vmem:[#allocation15_spill] sm:$0xff] %v3705_v10  ;;  %v3060_v44 = vld [vmem:[%s4248_s3 + $0x1d8] sm:$0xff]  ;;  %v757_v52 = vsel %vm3246_vm10, %v3241_v16, 0 }
  0x80   : > { %4293 = vst [vmem:[#allocation17_spill] sm:$0xff] %v3723_v54  ;;  %v861_v29 = vrot.slane %v859_v58, 1  ;;  %2209 = vmatpush.bf16.msra.mxu2 %v3052_v34  ;;  %2298 = vmatpush.bf16.msra.mxu3 %v3060_v44 }
  0x82   : > { %v3737_v4 = vsel %vm766_vm3, %v857_v12, %v861_v29  ;;  %v3044_v29 = vld [vmem:[%s4248_s3 + $0x158] sm:$0xff]  ;;  %v866_v12 = vshll.u32 %v3281_v45, 16 }
  0x83   : > { %1951 = vmatmul.bf16.gmra.mxu3 %v3499_v47  ;;  %4295 = vst [vmem:[#allocation19_spill] sm:$0xff] %v3737_v4  ;;  %2120 = vmatpush.bf16.msra.mxu1 %v3044_v29 }
  0x89   : > { %2040 = vmatmul.bf16.gmra.mxu0 %v3592_v59 }
  0x8b   : > { %1778 = vmatmul.bf16.gmra.mxu1 %v3592_v59 }
  0x8f   : > { %1867 = vmatmul.bf16.gmra.mxu2 %v3601_v5 }
  0x93   : > { %1956 = vmatmul.bf16.gmra.mxu3 %v3549_v11 }
  0x99   : > { %2045 = vmatmul.bf16.gmra.mxu0 %v3610_v6 }
  0x9b   : > { %1783 = vmatmul.bf16.gmra.mxu1 %v3610_v6 }
  0x9f   : > { %1872 = vmatmul.bf16.gmra.mxu2 %v3629_v32 }
  0xa3   : > { %1961 = vmatmul.bf16.gmra.mxu3 %v3267_v35 }
  0xa8   : > { %v3637_v8 = vpop.f32.mrf.mxu1 }
  0xa9   : > { %2050 = vmatmul.bf16.gmra.mxu0 %v3635_v42 }
  0xaa   : > { %v3641_v46 = vpop.f32.mrf.mxu0 }
  0xab   : > { %1788 = vmatmul.bf16.gmra.mxu1 %v3635_v42 }
  0xae   : > { %v3652_v27 = vpop.f32.mrf.mxu2 }
  0xaf   : > { %1877 = vmatmul.bf16.gmra.mxu2 %v3649_v57  ;;  %v3655_v7 = vpop.f32.mrf.mxu3 }
  0xb0   : > { %4286 = vst [vmem:[#allocation10_spill] sm:$0xff] %v3655_v7  ;;  %v3657_v9 = vpop.f32.mrf.mxu1 }
  0xb2   : > { %v3663_v17 = vpop.f32.mrf.mxu0 }
  0xb3   : > { %1966 = vmatmul.bf16.gmra.mxu3 %v3352_v50 }
  0xb6   : > { %v3668_v2 = vpop.f32.mrf.mxu2 }
  0xb7   : > { %v3670_v23 = vpop.f32.mrf.mxu3 }
  0xb8   : > { %4288 = vst [vmem:[#allocation12_spill] sm:$0xff] %v3670_v23  ;;  %v3672_v24 = vpop.f32.mrf.mxu1 }
  0xb9   : > { %2055 = vmatmul.bf16.gmra.mxu0 %v3666_v19 }
  0xbb   : > { %1793 = vmatmul.bf16.gmra.mxu1 %v3666_v19 }
  0xbd   : > { %v3693_v41 = vpop.f32.mrf.mxu0 }
  0xbe   : > { %v3696_v56 = vpop.f32.mrf.mxu2 }
  0xbf   : > { %1882 = vmatmul.bf16.gmra.mxu2 %v3691_v40  ;;  %v3699_v21 = vpop.f32.mrf.mxu3  ;;  %v878_v40 = vshll.u32 %v3366_v60, 16 }
  0xc0   : > { %4290 = vst [vmem:[#allocation14_spill] sm:$0xff] %v3699_v21  ;;  %v3701_v62 = vpop.f32.mrf.mxu1  ;;  %v1030_v21 = vrot.slane %v756_v38, 1 }
  0xc3   : > { %1971 = vmatmul.bf16.gmra.mxu3 %v3430_v13 }
  0xc5   : > { %v3709_v61 = vpop.f32.mrf.mxu0 }
  0xc6   : > { %v3707_v14 = vpop.f32.mrf.mxu2 }
  0xc7   : > { %v3715_v36 = vpop.f32.mrf.mxu3 }
  0xc8   : > { %v3711_v26 = vpop.f32.mrf.mxu1  ;;  %4292 = vst [vmem:[#allocation16_spill] sm:$0xff] %v3715_v36 }
  0xc9   : > { %2060 = vmatmul.bf16.gmra.mxu0 %v3705_v10 }
  0xcb   : > { %1798 = vmatmul.bf16.gmra.mxu1 %v3705_v10  ;;  %v871_v10 = vshll.u32 %v757_v52, 16 }
  0xcd   : > { %v873_v13 = vrot.slane %v871_v10, 1 }
  0xce   : > { %v3726_v39 = vpop.f32.mrf.mxu2 }
  0xcf   : > { %1887 = vmatmul.bf16.gmra.mxu2 %v3723_v54  ;;  %v1029_v54 = vrot.slane %v3514_v18, 1 }
  0xd0   : > { %v3729_v1 = vpop.f32.mrf.mxu1  ;;  %v3731_v22 = vpop.f32.mrf.mxu0 }
  0xd1   : > { %v3764_v34 = vsel %vm1007_vm4, %v1029_v54, %v1030_v21  ;;  %v3779_v21 = vld [vmem:[%s4249_s4] ss:$0 sm:$0xff] }
  0xd2   : > { %v3734_v63 = vpop.f32.mrf.mxu3  ;;  %4297 = vst [vmem:[#allocation21_spill] sm:$0xff] %v3764_v34 }
  0xd3   : > { %1976 = vmatmul.bf16.gmra.mxu3 %v3514_v18  ;;  %4294 = vst [vmem:[#allocation18_spill] sm:$0xff] %v3734_v63  ;;  %v864_v63 = vshrl.u32 %v3281_v45, 16  ;;  %v868_v18 = vrot.slane %v866_v12, 1 }
  0xd5   : > { %v869_v44 = vor.u32 %v868_v18, %v864_v63  ;;  %v1681_v18 = vadd.f32 %v3779_v21, %v3641_v46  ;;  %v1032_v63 = vrot.slane %v3281_v45, 1 }
  0xd6   : > { %v3742_v37 = vpop.f32.mrf.mxu2 }
  0xd7   : > { %v3784_v29 = vsel %vm766_vm3, %v869_v44, %v873_v13  ;;  %v758_v13 = vsel %vm3246_vm10, %v3329_v25, 0 }
  0xd8   : > { %v3744_v36 = vpop.f32.mrf.mxu1  ;;  %v3759_v38 = vpop.f32.mrf.mxu0  ;;  %4298 = vst [vmem:[#allocation22_spill] sm:$0xff] %v3784_v29 }
  0xd9   : > { %2065 = vmatmul.bf16.gmra.mxu0 %v3737_v4 }
  0xda   : > { %v3761_v58 = vpop.f32.mrf.mxu3 }
  0xdb   : > { %1803 = vmatmul.bf16.gmra.mxu1 %v3737_v4  ;;  %4296 = vst [vmem:[#allocation20_spill] sm:$0xff] %v3761_v58  ;;  %v3068_v4 = vld [vmem:[%s4248_s3 + $0x218] sm:$0xff] }
  0xdc   : > { %2387 = vmatpush.bf16.msra.mxu0 %v3068_v4  ;;  %v1033_v4 = vrot.slane %v757_v52, 1  ;;  %v876_v52 = vshrl.u32 %v3366_v60, 16 }
  0xde   : > { %v3800_v44 = vsel %vm1007_vm4, %v1032_v63, %v1033_v4 }
  0xdf   : > { %1892 = vmatmul.bf16.gmra.mxu2 %v3764_v34  ;;  %4301 = vst [vmem:[#allocation25_spill] sm:$0xff] %v3800_v44 }
  0xe0   : > { %v3771_v16 = vpop.f32.mrf.mxu1 }
  0xe2   : > { %v3773_v58 = vpop.f32.mrf.mxu2 }
  0xe3   : > { %1981 = vmatmul.bf16.gmra.mxu3 %v3281_v45 }
  0xe6   : > { %v3781_v54 = vpop.f32.mrf.mxu0  ;;  %v3786_v12 = vpop.f32.mrf.mxu3 }
  0xe7   : > { %4299 = vst [vmem:[#allocation23_spill] sm:$0xff] %v3786_v12 }
  0xe8   : > { %v1769_v10 = vpop.f32.mrf.mxu1 }
  0xe9   : > { %2070 = vmatmul.bf16.gmra.mxu0 %v3784_v29  ;;  %v1770_v34 = vadd.f32 %v1769_v10, %v1681_v18  ;;  %v880_v18 = vrot.slane %v878_v40, 1  ;;  %v883_v10 = vshll.u32 %v758_v13, 16  ;;  %v1683_v40 = vadd.f32 %v3779_v21, %v3663_v17  ;;  %v3043_v17 = vld [vmem:[%s4248_s3 + $0x150] sm:$0xff] }
  0xea   : > { %v3792_v23 = vpop.f32.mrf.mxu2  ;;  %2121 = vmatpush.bf16.msra.mxu1 %v3043_v17 }
  0xeb   : > { %4300 = vst [vmem:[#allocation24_spill] sm:$0xff] %v3792_v23  ;;  %1808 = vmatmul.bf16.gmra.mxu1 %v3784_v29  ;;  %v881_v7 = vor.u32 %v880_v18, %v876_v52  ;;  %v885_v29 = vrot.slane %v883_v10, 1  ;;  %v1686_v52 = vadd.f32 %v3779_v21, %v3693_v41 }
  0xed   : > { %v3810_v63 = vsel %vm766_vm3, %v881_v7, %v885_v29  ;;  %v3059_v29 = vld [vmem:[%s4248_s3 + $0x1d0] sm:$0xff] }
  0xee   : > { %v3802_v46 = vpop.f32.mrf.mxu0  ;;  %v3804_v12 = vpop.f32.mrf.mxu3  ;;  %4303 = vst [vmem:[#allocation27_spill] sm:$0xff] %v3810_v63  ;;  %2299 = vmatpush.bf16.msra.mxu3 %v3059_v29 }
  0xef   : > { %4302 = vst [vmem:[#allocation26_spill] sm:$0xff] %v3804_v12  ;;  %1897 = vmatmul.bf16.gmra.mxu2 %v3800_v44  ;;  %v3051_v12 = vld [vmem:[%s4248_s3 + $0x190] sm:$0xff]  ;;  %v1035_v44 = vrot.slane %v3366_v60, 1 }
  0xf0   : > { %v1771_v45 = vpop.f32.mrf.mxu1  ;;  %2210 = vmatpush.bf16.msra.mxu2 %v3051_v12 }
  0xf1   : > { %v1772_v7 = vadd.f32 %v1771_v45, %v1683_v40  ;;  %v759_v45 = vsel %vm3246_vm10, %v3437_v30, 0 }
  0xf2   : > { %v1858_v19 = vpop.f32.mrf.mxu2 }
  0xf3   : > { %1986 = vmatmul.bf16.gmra.mxu3 %v3366_v60  ;;  %v1859_v25 = vadd.f32 %v1858_v19, %v1770_v34  ;;  %v1036_v19 = vrot.slane %v758_v13, 1 }
  0xf5   : > { %v3835_v12 = vsel %vm1007_vm4, %v1035_v44, %v1036_v19 }
  0xf6   : > { %v2036_v50 = vpop.f32.mrf.mxu0  ;;  %v1947_v4 = vpop.f32.mrf.mxu3 }
  0xf7   : > { %v1948_v18 = vadd.f32 %v1947_v4, %v1859_v25  ;;  %v890_v25 = vshll.u32 %v3452_v55, 16 }
  0xf8   : > { %v1774_v10 = vpop.f32.mrf.mxu1 }
  0xf9   : > { %2075 = vmatmul.bf16.gmra.mxu0 %v3810_v63  ;;  %v1775_v34 = vadd.f32 %v1774_v10, %v1686_v52  ;;  %v3827_v23 = vadd.f32 %v2036_v50, %v1948_v18  ;;  %v888_v50 = vshrl.u32 %v3452_v55, 16  ;;  %v892_v52 = vrot.slane %v890_v25, 1  ;;  %v3067_v10 = vld [vmem:[%s4248_s3 + $0x210] sm:$0xff] }
  0xfa   : > { %v1860_v41 = vpop.f32.mrf.mxu2  ;;  %v895_v18 = vshll.u32 %v759_v45, 16  ;;  %2388 = vmatpush.bf16.msra.mxu0 %v3067_v10 }
  0xfb   : > { %4304 = vst [vmem:[#allocation28_spill] sm:$0xff] %v3827_v23  ;;  %v1861_v4 = vadd.f32 %v1860_v41, %v1772_v7  ;;  %1813 = vmatmul.bf16.gmra.mxu1 %v3810_v63  ;;  %v893_v44 = vor.u32 %v892_v52, %v888_v50  ;;  %v1038_v50 = vrot.slane %v3452_v55, 1  ;;  %v1039_v52 = vrot.slane %v759_v45, 1 }
  0xfc   : > { %v897_v19 = vrot.slane %v895_v18, 1 }
  0xfe   : > { %v2038_v13 = vpop.f32.mrf.mxu0  ;;  %v1949_v40 = vpop.f32.mrf.mxu3  ;;  %v3846_v25 = vsel %vm766_vm3, %v893_v44, %v897_v19  ;;  %v902_v19 = vshll.u32 %v3535_v48, 16 }
  0xff   : > { %v1950_v7 = vadd.f32 %v1949_v40, %v1861_v4  ;;  %1902 = vmatmul.bf16.gmra.mxu2 %v3835_v12  ;;  %v1688_v4 = vadd.f32 %v3779_v21, %v3709_v61  ;;  %v1691_v40 = vadd.f32 %v3779_v21, %v3731_v22  ;;  %v760_v22 = vsel %vm3246_vm10, %v3522_v31, 0 }
 0x100   : > { %v1776_v41 = vpop.f32.mrf.mxu1  ;;  %v3862_v61 = vsel %vm1007_vm4, %v1038_v50, %v1039_v52 }
 0x101   : > { %v3842_v30 = vadd.f32 %v2038_v13, %v1950_v7  ;;  %v1777_v18 = vadd.f32 %v1776_v41, %v1688_v4  ;;  %v900_v41 = vshrl.u32 %v3535_v48, 16  ;;  %v1693_v4 = vadd.f32 %v3779_v21, %v3759_v38  ;;  %v3050_v38 = vld [vmem:[%s4248_s3 + $0x188] sm:$0xff] }
 0x102   : > { %v1863_v29 = vpop.f32.mrf.mxu2  ;;  %2211 = vmatpush.bf16.msra.mxu2 %v3050_v38 }
 0x103   : > { %4305 = vst [vmem:[#allocation29_spill] sm:$0xff] %v3842_v30  ;;  %1991 = vmatmul.bf16.gmra.mxu3 %v3452_v55  ;;  %v1864_v17 = vadd.f32 %v1863_v29, %v1775_v34 }
 0x106   : > { %v2041_v23 = vpop.f32.mrf.mxu0  ;;  %v1952_v63 = vpop.f32.mrf.mxu3 }
 0x107   : > { %v1953_v10 = vadd.f32 %v1952_v63, %v1864_v17  ;;  %v904_v17 = vrot.slane %v902_v19, 1 }
 0x108   : > { %v1779_v13 = vpop.f32.mrf.mxu1 }
 0x109   : > { %2080 = vmatmul.bf16.gmra.mxu0 %v3846_v25  ;;  %v1780_v34 = vadd.f32 %v1779_v13, %v1691_v40  ;;  %v3854_v7 = vadd.f32 %v2041_v23, %v1953_v10  ;;  %v907_v23 = vshll.u32 %v760_v22, 16  ;;  %v905_v31 = vor.u32 %v904_v17, %v900_v41 }
 0x10a   : > { %v1865_v44 = vpop.f32.mrf.mxu2  ;;  %v1041_v41 = vrot.slane %v3535_v48, 1  ;;  %v1042_v17 = vrot.slane %v760_v22, 1  ;;  %v761_v22 = vsel %vm3246_vm10, %v3256_v28, 0 }
 0x10b   : > { %4306 = vst [vmem:[#allocation30_spill] sm:$0xff] %v3854_v7  ;;  %v1866_v29 = vadd.f32 %v1865_v44, %v1777_v18  ;;  %1818 = vmatmul.bf16.gmra.mxu1 %v3846_v25  ;;  %v909_v44 = vrot.slane %v907_v23, 1  ;;  %v3058_v23 = vld [vmem:[%s4248_s3 + $0x1c8] sm:$0xff]  ;;  %v919_v38 = vshll.u32 %v761_v22, 16 }
 0x10c   : > { %2300 = vmatpush.bf16.msra.mxu3 %v3058_v23 }
 0x10d   : > { %v3872_v19 = vsel %vm766_vm3, %v905_v31, %v909_v44  ;;  %v3895_v31 = vsel %vm1007_vm4, %v1041_v41, %v1042_v17  ;;  %v921_v23 = vrot.slane %v919_v38, 1 }
 0x10e   : > { %v2043_v63 = vpop.f32.mrf.mxu0  ;;  %v1954_v45 = vpop.f32.mrf.mxu3 }
 0x10f   : > { %v1955_v40 = vadd.f32 %v1954_v45, %v1866_v29  ;;  %1907 = vmatmul.bf16.gmra.mxu2 %v3862_v61  ;;  %v1696_v29 = vadd.f32 %v3779_v21, %v3781_v54 }
 0x110   : > { %v1781_v10 = vpop.f32.mrf.mxu1 }
 0x111   : > { %v1782_v13 = vadd.f32 %v1781_v10, %v1693_v4  ;;  %v3868_v18 = vadd.f32 %v2043_v63, %v1955_v40  ;;  %v3042_v4 = vld [vmem:[%s4248_s3 + $0x148] sm:$0xff] }
 0x112   : > { %v1868_v50 = vpop.f32.mrf.mxu2  ;;  %2122 = vmatpush.bf16.msra.mxu1 %v3042_v4 }
 0x113   : > { %1996 = vmatmul.bf16.gmra.mxu3 %v3535_v48  ;;  %v1869_v52 = vadd.f32 %v1868_v50, %v1780_v34 }
 0x116   : > { %v2046_v7 = vpop.f32.mrf.mxu0  ;;  %v1957_v30 = vpop.f32.mrf.mxu3 }
 0x117   : > { %v1958_v63 = vadd.f32 %v1957_v30, %v1869_v52  ;;  %v914_v30 = vshll.u32 %v3291_v51, 16 }
 0x118   : > { %v1784_v45 = vpop.f32.mrf.mxu1 }
 0x119   : > { %2085 = vmatmul.bf16.gmra.mxu0 %v3872_v19  ;;  %v1785_v34 = vadd.f32 %v1784_v45, %v1696_v29  ;;  %v3887_v40 = vadd.f32 %v2046_v7, %v1958_v63  ;;  %v912_v7 = vshrl.u32 %v3291_v51, 16  ;;  %v916_v52 = vrot.slane %v914_v30, 1 }
 0x11a   : > { %v1870_v54 = vpop.f32.mrf.mxu2  ;;  %v1698_v29 = vadd.f32 %v3779_v21, %v3802_v46 }
 0x11b   : > { %4307 = vst [vmem:[#allocation31_spill] sm:$0xff] %v3887_v40  ;;  %v1871_v10 = vadd.f32 %v1870_v54, %v1782_v13  ;;  %1823 = vmatmul.bf16.gmra.mxu1 %v3872_v19  ;;  %v3066_v13 = vld [vmem:[%s4248_s3 + $0x208] sm:$0xff]  ;;  %v917_v17 = vor.u32 %v916_v52, %v912_v7  ;;  %v1045_v7 = vrot.slane %v761_v22, 1  ;;  %v295_v22 = vld [vmem:[%s3185_s10 + $0xf8] sm:$0xff] }
 0x11c   : > { %2389 = vmatpush.bf16.msra.mxu0 %v3066_v13 }
 0x11d   : > { %v3908_v40 = vsel %vm766_vm3, %v917_v17, %v921_v23  ;;  %v294_v17 = vld [vmem:[%s3185_s10 + $0xf0] sm:$0xff] }
 0x11e   : > { %v2048_v44 = vpop.f32.mrf.mxu0  ;;  %v1959_v50 = vpop.f32.mrf.mxu3  ;;  %4309 = vst [vmem:[#allocation33_spill] sm:$0xff] %v3908_v40 }
 0x11f   : > { %v1960_v63 = vadd.f32 %v1959_v50, %v1871_v10  ;;  %1912 = vmatmul.bf16.gmra.mxu2 %v3895_v31  ;;  %v1701_v10 = vadd.f32 %v3779_v21, %v3637_v8  ;;  %v762_v8 = vsel %vm3246_vm10, %v3354_v53, 0  ;;  %v3109_v53 = vld [vmem:[%s4246_s1] ss:$0 sm:$0xff] }
 0x120   : > { %v1786_v28 = vpop.f32.mrf.mxu1 }
 0x121   : > { %v1787_v45 = vadd.f32 %v1786_v28, %v1698_v29  ;;  %v3904_v41 = vadd.f32 %v2048_v44, %v1960_v63  ;;  %v1044_v44 = vrot.slane %v3291_v51, 1  ;;  %v926_v29 = vshll.u32 %v3384_v15, 16 }
 0x122   : > { %v1873_v4 = vpop.f32.mrf.mxu2 }
 0x123   : > { %4308 = vst [vmem:[#allocation32_spill] sm:$0xff] %v3904_v41  ;;  %2001 = vmatmul.bf16.gmra.mxu3 %v3291_v51  ;;  %v1874_v54 = vadd.f32 %v1873_v4, %v1785_v34  ;;  %v3922_v28 = vsel %vm1007_vm4, %v1044_v44, %v1045_v7  ;;  %v332_v44 = vmul.f32 %v3109_v53, %v295_v22  ;;  %v3049_v22 = vld [vmem:[%s4248_s3 + $0x180] sm:$0xff] }
 0x124   : > { %4311 = vst [vmem:[#allocation35_spill] sm:$0xff] %v3922_v28  ;;  %2212 = vmatpush.bf16.msra.mxu2 %v3049_v22  ;;  %v936_v22 = vshrl.u32 %v3487_v33, 16 }
 0x126   : > { %v2051_v30 = vpop.f32.mrf.mxu0  ;;  %v1962_v46 = vpop.f32.mrf.mxu3 }
 0x127   : > { %v1963_v50 = vadd.f32 %v1962_v46, %v1874_v54  ;;  %v924_v54 = vshrl.u32 %v3384_v15, 16  ;;  %v931_v46 = vshll.u32 %v762_v8, 16 }
 0x128   : > { %v1789_v13 = vpop.f32.mrf.mxu1 }
 0x129   : > { %2090 = vmatmul.bf16.gmra.mxu0 %v3908_v40  ;;  %v1790_v52 = vadd.f32 %v1789_v13, %v1701_v10  ;;  %v3914_v38 = vadd.f32 %v2051_v30, %v1963_v50  ;;  %v928_v30 = vrot.slane %v926_v29, 1  ;;  %v331_v13 = vmul.f32 %v3109_v53, %v294_v17 }
 0x12a   : > { %v1875_v34 = vpop.f32.mrf.mxu2  ;;  %v933_v41 = vrot.slane %v931_v46, 1  ;;  %v1048_v46 = vrot.slane %v762_v8, 1  ;;  %v938_v8 = vshll.u32 %v3487_v33, 16 }
 0x12b   : > { %4310 = vst [vmem:[#allocation34_spill] sm:$0xff] %v3914_v38  ;;  %v1876_v63 = vadd.f32 %v1875_v34, %v1787_v45  ;;  %1828 = vmatmul.bf16.gmra.mxu1 %v3908_v40  ;;  %v1703_v45 = vadd.f32 %v3779_v21, %v3657_v9  ;;  %v929_v38 = vor.u32 %v928_v30, %v924_v54  ;;  %v3110_v9 = vld [vmem:[%s4247_s2] ss:$0 sm:$0xff]  ;;  %v1047_v30 = vrot.slane %v3384_v15, 1 }
 0x12d   : > { %v3940_v51 = vsel %vm766_vm3, %v929_v38, %v933_v41  ;;  %v3057_v38 = vld [vmem:[%s4248_s3 + $0x1c0] sm:$0xff] }
 0x12e   : > { %v2053_v23 = vpop.f32.mrf.mxu0  ;;  %v1964_v4 = vpop.f32.mrf.mxu3  ;;  %2301 = vmatpush.bf16.msra.mxu3 %v3057_v38 }
 0x12f   : > { %v1965_v10 = vadd.f32 %v1964_v4, %v1876_v63  ;;  %1917 = vmatmul.bf16.gmra.mxu2 %v3922_v28  ;;  %v366_v63 = vadd.f32 %v3110_v9, %v331_v13  ;;  %v367_v4 = vadd.f32 %v3110_v9, %v332_v44  ;;  %v763_v13 = vsel %vm3246_vm10, %v3463_v0, 0 }
 0x130   : > { %v1791_v50 = vpop.f32.mrf.mxu1  ;;  %v3963_v44 = vsel %vm1007_vm4, %v1047_v30, %v1048_v46  ;;  %v1708_v0 = vadd.f32 %v3779_v21, %v3701_v62 }
 0x131   : > { %v1792_v7 = vadd.f32 %v1791_v50, %v1703_v45  ;;  %v3933_v34 = vadd.f32 %v2053_v23, %v1965_v10  ;;  %v1706_v23 = vadd.f32 %v3779_v21, %v3672_v24  ;;  %v430_v45 = vmul.f32 0.1, %v366_v63  ;;  %v3041_v50 = vld [vmem:[%s4248_s3 + $0x140] sm:$0xff] }
 0x132   : > { %v1878_v29 = vpop.f32.mrf.mxu2  ;;  %v431_v10 = vmul.f32 0.1, %v367_v4  ;;  %vm398_vm5 = vcmp.gt.f32.partialorder %v366_v63, 0.0  ;;  %vm399_vm7 = vcmp.gt.f32.partialorder %v367_v4, 0.0  ;;  %2123 = vmatpush.bf16.msra.mxu1 %v3041_v50 }
 0x133   : > { %4312 = vst [vmem:[#allocation36_spill] sm:$0xff] %v3933_v34  ;;  %2006 = vmatmul.bf16.gmra.mxu3 %v3384_v15  ;;  %v1879_v40 = vadd.f32 %v1878_v29, %v1790_v52  ;;  %v462_v29 = vsel %vm398_vm5, %v366_v63, %v430_v45 }
 0x134   : > { %v463_v9 = vsel %vm399_vm7, %v367_v4, %v431_v10  ;;  %v494_v30 = vpack.c.bf16 %v462_v29, %v462_v29  ;;  %v1711_v29 = vadd.f32 %v3779_v21, %v3711_v26  ;;  %v764_v26 = vsel %vm3246_vm10, %v3537_v49, 0 }
 0x135   : > { %v495_v46 = vpack.c.bf16 %v463_v9, %v463_v9 }
 0x136   : > { %v2056_v28 = vpop.f32.mrf.mxu0  ;;  %v1967_v17 = vpop.f32.mrf.mxu3 }
 0x137   : > { %v1968_v54 = vadd.f32 %v1967_v17, %v1879_v40 }
 0x138   : > { %v1794_v52 = vpop.f32.mrf.mxu1 }
 0x139   : > { %2095 = vmatmul.bf16.gmra.mxu0 %v3940_v51  ;;  %v1795_v41 = vadd.f32 %v1794_v52, %v1706_v23  ;;  %v3955_v24 = vadd.f32 %v2056_v28, %v1968_v54  ;;  %v940_v23 = vrot.slane %v938_v8, 1  ;;  %v943_v54 = vshll.u32 %v763_v13, 16 }
 0x13a   : > { %v1880_v40 = vpop.f32.mrf.mxu2  ;;  %v558_v8 = vunpack.c.l.b16 %v494_v30 }
 0x13b   : > { %4313 = vst [vmem:[#allocation37_spill] sm:$0xff] %v3955_v24  ;;  %v1881_v53 = vadd.f32 %v1880_v40, %v1792_v7  ;;  %1833 = vmatmul.bf16.gmra.mxu1 %v3940_v51  ;;  %v3065_v7 = vld [vmem:[%s4248_s3 + $0x200] sm:$0xff]  ;;  %v941_v10 = vor.u32 %v940_v23, %v936_v22  ;;  %v945_v38 = vrot.slane %v943_v54, 1  ;;  %v559_v24 = vunpack.c.l.b16 %v495_v46 }
 0x13c   : > { %2390 = vmatpush.bf16.msra.mxu0 %v3065_v7  ;;  %v1050_v22 = vrot.slane %v3487_v33, 1  ;;  %v1051_v23 = vrot.slane %v763_v13, 1 }
 0x13d   : > { %v3976_v62 = vsel %vm766_vm3, %v941_v10, %v945_v38  ;;  %v955_v10 = vshll.u32 %v764_v26, 16  ;;  %v1713_v38 = vadd.f32 %v3779_v21, %v3729_v1 }
 0x13e   : > { %v2058_v17 = vpop.f32.mrf.mxu0  ;;  %v1969_v28 = vpop.f32.mrf.mxu3  ;;  %v3990_v30 = vsel %vm1007_vm4, %v1050_v22, %v1051_v23 }
 0x13f   : > { %v1970_v52 = vadd.f32 %v1969_v28, %v1881_v53  ;;  %1922 = vmatmul.bf16.gmra.mxu2 %v3963_v44  ;;  %v575_v28 = vpack.c.b16 %v559_v24, %v558_v8 }
 0x140   : > { %v1796_v63 = vpop.f32.mrf.mxu1 }
 0x141   : > { %v1797_v4 = vadd.f32 %v1796_v63, %v1708_v0  ;;  %v3972_v45 = vadd.f32 %v2058_v17, %v1970_v52  ;;  %v950_v0 = vshll.u32 %v3544_v3, 16  ;;  %v689_v24 = vshrl.u32 %v575_v28, 16 }
 0x142   : > { %v1883_v50 = vpop.f32.mrf.mxu2  ;;  %v948_v63 = vshrl.u32 %v3544_v3, 16 }
 0x143   : > { %2011 = vmatmul.bf16.gmra.mxu3 %v3487_v33  ;;  %v1884_v40 = vadd.f32 %v1883_v50, %v1795_v41  ;;  %v691_v50 = vrot.slane %v689_v24, 7 }
 0x146   : > { %v2061_v34 = vpop.f32.mrf.mxu0  ;;  %v1972_v53 = vpop.f32.mrf.mxu3 }
 0x147   : > { %v1973_v9 = vadd.f32 %v1972_v53, %v1884_v40  ;;  %v692_v40 = vshll.u32 %v575_v28, 16 }
 0x148   : > { %v1799_v17 = vpop.f32.mrf.mxu1 }
 0x149   : > { %2100 = vmatmul.bf16.gmra.mxu0 %v3976_v62  ;;  %v1800_v54 = vadd.f32 %v1799_v17, %v1711_v29  ;;  %v3982_v41 = vadd.f32 %v2061_v34, %v1973_v9  ;;  %v952_v34 = vrot.slane %v950_v0, 1  ;;  %v957_v9 = vrot.slane %v955_v10, 1 }
 0x14a   : > { %v1885_v7 = vpop.f32.mrf.mxu2  ;;  %v694_v23 = vor.u32 %v692_v40, %v691_v50 }
 0x14b   : > { %v1886_v52 = vadd.f32 %v1885_v7, %v1797_v4  ;;  %1838 = vmatmul.bf16.gmra.mxu1 %v3976_v62  ;;  %v953_v29 = vor.u32 %v952_v34, %v948_v63  ;;  %v1054_v63 = vrot.slane %v764_v26, 1 }
 0x14c   : > { %v4006_v24 = vsel %vm3246_vm10, 0, %v694_v23 }
 0x14d   : > { %v4000_v0 = vsel %vm766_vm3, %v953_v29, %v957_v9  ;;  %v1073_v29 = vshrl.u32 %v4006_v24, 16 }
 0x14e   : > { %v2063_v13 = vpop.f32.mrf.mxu0  ;;  %v1974_v46 = vpop.f32.mrf.mxu3 }
 0x14f   : > { %v1975_v4 = vadd.f32 %v1974_v46, %v1886_v52  ;;  %1927 = vmatmul.bf16.gmra.mxu2 %v3990_v30  ;;  %v1716_v52 = vadd.f32 %v3779_v21, %v3744_v36  ;;  %v1053_v46 = vrot.slane %v3544_v3, 1  ;;  %v4016_v36 = vsel %vm3246_vm10, %v691_v50, 0 }
 0x150   : > { %v1801_v8 = vpop.f32.mrf.mxu1 }
 0x151   : > { %v1802_v49 = vadd.f32 %v1801_v8, %v1713_v38  ;;  %v3996_v53 = vadd.f32 %v2063_v13, %v1975_v4  ;;  %v1075_v38 = vshll.u32 %v4006_v24, 16  ;;  %v4019_v40 = vsel %vm1007_vm4, %v1053_v46, %v1054_v63 }
 0x152   : > { %v1888_v17 = vpop.f32.mrf.mxu2 }
 0x153   : > { %2016 = vmatmul.bf16.gmra.mxu3 %v3544_v3  ;;  %v1889_v22 = vadd.f32 %v1888_v17, %v1800_v54  ;;  %v1077_v9 = vrot.slane %v1075_v38, 1  ;;  %v1080_v17 = vshll.u32 %v4016_v36, 16 }
 0x156   : > { %v2066_v7 = vpop.f32.mrf.mxu0  ;;  %v1977_v1 = vpop.f32.mrf.mxu3 }
 0x157   : > { %v1978_v28 = vadd.f32 %v1977_v1, %v1889_v22  ;;  %v1718_v22 = vadd.f32 %v3779_v21, %v3771_v16  ;;  %v1082_v1 = vrot.slane %v1080_v17, 1  ;;  %v1721_v16 = vadd.f32 %v3779_v21, %v3652_v27 }
 0x158   : > { %v1804_v13 = vpop.f32.mrf.mxu1  ;;  %v1723_v17 = vadd.f32 %v3779_v21, %v3668_v2 }
 0x159   : > { %2105 = vmatmul.bf16.gmra.mxu0 %v4000_v0  ;;  %v1805_v54 = vadd.f32 %v1804_v13, %v1716_v52  ;;  %v4010_v34 = vadd.f32 %v2066_v7, %v1978_v28  ;;  %v1078_v7 = vor.u32 %v1077_v9, %v1073_v29 }
 0x15a   : > { %v1890_v10 = vpop.f32.mrf.mxu2 }
 0x15b   : > { %v1891_v4 = vadd.f32 %v1890_v10, %v1802_v49  ;;  %1843 = vmatmul.bf16.gmra.mxu1 %v4000_v0  ;;  %v4030_v46 = vsel %vm766_vm3, %v1078_v7, %v1082_v1 }
 0x15e   : > { %v2068_v8 = vpop.f32.mrf.mxu0  ;;  %v1979_v26 = vpop.f32.mrf.mxu3 }
 0x15f   : > { %v1980_v49 = vadd.f32 %v1979_v26, %v1891_v4  ;;  %1932 = vmatmul.bf16.gmra.mxu2 %v4019_v40 }
 0x160   : > { %v1806_v23 = vpop.f32.mrf.mxu1 }
 0x161   : > { %v1807_v20 = vadd.f32 %v1806_v23, %v1718_v22  ;;  %v4026_v50 = vadd.f32 %v2068_v8, %v1980_v49 }
 0x162   : > { %v1893_v52 = vpop.f32.mrf.mxu2 }
 0x163   : > { %2021 = vmatmul.bf16.gmra.mxu3 %v4006_v24  ;;  %v1894_v28 = vadd.f32 %v1893_v52, %v1805_v54 }
 0x166   : > { %v2071_v13 = vpop.f32.mrf.mxu0  ;;  %v1982_v63 = vpop.f32.mrf.mxu3 }
 0x167   : > { %v1983_v10 = vadd.f32 %v1982_v63, %v1894_v28 }
 0x168   : > { %v1809_v38 = vpop.f32.mrf.mxu1 }
 0x169   : > { %2110 = vmatmul.bf16.gmra.mxu0 %v4030_v46  ;;  %v1810_v4 = vadd.f32 %v1809_v38, %v1721_v16  ;;  %v4035_v8 = vadd.f32 %v2071_v13, %v1983_v10 }
 0x16a   : > { %v1895_v26 = vpop.f32.mrf.mxu2 }
 0x16b   : > { %v1896_v29 = vadd.f32 %v1895_v26, %v1807_v20  ;;  %2124 = vmatmul.bf16.vlgmr.msra.gmra.mxu1 %v3586_v43  ;;  %v1726_v43 = vadd.f32 %v3779_v21, %v3696_v56 }
 0x16e   : > { %v2073_v54 = vpop.f32.mrf.mxu0  ;;  %v1984_v9 = vpop.f32.mrf.mxu3 }
 0x16f   : > { %v1985_v22 = vadd.f32 %v1984_v9, %v1896_v29  ;;  %2213 = vmatmul.bf16.vlgmr.msra.gmra.mxu2 %v3499_v47 }
 0x170   : > { %v1811_v27 = vpop.f32.mrf.mxu1 }
 0x171   : > { %v1812_v49 = vadd.f32 %v1811_v27, %v1723_v17  ;;  %v4041_v23 = vadd.f32 %v2073_v54, %v1985_v22 }
 0x172   : > { %v1898_v7 = vpop.f32.mrf.mxu2 }
 0x173   : > { %2302 = vmatmul.bf16.vlgmr.msra.gmra.mxu3 %v3592_v59  ;;  %v1899_v1 = vadd.f32 %v1898_v7, %v1810_v4  ;;  %v1728_v59 = vadd.f32 %v3779_v21, %v3707_v14 }
 0x176   : > { %v2076_v52 = vpop.f32.mrf.mxu0  ;;  %v1987_v20 = vpop.f32.mrf.mxu3 }
 0x177   : > { %v1988_v28 = vadd.f32 %v1987_v20, %v1899_v1 }
 0x178   : > { %v1814_v13 = vpop.f32.mrf.mxu1 }
 0x179   : > { %2391 = vmatmul.bf16.vlgmr.msra.gmra.mxu0 %v3601_v5  ;;  %v1815_v2 = vadd.f32 %v1814_v13, %v1726_v43  ;;  %v4047_v63 = vadd.f32 %v2076_v52, %v1988_v28 }
 0x17a   : > { %v1900_v47 = vpop.f32.mrf.mxu2 }
 0x17b   : > { %v1901_v16 = vadd.f32 %v1900_v47, %v1812_v49  ;;  %2129 = vmatmul.bf16.gmra.mxu1 %v3601_v5  ;;  %v1731_v5 = vadd.f32 %v3779_v21, %v3726_v39 }
 0x17e   : > { %v2078_v10 = vpop.f32.mrf.mxu0  ;;  %v1989_v38 = vpop.f32.mrf.mxu3 }
 0x17f   : > { %v1990_v4 = vadd.f32 %v1989_v38, %v1901_v16  ;;  %2218 = vmatmul.bf16.gmra.mxu2 %v3549_v11 }
 0x180   : > { %v1816_v56 = vpop.f32.mrf.mxu1 }
 0x181   : > { %v1817_v26 = vadd.f32 %v1816_v56, %v1728_v59  ;;  %v4053_v29 = vadd.f32 %v2078_v10, %v1990_v4 }
 0x182   : > { %v1903_v54 = vpop.f32.mrf.mxu2 }
 0x183   : > { %2307 = vmatmul.bf16.gmra.mxu3 %v3610_v6  ;;  %v1904_v9 = vadd.f32 %v1903_v54, %v1815_v2  ;;  %v1733_v6 = vadd.f32 %v3779_v21, %v3742_v37 }
 0x186   : > { %v2081_v17 = vpop.f32.mrf.mxu0  ;;  %v1992_v22 = vpop.f32.mrf.mxu3 }
 0x187   : > { %v1993_v27 = vadd.f32 %v1992_v22, %v1904_v9  ;;  %v4315_v22 = vld [vmem:[#allocation5_spill] sm:$0xff] }
 0x188   : > { %v1819_v49 = vpop.f32.mrf.mxu1 }
 0x189   : > { %2396 = vmatmul.bf16.gmra.mxu0 %v3629_v32  ;;  %v1820_v14 = vadd.f32 %v1819_v49, %v1731_v5  ;;  %v4059_v7 = vadd.f32 %v2081_v17, %v1993_v27 }
 0x18a   : > { %v1905_v11 = vpop.f32.mrf.mxu2 }
 0x18b   : > { %v1906_v1 = vadd.f32 %v1905_v11, %v1817_v26  ;;  %2134 = vmatmul.bf16.gmra.mxu1 %v3629_v32  ;;  %v1736_v32 = vadd.f32 %v3779_v21, %v3773_v58 }
 0x18e   : > { %v2083_v52 = vpop.f32.mrf.mxu0  ;;  %v1994_v20 = vpop.f32.mrf.mxu3 }
 0x18f   : > { %v1995_v43 = vadd.f32 %v1994_v20, %v1906_v1  ;;  %2223 = vmatmul.bf16.gmra.mxu2 %v3267_v35  ;;  %v4317_v20 = vld [vmem:[#allocation10_spill] sm:$0xff] }
 0x190   : > { %v1821_v39 = vpop.f32.mrf.mxu1 }
 0x191   : > { %v1822_v28 = vadd.f32 %v1821_v39, %v1733_v6  ;;  %v4065_v13 = vadd.f32 %v2083_v52, %v1995_v43  ;;  %v4318_v39 = vld [vmem:[#allocation13_spill] sm:$0xff] }
 0x192   : > { %v1908_v2 = vpop.f32.mrf.mxu2 }
 0x193   : > { %2312 = vmatmul.bf16.gmra.mxu3 %v3635_v42  ;;  %v1909_v47 = vadd.f32 %v1908_v2, %v1820_v14  ;;  %v4314_v42 = vld [vmem:[#allocation24_spill] sm:$0xff]  ;;  %v4316_v14 = vld [vmem:[#allocation11_spill] sm:$0xff] }
 0x194   : > { %v1738_v9 = vadd.f32 %v3779_v21, %v4314_v42 }
 0x196   : > { %v2086_v16 = vpop.f32.mrf.mxu0  ;;  %v1997_v10 = vpop.f32.mrf.mxu3 }
 0x197   : > { %v1998_v38 = vadd.f32 %v1997_v10, %v1909_v47 }
 0x198   : > { %v1824_v59 = vpop.f32.mrf.mxu1 }
 0x199   : > { %2401 = vmatmul.bf16.gmra.mxu0 %v3649_v57  ;;  %v1825_v37 = vadd.f32 %v1824_v59, %v1736_v32  ;;  %v4071_v4 = vadd.f32 %v2086_v16, %v1998_v38  ;;  %v4319_v38 = vld [vmem:[#allocation12_spill] sm:$0xff] }
 0x19a   : > { %v1910_v35 = vpop.f32.mrf.mxu2  ;;  %v1743_v59 = vadd.f32 %v3779_v21, %v4319_v38 }
 0x19b   : > { %v1911_v56 = vadd.f32 %v1910_v35, %v1822_v28  ;;  %2139 = vmatmul.bf16.gmra.mxu1 %v3649_v57  ;;  %v1741_v57 = vadd.f32 %v3779_v21, %v4317_v20  ;;  %v4320_v35 = vld [vmem:[#allocation6_spill] sm:$0xff] }
 0x19e   : > { %v2088_v26 = vpop.f32.mrf.mxu0  ;;  %v1999_v54 = vpop.f32.mrf.mxu3 }
 0x19f   : > { %v2000_v17 = vadd.f32 %v1999_v54, %v1911_v56  ;;  %2228 = vmatmul.bf16.gmra.mxu2 %v4315_v22 }
 0x1a0   : > { %v1826_v58 = vpop.f32.mrf.mxu1 }
 0x1a1   : > { %v1827_v5 = vadd.f32 %v1826_v58, %v1738_v9  ;;  %v4077_v27 = vadd.f32 %v2088_v26, %v2000_v17  ;;  %v4321_v9 = vld [vmem:[#allocation15_spill] sm:$0xff] }
 0x1a2   : > { %v1913_v49 = vpop.f32.mrf.mxu2 }
 0x1a3   : > { %2317 = vmatmul.bf16.gmra.mxu3 %v4316_v14  ;;  %v1914_v11 = vadd.f32 %v1913_v49, %v1825_v37 }
 0x1a6   : > { %v2091_v1 = vpop.f32.mrf.mxu0  ;;  %v2002_v52 = vpop.f32.mrf.mxu3 }
 0x1a7   : > { %v2003_v6 = vadd.f32 %v2002_v52, %v1914_v11 }
 0x1a8   : > { %v1829_v43 = vpop.f32.mrf.mxu1 }
 0x1a9   : > { %2406 = vmatmul.bf16.gmra.mxu0 %v4318_v39  ;;  %v1830_v28 = vadd.f32 %v1829_v43, %v1741_v57  ;;  %v4083_v2 = vadd.f32 %v2091_v1, %v2003_v6  ;;  %v4323_v1 = vld [vmem:[#allocation17_spill] sm:$0xff] }
 0x1aa   : > { %v1915_v47 = vpop.f32.mrf.mxu2 }
 0x1ab   : > { %v1916_v16 = vadd.f32 %v1915_v47, %v1827_v5  ;;  %2144 = vmatmul.bf16.gmra.mxu1 %v4318_v39  ;;  %v4322_v5 = vld [vmem:[#allocation14_spill] sm:$0xff]  ;;  %v4324_v47 = vld [vmem:[#allocation16_spill] sm:$0xff] }
 0x1ac   : > { %v1746_v49 = vadd.f32 %v3779_v21, %v4322_v5  ;;  %v4328_v5 = vld [vmem:[#allocation21_spill] sm:$0xff] }
 0x1ae   : > { %v2093_v10 = vpop.f32.mrf.mxu0  ;;  %v2004_v32 = vpop.f32.mrf.mxu3 }
 0x1af   : > { %v2005_v37 = vadd.f32 %v2004_v32, %v1916_v16  ;;  %2233 = vmatmul.bf16.gmra.mxu2 %v4320_v35  ;;  %v4326_v35 = vld [vmem:[#allocation19_spill] sm:$0xff] }
 0x1b0   : > { %v1831_v56 = vpop.f32.mrf.mxu1 }
 0x1b1   : > { %v1832_v26 = vadd.f32 %v1831_v56, %v1743_v59  ;;  %v4089_v54 = vadd.f32 %v2093_v10, %v2005_v37  ;;  %v4325_v10 = vld [vmem:[#allocation7_spill] sm:$0xff] }
 0x1b2   : > { %v1918_v42 = vpop.f32.mrf.mxu2 }
 0x1b3   : > { %2322 = vmatmul.bf16.gmra.mxu3 %v4321_v9  ;;  %v1919_v17 = vadd.f32 %v1918_v42, %v1830_v28  ;;  %v1748_v28 = vadd.f32 %v3779_v21, %v4324_v47  ;;  %v4327_v9 = vld [vmem:[#allocation18_spill] sm:$0xff]  ;;  %v4330_v47 = vld [vmem:[#allocation3_spill] sm:$0xff] }
 0x1b6   : > { %v2096_v22 = vpop.f32.mrf.mxu0  ;;  %v2007_v58 = vpop.f32.mrf.mxu3 }
 0x1b7   : > { %v2008_v14 = vadd.f32 %v2007_v58, %v1919_v17  ;;  %v1751_v17 = vadd.f32 %v3779_v21, %v4327_v9 }
 0x1b8   : > { %v1834_v11 = vpop.f32.mrf.mxu1 }
 0x1b9   : > { %2411 = vmatmul.bf16.gmra.mxu0 %v4323_v1  ;;  %v1835_v52 = vadd.f32 %v1834_v11, %v1746_v49  ;;  %v4095_v20 = vadd.f32 %v2096_v22, %v2008_v14 }
 0x1ba   : > { %v1920_v57 = vpop.f32.mrf.mxu2 }
 0x1bb   : > { %v1921_v6 = vadd.f32 %v1920_v57, %v1832_v26  ;;  %2149 = vmatmul.bf16.gmra.mxu1 %v4323_v1 }
 0x1be   : > { %v2098_v43 = vpop.f32.mrf.mxu0  ;;  %v2009_v39 = vpop.f32.mrf.mxu3 }
 0x1bf   : > { %v2010_v16 = vadd.f32 %v2009_v39, %v1921_v6  ;;  %2238 = vmatmul.bf16.gmra.mxu2 %v4325_v10 }
 0x1c0   : > { %v1836_v32 = vpop.f32.mrf.mxu1 }
 0x1c1   : > { %v1837_v38 = vadd.f32 %v1836_v32, %v1748_v28  ;;  %v4101_v59 = vadd.f32 %v2098_v43, %v2010_v16  ;;  %v4329_v43 = vld [vmem:[#allocation20_spill] sm:$0xff] }
 0x1c2   : > { %v1923_v37 = vpop.f32.mrf.mxu2 }
 0x1c3   : > { %2327 = vmatmul.bf16.gmra.mxu3 %v4326_v35  ;;  %v1924_v56 = vadd.f32 %v1923_v37, %v1835_v52  ;;  %v1753_v52 = vadd.f32 %v3779_v21, %v4329_v43  ;;  %v4331_v37 = vld [vmem:[#allocation22_spill] sm:$0xff] }
 0x1c4   : > { %v4334_v43 = vld [vmem:[#allocation26_spill] sm:$0xff] }
 0x1c6   : > { %v2101_v42 = vpop.f32.mrf.mxu0  ;;  %v2012_v26 = vpop.f32.mrf.mxu3 }
 0x1c7   : > { %v2013_v22 = vadd.f32 %v2012_v26, %v1924_v56 }
 0x1c8   : > { %v1839_v58 = vpop.f32.mrf.mxu1 }
 0x1c9   : > { %2416 = vmatmul.bf16.gmra.mxu0 %v4328_v5  ;;  %v1840_v49 = vadd.f32 %v1839_v58, %v1751_v17  ;;  %v4107_v14 = vadd.f32 %v2101_v42, %v2013_v22  ;;  %v4332_v42 = vld [vmem:[#allocation23_spill] sm:$0xff]  ;;  %v4333_v22 = vld [vmem:[#allocation25_spill] sm:$0xff] }
 0x1ca   : > { %v1925_v11 = vpop.f32.mrf.mxu2  ;;  %v1756_v26 = vadd.f32 %v3779_v21, %v4332_v42 }
 0x1cb   : > { %v1926_v1 = vadd.f32 %v1925_v11, %v1837_v38  ;;  %2154 = vmatmul.bf16.gmra.mxu1 %v4328_v5 }
 0x1ce   : > { %v2103_v57 = vpop.f32.mrf.mxu0  ;;  %v2014_v6 = vpop.f32.mrf.mxu3 }
 0x1cf   : > { %v2015_v39 = vadd.f32 %v2014_v6, %v1926_v1  ;;  %2243 = vmatmul.bf16.gmra.mxu2 %v4330_v47 }
 0x1d0   : > { %v1841_v28 = vpop.f32.mrf.mxu1 }
 0x1d1   : > { %v1842_v16 = vadd.f32 %v1841_v28, %v1753_v52  ;;  %v4113_v10 = vadd.f32 %v2103_v57, %v2015_v39 }
 0x1d2   : > { %v1928_v32 = vpop.f32.mrf.mxu2 }
 0x1d3   : > { %2332 = vmatmul.bf16.gmra.mxu3 %v4331_v37  ;;  %v1929_v35 = vadd.f32 %v1928_v32, %v1840_v49  ;;  %v1758_v49 = vadd.f32 %v3779_v21, %v4334_v43  ;;  %v4335_v37 = vld [vmem:[#allocation27_spill] sm:$0xff] }
 0x1d6   : > { %v2106_v56 = vpop.f32.mrf.mxu0  ;;  %v2017_v38 = vpop.f32.mrf.mxu3 }
 0x1d7   : > { %v2018_v9 = vadd.f32 %v2017_v38, %v1929_v35 }
 0x1d8   : > { %v1844_v17 = vpop.f32.mrf.mxu1 }
 0x1d9   : > { %2421 = vmatmul.bf16.gmra.mxu0 %v4333_v22  ;;  %v1845_v58 = vadd.f32 %v1844_v17, %v1756_v26  ;;  %v4119_v5 = vadd.f32 %v2106_v56, %v2018_v9 }
 0x1da   : > { %v1930_v11 = vpop.f32.mrf.mxu2 }
 0x1db   : > { %v1931_v1 = vadd.f32 %v1930_v11, %v1842_v16  ;;  %2159 = vmatmul.bf16.gmra.mxu1 %v4333_v22 }
 0x1de   : > { %v2108_v57 = vpop.f32.mrf.mxu0  ;;  %v2019_v6 = vpop.f32.mrf.mxu3 }
 0x1df   : > { %v2020_v52 = vadd.f32 %v2019_v6, %v1931_v1  ;;  %2248 = vmatmul.bf16.gmra.mxu2 %v3366_v60 }
 0x1e0   : > { %v1846_v39 = vpop.f32.mrf.mxu1 }
 0x1e1   : > { %v1847_v47 = vadd.f32 %v1846_v39, %v1758_v49  ;;  %v4125_v28 = vadd.f32 %v2108_v57, %v2020_v52 }
 0x1e2   : > { %v1933_v32 = vpop.f32.mrf.mxu2 }
 0x1e3   : > { %2337 = vmatmul.bf16.gmra.mxu3 %v4335_v37  ;;  %v1934_v35 = vadd.f32 %v1933_v32, %v1845_v58  ;;  %v4336_v58 = vld [vmem:[#allocation28_spill] sm:$0xff] }
 0x1e6   : > { %v2111_v56 = vpop.f32.mrf.mxu0  ;;  %v2022_v16 = vpop.f32.mrf.mxu3 }
 0x1e7   : > { %v2023_v38 = vadd.f32 %v2022_v16, %v1934_v35 }
 0x1e8   : > { %v2125_v42 = vpop.f32.mrf.mxu1 }
 0x1e9   : > { %2426 = vmatmul.bf16.gmra.mxu0 %v3835_v12  ;;  %v4129_v26 = vadd.f32 %v2111_v56, %v2023_v38  ;;  %v2126_v1 = vadd.f32 %v2125_v42, %v4336_v58 }
 0x1ea   : > { %v1935_v21 = vpop.f32.mrf.mxu2 }
 0x1eb   : > { %v1936_v9 = vadd.f32 %v1935_v21, %v1847_v47  ;;  %2164 = vmatmul.bf16.gmra.mxu1 %v3835_v12  ;;  %v4337_v47 = vld [vmem:[#allocation29_spill] sm:$0xff]  ;;  %v4338_v21 = vld [vmem:[#allocation30_spill] sm:$0xff] }
 0x1ee   : > { %v2113_v60 = vpop.f32.mrf.mxu0  ;;  %v2024_v17 = vpop.f32.mrf.mxu3 }
 0x1ef   : > { %v2025_v22 = vadd.f32 %v2024_v17, %v1936_v9  ;;  %2253 = vmatmul.bf16.gmra.mxu2 %v3452_v55 }
 0x1f0   : > { %v2127_v11 = vpop.f32.mrf.mxu1 }
 0x1f1   : > { %v4134_v57 = vadd.f32 %v2113_v60, %v2025_v22  ;;  %v2128_v32 = vadd.f32 %v2127_v11, %v4337_v47 }
 0x1f2   : > { %v2214_v6 = vpop.f32.mrf.mxu2 }
 0x1f3   : > { %2342 = vmatmul.bf16.gmra.mxu3 %v3846_v25  ;;  %v2215_v43 = vadd.f32 %v2214_v6, %v2126_v1 }
 0x1f6   : > { %v2392_v49 = vpop.f32.mrf.mxu0  ;;  %v2303_v52 = vpop.f32.mrf.mxu3 }
 0x1f7   : > { %v2304_v39 = vadd.f32 %v2303_v52, %v2215_v43 }
 0x1f8   : > { %v2130_v55 = vpop.f32.mrf.mxu1 }
 0x1f9   : > { %2431 = vmatmul.bf16.gmra.mxu0 %v3862_v61  ;;  %v2393_v12 = vadd.f32 %v2392_v49, %v2304_v39  ;;  %v2131_v9 = vadd.f32 %v2130_v55, %v4338_v21 }
 0x1fa   : > { %v2216_v37 = vpop.f32.mrf.mxu2 }
 0x1fb   : > { %2472 = vst [vmem:[%s4142_s18] sm:$0xff] %v2393_v12  ;;  %v2217_v25 = vadd.f32 %v2216_v37, %v2128_v32  ;;  %2169 = vmatmul.bf16.gmra.mxu1 %v3862_v61  ;;  %v2541_v60 = vmul.f32 %v2393_v12, %v2393_v12 }
 0x1fe   : > { %v2394_v35 = vpop.f32.mrf.mxu0  ;;  %v2305_v56 = vpop.f32.mrf.mxu3 }
 0x1ff   : > { %v2306_v16 = vadd.f32 %v2305_v56, %v2217_v25  ;;  %2258 = vmatmul.bf16.gmra.mxu2 %v3535_v48 }
 0x200   : > { %v2132_v38 = vpop.f32.mrf.mxu1 }
 0x201   : > { %v2395_v42 = vadd.f32 %v2394_v35, %v2306_v16  ;;  %v2133_v52 = vadd.f32 %v2132_v38, %v3868_v18  ;;  %v4339_v35 = vld [vmem:[#allocation4_spill] sm:$0xff] }
 0x202   : > { %v2219_v17 = vpop.f32.mrf.mxu2 }
 0x203   : > { %2473 = vst [vmem:[%s4142_s18 + $0x8] sm:$0xff] %v2395_v42  ;;  %v2504_v22 = vadd.f32 %v2395_v42, %v2393_v12  ;;  %v2542_v11 = vmul.f32 %v2395_v42, %v2395_v42  ;;  %2347 = vmatmul.bf16.gmra.mxu3 %v3872_v19  ;;  %v2220_v58 = vadd.f32 %v2219_v17, %v2131_v9  ;;  %v4340_v42 = vld [vmem:[#allocation31_spill] sm:$0xff] }
 0x205   : > { %v2573_v1 = vadd.f32 %v2542_v11, %v2541_v60  ;;  %v4341_v60 = vld [vmem:[#allocation33_spill] sm:$0xff] }
 0x206   : > { %v2397_v61 = vpop.f32.mrf.mxu0  ;;  %v2308_v6 = vpop.f32.mrf.mxu3 }
 0x207   : > { %v2309_v43 = vadd.f32 %v2308_v6, %v2220_v58 }
 0x208   : > { %v2135_v49 = vpop.f32.mrf.mxu1 }
 0x209   : > { %2436 = vmatmul.bf16.gmra.mxu0 %v3895_v31  ;;  %v2398_v48 = vadd.f32 %v2397_v61, %v2309_v43  ;;  %v2136_v21 = vadd.f32 %v2135_v49, %v4340_v42  ;;  %v4342_v61 = vld [vmem:[#allocation35_spill] sm:$0xff]  ;;  %v4343_v43 = vld [vmem:[#allocation32_spill] sm:$0xff] }
 0x20a   : > { %v2221_v39 = vpop.f32.mrf.mxu2 }
 0x20b   : > { %2474 = vst [vmem:[%s4142_s18 + $0x10] sm:$0xff] %v2398_v48  ;;  %v2505_v55 = vadd.f32 %v2504_v22, %v2398_v48  ;;  %v2543_v47 = vmul.f32 %v2398_v48, %v2398_v48  ;;  %v2222_v12 = vadd.f32 %v2221_v39, %v2133_v52  ;;  %2174 = vmatmul.bf16.gmra.mxu1 %v3895_v31 }
 0x20d   : > { %v2574_v19 = vadd.f32 %v2573_v1, %v2543_v47 }
 0x20e   : > { %v2399_v32 = vpop.f32.mrf.mxu0  ;;  %v2310_v37 = vpop.f32.mrf.mxu3 }
 0x20f   : > { %v2311_v25 = vadd.f32 %v2310_v37, %v2222_v12  ;;  %2263 = vmatmul.bf16.gmra.mxu2 %v4339_v35  ;;  %v4344_v35 = vld [vmem:[#allocation34_spill] sm:$0xff] }
 0x210   : > { %v2137_v56 = vpop.f32.mrf.mxu1 }
 0x211   : > { %v2400_v16 = vadd.f32 %v2399_v32, %v2311_v25  ;;  %v2138_v48 = vadd.f32 %v2137_v56, %v4343_v43 }
 0x212   : > { %v2224_v18 = vpop.f32.mrf.mxu2 }
 0x213   : > { %2475 = vst [vmem:[%s4142_s18 + $0x18] sm:$0xff] %v2400_v16  ;;  %v2506_v38 = vadd.f32 %v2505_v55, %v2400_v16  ;;  %v2544_v9 = vmul.f32 %v2400_v16, %v2400_v16  ;;  %2352 = vmatmul.bf16.gmra.mxu3 %v4341_v60  ;;  %v2225_v17 = vadd.f32 %v2224_v18, %v2136_v21 }
 0x215   : > { %v2575_v22 = vadd.f32 %v2574_v19, %v2544_v9 }
 0x216   : > { %v2402_v31 = vpop.f32.mrf.mxu0  ;;  %v2313_v11 = vpop.f32.mrf.mxu3 }
 0x217   : > { %v2314_v58 = vadd.f32 %v2313_v11, %v2225_v17 }
 0x218   : > { %v2140_v1 = vpop.f32.mrf.mxu1 }
 0x219   : > { %2441 = vmatmul.bf16.gmra.mxu0 %v4342_v61  ;;  %v2403_v6 = vadd.f32 %v2402_v31, %v2314_v58  ;;  %v2141_v16 = vadd.f32 %v2140_v1, %v4344_v35  ;;  %v4345_v31 = vld [vmem:[#allocation36_spill] sm:$0xff] }
 0x21a   : > { %v2226_v49 = vpop.f32.mrf.mxu2 }
 0x21b   : > { %2476 = vst [vmem:[%s4142_s18 + $0x20] sm:$0xff] %v2403_v6  ;;  %v2507_v52 = vadd.f32 %v2506_v38, %v2403_v6  ;;  %v2545_v39 = vmul.f32 %v2403_v6, %v2403_v6  ;;  %v2227_v55 = vadd.f32 %v2226_v49, %v2138_v48  ;;  %2179 = vmatmul.bf16.gmra.mxu1 %v4342_v61 }
 0x21d   : > { %v2576_v47 = vadd.f32 %v2575_v22, %v2545_v39 }
 0x21e   : > { %v2404_v12 = vpop.f32.mrf.mxu0  ;;  %v2315_v19 = vpop.f32.mrf.mxu3 }
 0x21f   : > { %v2316_v32 = vadd.f32 %v2315_v19, %v2227_v55  ;;  %2268 = vmatmul.bf16.gmra.mxu2 %v3384_v15  ;;  %v4346_v55 = vld [vmem:[#allocation37_spill] sm:$0xff] }
 0x220   : > { %v2142_v37 = vpop.f32.mrf.mxu1 }
 0x221   : > { %v2405_v25 = vadd.f32 %v2404_v12, %v2316_v32  ;;  %v2143_v11 = vadd.f32 %v2142_v37, %v4345_v31 }
 0x222   : > { %v2229_v56 = vpop.f32.mrf.mxu2 }
 0x223   : > { %2477 = vst [vmem:[%s4142_s18 + $0x28] sm:$0xff] %v2405_v25  ;;  %v2508_v42 = vadd.f32 %v2507_v52, %v2405_v25  ;;  %v2546_v21 = vmul.f32 %v2405_v25, %v2405_v25  ;;  %2357 = vmatmul.bf16.gmra.mxu3 %v3940_v51  ;;  %v2230_v18 = vadd.f32 %v2229_v56, %v2141_v16 }
 0x225   : > { %v2577_v38 = vadd.f32 %v2576_v47, %v2546_v21 }
 0x226   : > { %v2407_v9 = vpop.f32.mrf.mxu0  ;;  %v2318_v60 = vpop.f32.mrf.mxu3 }
 0x227   : > { %v2319_v17 = vadd.f32 %v2318_v60, %v2230_v18 }
 0x228   : > { %v2145_v22 = vpop.f32.mrf.mxu1 }
 0x229   : > { %2446 = vmatmul.bf16.gmra.mxu0 %v3963_v44  ;;  %v2408_v15 = vadd.f32 %v2407_v9, %v2319_v17  ;;  %v2146_v47 = vadd.f32 %v2145_v22, %v4346_v55 }
 0x22a   : > { %v2231_v58 = vpop.f32.mrf.mxu2 }
 0x22b   : > { %2478 = vst [vmem:[%s4142_s18 + $0x30] sm:$0xff] %v2408_v15  ;;  %v2509_v1 = vadd.f32 %v2508_v42, %v2408_v15  ;;  %v2547_v61 = vmul.f32 %v2408_v15, %v2408_v15  ;;  %v2232_v6 = vadd.f32 %v2231_v58, %v2143_v11  ;;  %2184 = vmatmul.bf16.gmra.mxu1 %v3963_v44 }
 0x22d   : > { %v2578_v51 = vadd.f32 %v2577_v38, %v2547_v61 }
 0x22e   : > { %v2409_v43 = vpop.f32.mrf.mxu0  ;;  %v2320_v48 = vpop.f32.mrf.mxu3 }
 0x22f   : > { %v2321_v49 = vadd.f32 %v2320_v48, %v2232_v6  ;;  %2273 = vmatmul.bf16.gmra.mxu2 %v3487_v33 }
 0x230   : > { %v2147_v52 = vpop.f32.mrf.mxu1 }
 0x231   : > { %v2410_v39 = vadd.f32 %v2409_v43, %v2321_v49  ;;  %v2148_v42 = vadd.f32 %v2147_v52, %v3972_v45 }
 0x232   : > { %v2234_v12 = vpop.f32.mrf.mxu2 }
 0x233   : > { %2479 = vst [vmem:[%s4142_s18 + $0x38] sm:$0xff] %v2410_v39  ;;  %v2510_v19 = vadd.f32 %v2509_v1, %v2410_v39  ;;  %v2548_v32 = vmul.f32 %v2410_v39, %v2410_v39  ;;  %2362 = vmatmul.bf16.gmra.mxu3 %v3976_v62  ;;  %v2235_v37 = vadd.f32 %v2234_v12, %v2146_v47 }
 0x235   : > { %v2579_v25 = vadd.f32 %v2578_v51, %v2548_v32 }
 0x236   : > { %v2412_v44 = vpop.f32.mrf.mxu0  ;;  %v2323_v35 = vpop.f32.mrf.mxu3 }
 0x237   : > { %v2324_v16 = vadd.f32 %v2323_v35, %v2235_v37 }
 0x238   : > { %v2150_v56 = vpop.f32.mrf.mxu1 }
 0x239   : > { %2451 = vmatmul.bf16.gmra.mxu0 %v3990_v30  ;;  %v2413_v33 = vadd.f32 %v2412_v44, %v2324_v16  ;;  %v2151_v11 = vadd.f32 %v2150_v56, %v3982_v41  ;;  %v1088_v44 = vrot.slane %v4016_v36, 1 }
 0x23a   : > { %v2236_v21 = vpop.f32.mrf.mxu2 }
 0x23b   : > { %2480 = vst [vmem:[%s4142_s18 + $0x40] sm:$0xff] %v2413_v33  ;;  %v2511_v18 = vadd.f32 %v2510_v19, %v2413_v33  ;;  %v2549_v38 = vmul.f32 %v2413_v33, %v2413_v33  ;;  %v2237_v9 = vadd.f32 %v2236_v21, %v2148_v42  ;;  %2189 = vmatmul.bf16.gmra.mxu1 %v3990_v30 }
 0x23d   : > { %v2580_v62 = vadd.f32 %v2579_v25, %v2549_v38 }
 0x23e   : > { %v2414_v60 = vpop.f32.mrf.mxu0  ;;  %v2325_v17 = vpop.f32.mrf.mxu3 }
 0x23f   : > { %v2326_v22 = vadd.f32 %v2325_v17, %v2237_v9  ;;  %2278 = vmatmul.bf16.gmra.mxu2 %v3544_v3 }
 0x240   : > { %v2152_v15 = vpop.f32.mrf.mxu1 }
 0x241   : > { %v2415_v31 = vadd.f32 %v2414_v60, %v2326_v22  ;;  %v2153_v49 = vadd.f32 %v2152_v15, %v3996_v53  ;;  %v1087_v53 = vrot.slane %v4006_v24, 1 }
 0x242   : > { %v2239_v45 = vpop.f32.mrf.mxu2 }
 0x243   : > { %2481 = vst [vmem:[%s4142_s18 + $0x48] sm:$0xff] %v2415_v31  ;;  %v2512_v58 = vadd.f32 %v2511_v18, %v2415_v31  ;;  %v2550_v1 = vmul.f32 %v2415_v31, %v2415_v31  ;;  %2367 = vmatmul.bf16.gmra.mxu3 %v4000_v0  ;;  %v2240_v61 = vadd.f32 %v2239_v45, %v2151_v11  ;;  %v4347_v11 = vld [vmem:[#allocation2_spill] sm:$0xff] }
 0x244   : > { %v1089_v21 = vsel %vm1007_vm4, %v1087_v53, %v1088_v44 }
 0x245   : > { %v2581_v6 = vadd.f32 %v2580_v62, %v2550_v1 }
 0x246   : > { %v2417_v30 = vpop.f32.mrf.mxu0  ;;  %v2328_v51 = vpop.f32.mrf.mxu3 }
 0x247   : > { %v2329_v43 = vadd.f32 %v2328_v51, %v2240_v61 }
 0x248   : > { %v2155_v48 = vpop.f32.mrf.mxu1 }
 0x249   : > { %2456 = vmatmul.bf16.gmra.mxu0 %v4019_v40  ;;  %v2418_v3 = vadd.f32 %v2417_v30, %v2329_v43  ;;  %v2156_v25 = vadd.f32 %v2155_v48, %v4010_v34  ;;  %v4348_v30 = vld [vmem:[#allocation8_spill] sm:$0xff] }
 0x24a   : > { %v2241_v52 = vpop.f32.mrf.mxu2 }
 0x24b   : > { %2482 = vst [vmem:[%s4142_s18 + $0x50] sm:$0xff] %v2418_v3  ;;  %v2513_v41 = vadd.f32 %v2512_v58, %v2418_v3  ;;  %v2551_v39 = vmul.f32 %v2418_v3, %v2418_v3  ;;  %v2242_v55 = vadd.f32 %v2241_v52, %v2153_v49  ;;  %2194 = vmatmul.bf16.gmra.mxu1 %v4019_v40 }
 0x24d   : > { %v2582_v0 = vadd.f32 %v2581_v6, %v2551_v39 }
 0x24e   : > { %v2419_v47 = vpop.f32.mrf.mxu0  ;;  %v2330_v12 = vpop.f32.mrf.mxu3 }
 0x24f   : > { %v2331_v19 = vadd.f32 %v2330_v12, %v2242_v55  ;;  %2283 = vmatmul.bf16.gmra.mxu2 %v4006_v24 }
 0x250   : > { %v2157_v32 = vpop.f32.mrf.mxu1 }
 0x251   : > { %v2420_v37 = vadd.f32 %v2419_v47, %v2331_v19  ;;  %v2158_v24 = vadd.f32 %v2157_v32, %v4026_v50 }
 0x252   : > { %v2244_v35 = vpop.f32.mrf.mxu2 }
 0x253   : > { %2483 = vst [vmem:[%s4142_s18 + $0x58] sm:$0xff] %v2420_v37  ;;  %v2514_v16 = vadd.f32 %v2513_v41, %v2420_v37  ;;  %v2552_v56 = vmul.f32 %v2420_v37, %v2420_v37  ;;  %2372 = vmatmul.bf16.gmra.mxu3 %v4030_v46  ;;  %v2245_v40 = vadd.f32 %v2244_v35, %v2156_v25  ;;  %v4349_v41 = vld [vmem:[#allocation9_spill] sm:$0xff] }
 0x255   : > { %v2583_v33 = vadd.f32 %v2582_v0, %v2552_v56 }
 0x256   : > { %v2422_v42 = vpop.f32.mrf.mxu0  ;;  %v2333_v18 = vpop.f32.mrf.mxu3 }
 0x257   : > { %v2334_v38 = vadd.f32 %v2333_v18, %v2245_v40 }
 0x258   : > { %v2160_v9 = vpop.f32.mrf.mxu1 }
 0x259   : > { %2461 = vmatmul.bf16.gmra.mxu0 %v1089_v21  ;;  %v2423_v34 = vadd.f32 %v2422_v42, %v2334_v38  ;;  %v2161_v1 = vadd.f32 %v2160_v9, %v4035_v8 }
 0x25a   : > { %v2246_v36 = vpop.f32.mrf.mxu2 }
 0x25b   : > { %2484 = vst [vmem:[%s4142_s18 + $0x60] sm:$0xff] %v2423_v34  ;;  %v2515_v62 = vadd.f32 %v2514_v16, %v2423_v34  ;;  %v2553_v60 = vmul.f32 %v2423_v34, %v2423_v34  ;;  %v2247_v17 = vadd.f32 %v2246_v36, %v2158_v24  ;;  %2199 = vmatmul.bf16.gmra.mxu1 %v1089_v21 }
 0x25d   : > { %v2584_v46 = vadd.f32 %v2583_v33, %v2553_v60 }
 0x25e   : > { %v2424_v22 = vpop.f32.mrf.mxu0  ;;  %v2335_v15 = vpop.f32.mrf.mxu3 }
 0x25f   : > { %v2336_v31 = vadd.f32 %v2335_v15, %v2247_v17  ;;  %2288 = vmatmul.bf16.gmra.mxu2 %v4347_v11 }
 0x260   : > { %v2162_v45 = vpop.f32.mrf.mxu1 }
 0x261   : > { %v2425_v58 = vadd.f32 %v2424_v22, %v2336_v31  ;;  %v2163_v55 = vadd.f32 %v2162_v45, %v4041_v23 }
 0x262   : > { %v2249_v61 = vpop.f32.mrf.mxu2 }
 0x263   : > { %2485 = vst [vmem:[%s4142_s18 + $0x68] sm:$0xff] %v2425_v58  ;;  %v2516_v50 = vadd.f32 %v2515_v62, %v2425_v58  ;;  %v2554_v6 = vmul.f32 %v2425_v58, %v2425_v58  ;;  %2377 = vmatmul.bf16.gmra.mxu3 %v4348_v30  ;;  %v2250_v51 = vadd.f32 %v2249_v61, %v2161_v1 }
 0x265   : > { %v2585_v43 = vadd.f32 %v2584_v46, %v2554_v6 }
 0x266   : > { %v2427_v48 = vpop.f32.mrf.mxu0  ;;  %v2338_v3 = vpop.f32.mrf.mxu3 }
 0x267   : > { %v2339_v49 = vadd.f32 %v2338_v3, %v2250_v51 }
 0x268   : > { %v2165_v52 = vpop.f32.mrf.mxu1 }
 0x269   : > { %2466 = vmatmul.bf16.gmra.mxu0 %v4349_v41  ;;  %v2428_v39 = vadd.f32 %v2427_v48, %v2339_v49  ;;  %v2166_v35 = vadd.f32 %v2165_v52, %v4047_v63 }
 0x26a   : > { %v2251_v8 = vpop.f32.mrf.mxu2 }
 0x26b   : > { %2486 = vst [vmem:[%s4142_s18 + $0x70] sm:$0xff] %v2428_v39  ;;  %v2517_v0 = vadd.f32 %v2516_v50, %v2428_v39  ;;  %v2555_v47 = vmul.f32 %v2428_v39, %v2428_v39  ;;  %v2252_v12 = vadd.f32 %v2251_v8, %v2163_v55 }
 0x26d   : > { %v2586_v19 = vadd.f32 %v2585_v43, %v2555_v47 }
 0x26e   : > { %v2429_v32 = vpop.f32.mrf.mxu0  ;;  %v2340_v37 = vpop.f32.mrf.mxu3 }
 0x26f   : > { %v2341_v25 = vadd.f32 %v2340_v37, %v2252_v12 }
 0x270   : > { %v2167_v53 = vpop.f32.mrf.mxu1 }
 0x271   : > { %v2430_v44 = vadd.f32 %v2429_v32, %v2341_v25  ;;  %v2168_v34 = vadd.f32 %v2167_v53, %v4053_v29 }
 0x272   : > { %v2254_v16 = vpop.f32.mrf.mxu2 }
 0x273   : > { %2487 = vst [vmem:[%s4142_s18 + $0x78] sm:$0xff] %v2430_v44  ;;  %v2518_v56 = vadd.f32 %v2517_v0, %v2430_v44  ;;  %v2556_v40 = vmul.f32 %v2430_v44, %v2430_v44  ;;  %v2255_v33 = vadd.f32 %v2254_v16, %v2166_v35 }
 0x275   : > { %v2587_v23 = vadd.f32 %v2586_v19, %v2556_v40 }
 0x276   : > { %v2432_v42 = vpop.f32.mrf.mxu0  ;;  %v2343_v21 = vpop.f32.mrf.mxu3 }
 0x277   : > { %v2344_v18 = vadd.f32 %v2343_v21, %v2255_v33 }
 0x278   : > { %v2170_v38 = vpop.f32.mrf.mxu1 }
 0x279   : > { %v2433_v9 = vadd.f32 %v2432_v42, %v2344_v18  ;;  %v2171_v11 = vadd.f32 %v2170_v38, %v4059_v7 }
 0x27a   : > { %v2256_v24 = vpop.f32.mrf.mxu2 }
 0x27b   : > { %2488 = vst [vmem:[%s4142_s18 + $0x80] sm:$0xff] %v2433_v9  ;;  %v2519_v36 = vadd.f32 %v2518_v56, %v2433_v9  ;;  %v2557_v62 = vmul.f32 %v2433_v9, %v2433_v9  ;;  %v2257_v60 = vadd.f32 %v2256_v24, %v2168_v34 }
 0x27d   : > { %v2588_v63 = vadd.f32 %v2587_v23, %v2557_v62 }
 0x27e   : > { %v2434_v17 = vpop.f32.mrf.mxu0  ;;  %v2345_v46 = vpop.f32.mrf.mxu3 }
 0x27f   : > { %v2346_v22 = vadd.f32 %v2345_v46, %v2257_v60 }
 0x280   : > { %v2172_v15 = vpop.f32.mrf.mxu1 }
 0x281   : > { %v2435_v31 = vadd.f32 %v2434_v17, %v2346_v22  ;;  %v2173_v48 = vadd.f32 %v2172_v15, %v4065_v13 }
 0x282   : > { %v2259_v45 = vpop.f32.mrf.mxu2 }
 0x283   : > { %2489 = vst [vmem:[%s4142_s18 + $0x88] sm:$0xff] %v2435_v31  ;;  %v2520_v58 = vadd.f32 %v2519_v36, %v2435_v31  ;;  %v2558_v1 = vmul.f32 %v2435_v31, %v2435_v31  ;;  %v2260_v61 = vadd.f32 %v2259_v45, %v2171_v11 }
 0x285   : > { %v2589_v29 = vadd.f32 %v2588_v63, %v2558_v1 }
 0x286   : > { %v2437_v50 = vpop.f32.mrf.mxu0  ;;  %v2348_v6 = vpop.f32.mrf.mxu3 }
 0x287   : > { %v2349_v30 = vadd.f32 %v2348_v6, %v2260_v61 }
 0x288   : > { %v2175_v51 = vpop.f32.mrf.mxu1 }
 0x289   : > { %v2438_v43 = vadd.f32 %v2437_v50, %v2349_v30  ;;  %v2176_v12 = vadd.f32 %v2175_v51, %v4071_v4 }
 0x28a   : > { %v2261_v3 = vpop.f32.mrf.mxu2 }
 0x28b   : > { %2490 = vst [vmem:[%s4142_s18 + $0x90] sm:$0xff] %v2438_v43  ;;  %v2521_v49 = vadd.f32 %v2520_v58, %v2438_v43  ;;  %v2559_v52 = vmul.f32 %v2438_v43, %v2438_v43  ;;  %v2262_v41 = vadd.f32 %v2261_v3, %v2173_v48 }
 0x28d   : > { %v2590_v7 = vadd.f32 %v2589_v29, %v2559_v52 }
 0x28e   : > { %v2439_v39 = vpop.f32.mrf.mxu0  ;;  %v2350_v55 = vpop.f32.mrf.mxu3 }
 0x28f   : > { %v2351_v8 = vadd.f32 %v2350_v55, %v2262_v41 }
 0x290   : > { %v2177_v0 = vpop.f32.mrf.mxu1 }
 0x291   : > { %v2440_v47 = vadd.f32 %v2439_v39, %v2351_v8  ;;  %v2178_v40 = vadd.f32 %v2177_v0, %v4077_v27 }
 0x292   : > { %v2264_v19 = vpop.f32.mrf.mxu2 }
 0x293   : > { %2491 = vst [vmem:[%s4142_s18 + $0x98] sm:$0xff] %v2440_v47  ;;  %v2522_v32 = vadd.f32 %v2521_v49, %v2440_v47  ;;  %v2560_v37 = vmul.f32 %v2440_v47, %v2440_v47  ;;  %v2265_v25 = vadd.f32 %v2264_v19, %v2176_v12 }
 0x295   : > { %v2591_v13 = vadd.f32 %v2590_v7, %v2560_v37 }
 0x296   : > { %v2442_v53 = vpop.f32.mrf.mxu0  ;;  %v2353_v44 = vpop.f32.mrf.mxu3 }
 0x297   : > { %v2354_v35 = vadd.f32 %v2353_v44, %v2265_v25 }
 0x298   : > { %v2180_v16 = vpop.f32.mrf.mxu1 }
 0x299   : > { %v2443_v56 = vadd.f32 %v2442_v53, %v2354_v35  ;;  %v2181_v36 = vadd.f32 %v2180_v16, %v4083_v2 }
 0x29a   : > { %v2266_v33 = vpop.f32.mrf.mxu2 }
 0x29b   : > { %2492 = vst [vmem:[%s4142_s18 + $0xa0] sm:$0xff] %v2443_v56  ;;  %v2523_v23 = vadd.f32 %v2522_v32, %v2443_v56  ;;  %v2561_v42 = vmul.f32 %v2443_v56, %v2443_v56  ;;  %v2267_v21 = vadd.f32 %v2266_v33, %v2178_v40 }
 0x29d   : > { %v2592_v4 = vadd.f32 %v2591_v13, %v2561_v42 }
 0x29e   : > { %v2444_v18 = vpop.f32.mrf.mxu0  ;;  %v2355_v38 = vpop.f32.mrf.mxu3 }
 0x29f   : > { %v2356_v9 = vadd.f32 %v2355_v38, %v2267_v21 }
 0x2a0   : > { %v2182_v34 = vpop.f32.mrf.mxu1 }
 0x2a1   : > { %v2445_v24 = vadd.f32 %v2444_v18, %v2356_v9  ;;  %v2183_v45 = vadd.f32 %v2182_v34, %v4089_v54 }
 0x2a2   : > { %v2269_v62 = vpop.f32.mrf.mxu2 }
 0x2a3   : > { %2493 = vst [vmem:[%s4142_s18 + $0xa8] sm:$0xff] %v2445_v24  ;;  %v2524_v60 = vadd.f32 %v2523_v23, %v2445_v24  ;;  %v2562_v63 = vmul.f32 %v2445_v24, %v2445_v24  ;;  %v2270_v17 = vadd.f32 %v2269_v62, %v2181_v36 }
 0x2a5   : > { %v2593_v27 = vadd.f32 %v2592_v4, %v2562_v63 }
 0x2a6   : > { %v2447_v46 = vpop.f32.mrf.mxu0  ;;  %v2358_v22 = vpop.f32.mrf.mxu3 }
 0x2a7   : > { %v2359_v15 = vadd.f32 %v2358_v22, %v2270_v17 }
 0x2a8   : > { %v2185_v31 = vpop.f32.mrf.mxu1 }
 0x2a9   : > { %v2448_v11 = vadd.f32 %v2447_v46, %v2359_v15  ;;  %v2186_v48 = vadd.f32 %v2185_v31, %v4095_v20 }
 0x2aa   : > { %v2271_v58 = vpop.f32.mrf.mxu2 }
 0x2ab   : > { %2494 = vst [vmem:[%s4142_s18 + $0xb0] sm:$0xff] %v2448_v11  ;;  %v2525_v1 = vadd.f32 %v2524_v60, %v2448_v11  ;;  %v2563_v61 = vmul.f32 %v2448_v11, %v2448_v11  ;;  %v2272_v29 = vadd.f32 %v2271_v58, %v2183_v45 }
 0x2ad   : > { %v2594_v2 = vadd.f32 %v2593_v27, %v2563_v61 }
 0x2ae   : > { %v2449_v50 = vpop.f32.mrf.mxu0  ;;  %v2360_v6 = vpop.f32.mrf.mxu3 }
 0x2af   : > { %v2361_v30 = vadd.f32 %v2360_v6, %v2272_v29 }
 0x2b0   : > { %v2187_v51 = vpop.f32.mrf.mxu1 }
 0x2b1   : > { %v2450_v43 = vadd.f32 %v2449_v50, %v2361_v30  ;;  %v2188_v47 = vadd.f32 %v2187_v51, %v4101_v59 }
 0x2b2   : > { %v2274_v3 = vpop.f32.mrf.mxu2 }
 0x2b3   : > { %2495 = vst [vmem:[%s4142_s18 + $0xb8] sm:$0xff] %v2450_v43  ;;  %v2526_v49 = vadd.f32 %v2525_v1, %v2450_v43  ;;  %v2564_v52 = vmul.f32 %v2450_v43, %v2450_v43  ;;  %v2275_v41 = vadd.f32 %v2274_v3, %v2186_v48 }
 0x2b5   : > { %v2595_v54 = vadd.f32 %v2594_v2, %v2564_v52 }
 0x2b6   : > { %v2452_v7 = vpop.f32.mrf.mxu0  ;;  %v2363_v39 = vpop.f32.mrf.mxu3 }
 0x2b7   : > { %v2364_v55 = vadd.f32 %v2363_v39, %v2275_v41 }
 0x2b8   : > { %v2190_v8 = vpop.f32.mrf.mxu1 }
 0x2b9   : > { %v2453_v0 = vadd.f32 %v2452_v7, %v2364_v55  ;;  %v2191_v16 = vadd.f32 %v2190_v8, %v4107_v14 }
 0x2ba   : > { %v2276_v12 = vpop.f32.mrf.mxu2 }
 0x2bb   : > { %2496 = vst [vmem:[%s4142_s18 + $0xc0] sm:$0xff] %v2453_v0  ;;  %v2527_v19 = vadd.f32 %v2526_v49, %v2453_v0  ;;  %v2565_v32 = vmul.f32 %v2453_v0, %v2453_v0  ;;  %v2277_v37 = vadd.f32 %v2276_v12, %v2188_v47 }
 0x2bd   : > { %v2596_v20 = vadd.f32 %v2595_v54, %v2565_v32 }
 0x2be   : > { %v2454_v25 = vpop.f32.mrf.mxu0  ;;  %v2365_v13 = vpop.f32.mrf.mxu3 }
 0x2bf   : > { %v2366_v53 = vadd.f32 %v2365_v13, %v2277_v37 }
 0x2c0   : > { %v2192_v44 = vpop.f32.mrf.mxu1 }
 0x2c1   : > { %v2455_v35 = vadd.f32 %v2454_v25, %v2366_v53  ;;  %v2193_v9 = vadd.f32 %v2192_v44, %v4113_v10 }
 0x2c2   : > { %v2279_v56 = vpop.f32.mrf.mxu2 }
 0x2c3   : > { %2497 = vst [vmem:[%s4142_s18 + $0xc8] sm:$0xff] %v2455_v35  ;;  %v2528_v40 = vadd.f32 %v2527_v19, %v2455_v35  ;;  %v2566_v33 = vmul.f32 %v2455_v35, %v2455_v35  ;;  %v2280_v23 = vadd.f32 %v2279_v56, %v2191_v16 }
 0x2c5   : > { %v2597_v59 = vadd.f32 %v2596_v20, %v2566_v33 }
 0x2c6   : > { %v2457_v42 = vpop.f32.mrf.mxu0  ;;  %v2368_v21 = vpop.f32.mrf.mxu3 }
 0x2c7   : > { %v2369_v4 = vadd.f32 %v2368_v21, %v2280_v23 }
 0x2c8   : > { %v2195_v18 = vpop.f32.mrf.mxu1 }
 0x2c9   : > { %v2458_v38 = vadd.f32 %v2457_v42, %v2369_v4  ;;  %v2196_v46 = vadd.f32 %v2195_v18, %v4119_v5 }
 0x2ca   : > { %v2281_v34 = vpop.f32.mrf.mxu2 }
 0x2cb   : > { %2498 = vst [vmem:[%s4142_s18 + $0xd0] sm:$0xff] %v2458_v38  ;;  %v2529_v24 = vadd.f32 %v2528_v40, %v2458_v38  ;;  %v2567_v36 = vmul.f32 %v2458_v38, %v2458_v38  ;;  %v2282_v62 = vadd.f32 %v2281_v34, %v2193_v9 }
 0x2cd   : > { %v2598_v14 = vadd.f32 %v2597_v59, %v2567_v36 }
 0x2ce   : > { %v2459_v60 = vpop.f32.mrf.mxu0  ;;  %v2370_v63 = vpop.f32.mrf.mxu3 }
 0x2cf   : > { %v2371_v17 = vadd.f32 %v2370_v63, %v2282_v62 }
 0x2d0   : > { %v2197_v22 = vpop.f32.mrf.mxu1 }
 0x2d1   : > { %v2460_v27 = vadd.f32 %v2459_v60, %v2371_v17  ;;  %v2198_v2 = vadd.f32 %v2197_v22, %v4125_v28 }
 0x2d2   : > { %v2284_v15 = vpop.f32.mrf.mxu2 }
 0x2d3   : > { %2499 = vst [vmem:[%s4142_s18 + $0xd8] sm:$0xff] %v2460_v27  ;;  %v2530_v31 = vadd.f32 %v2529_v24, %v2460_v27  ;;  %v2568_v11 = vmul.f32 %v2460_v27, %v2460_v27  ;;  %v2285_v45 = vadd.f32 %v2284_v15, %v2196_v46 }
 0x2d5   : > { %v2599_v10 = vadd.f32 %v2598_v14, %v2568_v11 }
 0x2d6   : > { %v2462_v58 = vpop.f32.mrf.mxu0  ;;  %v2373_v1 = vpop.f32.mrf.mxu3 }
 0x2d7   : > { %v2374_v61 = vadd.f32 %v2373_v1, %v2285_v45 }
 0x2d8   : > { %v2200_v5 = vpop.f32.mrf.mxu1 }
 0x2d9   : > { %v2463_v29 = vadd.f32 %v2462_v58, %v2374_v61  ;;  %v2201_v41 = vadd.f32 %v2200_v5, %v4129_v26 }
 0x2da   : > { %v2286_v50 = vpop.f32.mrf.mxu2 }
 0x2db   : > { %2500 = vst [vmem:[%s4142_s18 + $0xe0] sm:$0xff] %v2463_v29  ;;  %v2531_v6 = vadd.f32 %v2530_v31, %v2463_v29  ;;  %v2569_v30 = vmul.f32 %v2463_v29, %v2463_v29  ;;  %v2287_v51 = vadd.f32 %v2286_v50, %v2198_v2 }
 0x2dd   : > { %v2600_v43 = vadd.f32 %v2599_v10, %v2569_v30 }
 0x2de   : > { %v2464_v48 = vpop.f32.mrf.mxu0  ;;  %v2375_v3 = vpop.f32.mrf.mxu3 }
 0x2df   : > { %v2376_v49 = vadd.f32 %v2375_v3, %v2287_v51 }
 0x2e0   : > { %v2202_v8 = vpop.f32.mrf.mxu1 }
 0x2e1   : > { %v2465_v52 = vadd.f32 %v2464_v48, %v2376_v49  ;;  %v2203_v32 = vadd.f32 %v2202_v8, %v4134_v57 }
 0x2e2   : > { %v2289_v54 = vpop.f32.mrf.mxu2 }
 0x2e3   : > { %2501 = vst [vmem:[%s4142_s18 + $0xe8] sm:$0xff] %v2465_v52  ;;  %v2532_v7 = vadd.f32 %v2531_v6, %v2465_v52  ;;  %v2570_v39 = vmul.f32 %v2465_v52, %v2465_v52  ;;  %v2290_v55 = vadd.f32 %v2289_v54, %v2201_v41 }
 0x2e5   : > { %v2601_v28 = vadd.f32 %v2600_v43, %v2570_v39 }
 0x2e6   : > { %v2467_v0 = vpop.f32.mrf.mxu0  ;;  %v2378_v47 = vpop.f32.mrf.mxu3 }
 0x2e7   : > { %v2379_v12 = vadd.f32 %v2378_v47, %v2290_v55 }
 0x2e9   : > { %v2468_v19 = vadd.f32 %v2467_v0, %v2379_v12 }
 0x2ea   : > { %v2291_v37 = vpop.f32.mrf.mxu2 }
 0x2eb   : > { %2502 = vst [vmem:[%s4142_s18 + $0xf0] sm:$0xff] %v2468_v19  ;;  %v2533_v20 = vadd.f32 %v2532_v7, %v2468_v19  ;;  %v2571_v25 = vmul.f32 %v2468_v19, %v2468_v19  ;;  %v2292_v13 = vadd.f32 %v2291_v37, %v2203_v32 }
 0x2ed   : > { %v2602_v26 = vadd.f32 %v2601_v28, %v2571_v25 }
 0x2ee   : > { %v2380_v53 = vpop.f32.mrf.mxu3  ;;  %v2469_v35 = vpop.f32.mrf.mxu0 }
 0x2ef   : > { %v2381_v44 = vadd.f32 %v2380_v53, %v2292_v13 }
 0x2f1   : > { %v2470_v16 = vadd.f32 %v2469_v35, %v2381_v44 }
 0x2f3   : > { %2503 = vst [vmem:[%s4142_s18 + $0xf8] sm:$0xff] %v2470_v16  ;;  %v2534_v56 = vadd.f32 %v2533_v20, %v2470_v16  ;;  %v2572_v40 = vmul.f32 %v2470_v16, %v2470_v16 }
 0x2f5   : > { %v2535_v33 = vrot.slane %v2534_v56, 4  ;;  %v2603_v23 = vadd.f32 %v2602_v26, %v2572_v40 }
 0x2f7   : > { %v2536_v59 = vadd.f32 %v2535_v33, %v2534_v56  ;;  %v2604_v42 = vrot.slane %v2603_v23, 4 }
 0x2f9   : > { %v2537_v21 = vrot.slane %v2536_v59, 2  ;;  %v2605_v57 = vadd.f32 %v2604_v42, %v2603_v23 }
 0x2fb   : > { %v2538_v4 = vadd.f32 %v2537_v21, %v2536_v59  ;;  %v2606_v18 = vrot.slane %v2605_v57, 2 }
 0x2fd   : > { %v2539_v38 = vrot.slane %v2538_v4, 1  ;;  %v2607_v9 = vadd.f32 %v2606_v18, %v2605_v57 }
 0x2ff   : > { %v2608_v34 = vrot.slane %v2607_v9, 1  ;;  %v2540_v24 = vadd.f32 %v2539_v38, %v2538_v4 }
 0x301   : > { %v2609_v36 = vadd.f32 %v2608_v34, %v2607_v9 }
 0x303   : > { %v2611_v62 = vsel %vm729_vm6, %v2540_v24, %v2609_v36 }
 0x304   : > { %2612 = vst [vmem:[%s262_s23] sm:$0x3] %v2611_v62 }
 0x305 PF: > { %s17_s21 = sadd.s32 1, %s3117_s21  }
 0x306   : > { %p14_p4 = scmp.ge.s32.totalorder %s17_s21, 4  }
 0x308   :  { %16 = sbr.rel (!%p14_p4) target bundleno = 1 (0x1), region = 82 }

// kernel: triple_conv.4
= control target key start
LH: loop header
LB: loop body
LE: loop exit
PB: predicated region body
PF: predicated region fallthrough
CT: control target
= control target key end

     0   :  { %s2983_s21 = smov 0   ;;  %s4034_s0 = inlined_call_operand.vmem [shape: f32[2,16,16,128], index: 0, kind: input, shape index: {}]   ;;  %s4035_s1 = inlined_call_operand.vmem [shape: f32[1,128], index: 1, kind: input, shape index: {}]   ;;  %s4036_s2 = inlined_call_operand.vmem [shape: f32[1,128], index: 2, kind: input, shape index: {}]   ;;  %s4037_s3 = inlined_call_operand.vmem [shape: bf16[1152,128], index: 3, kind: input, shape index: {}]   ;;  %s4038_s4 = inlined_call_operand.vmem [shape: f32[1,128], index: 4, kind: input, shape index: {}]   ;;  %s4039_s5 = inlined_call_operand.vmem [shape: f32[2,16,16,128], index: 5, kind: output, shape index: {0}]   ;;  %s4040_s6 = inlined_call_operand.vmem [shape: f32[2,2,128], index: 6, kind: output, shape index: {1}]  }
   0x1 LB: > { %s2531_s1 = sadd.s32 4294967295, %s2945_s21   ;;  %p2535_p0 = scmp.ge.s32.totalorder %s2945_s21, 1  ;;  %s2945_s21 = sphi %s2983_s21, %s17_s21  }
   0x2   : > { %p215_p1 = scmp.lt.s32.totalorder %s2945_s21, 3 }
   0x4   : > { %p216_p2 = pnand %p2535_p0, %p215_p1 }
   0x6   : > { %219 = sbr.rel (%p216_p2) target bundleno = 767 (0x2ff), region = 40 }
   0xb   : > { %v2840_v0 = vld [vmem:[%s4037_s3 + $0x38] sm:$0xff]  ;;  %p249_p3 = scmp.lt.s32.totalorder %s2531_s1, 1  ;;  %v2839_v1 = vld [vmem:[%s4037_s3 + $0x30] sm:$0xff]  ;;  %v2838_v2 = vld [vmem:[%s4037_s3 + $0x28] sm:$0xff]  ;;  %vm561_vm0 = vcmask 1040384   ;;  %v2947_v53 = vmov 0  }
   0xc   : > { %2905 = vmatpush.bf16.msra.mxu1 %v2840_v0  ;;  %2906 = vmatpush.bf16.msra.mxu2 %v2840_v0  ;;  %v2837_v15 = vld [vmem:[%s4037_s3 + $0x20] sm:$0xff]  ;;  %v2836_v22 = vld [vmem:[%s4037_s3 + $0x18] sm:$0xff]  ;;  %v2835_v26 = vld [vmem:[%s4037_s3 + $0x10] sm:$0xff]  ;;  %vm562_vm1 = vsmask.f32 256  ;;  %v3042_v54 = vrot.slane %v2947_v53, 7 }
   0xd   : > { %s4143_s1 = smov (!%p249_p3, %s2531_s1), 1  ;;  %2907 = vmatpush.bf16.msra.mxu3 %v2840_v0  ;;  %1503 = vmatpush.bf16.msra.mxu0 %v2840_v0  ;;  %v2834_v44 = vld [vmem:[%s4037_s3 + $0x8] sm:$0xff]  ;;  %v2833_v58 = vld [vmem:[%s4037_s3] sm:$0xff]  ;;  %vm3051_vm2 = vmand %vm561_vm0, %vm562_vm1  ;;  %vm598_vm3 = vsmask.f32 7424  ;;  %vm839_vm4 = vcmask 1046528  }
   0xe   : > { %s2831_s25 = sshll.u32 %s4143_s1, 8 }
   0xf   : > { %s3008_s30 = scalar_lea.vmem %s4034_s0, %s2831_s25  ;;  %s3932_s16 = scalar_lea.vmem %s4039_s5, %s2831_s25 }
  0x10   : > { %2908 = vmatpush.bf16.msra.mxu1 %v2839_v1  ;;  %2909 = vmatpush.bf16.msra.mxu2 %v2839_v1  ;;  %v270_v3 = vld [vmem:[%s3008_s30 + $0x30] sm:$0xff]  ;;  %v271_v4 = vld [vmem:[%s3008_s30 + $0x38] sm:$0xff]  ;;  %v272_v27 = vld [vmem:[%s3008_s30 + $0x40] sm:$0xff]  ;;  %s2540_s25 = sshll.u32 %s4143_s1, 1 }
  0x11   : > { %v278_v5 = vld [vmem:[%s3008_s30 + $0x70] sm:$0xff]  ;;  %2910 = vmatpush.bf16.msra.mxu3 %v2839_v1  ;;  %1504 = vmatpush.bf16.msra.mxu0 %v2839_v1  ;;  %v302_v6 = vpack.c.bf16 %v270_v3, %v270_v3  ;;  %v303_v7 = vpack.c.bf16 %v271_v4, %v271_v4  ;;  %v279_v8 = vld [vmem:[%s3008_s30 + $0x78] sm:$0xff]  ;;  %v273_v28 = vld [vmem:[%s3008_s30 + $0x48] sm:$0xff]  ;;  %v304_v35 = vpack.c.bf16 %v272_v27, %v272_v27  ;;  %s262_s19 = scalar_lea.vmem %s4040_s6, %s2540_s25 }
  0x12   : > { %v310_v9 = vpack.c.bf16 %v278_v5, %v278_v5  ;;  %v286_v10 = vld [vmem:[%s3008_s30 + $0xb0] sm:$0xff]  ;;  %v287_v11 = vld [vmem:[%s3008_s30 + $0xb8] sm:$0xff]  ;;  %v311_v12 = vpack.c.bf16 %v279_v8, %v279_v8  ;;  %v280_v31 = vld [vmem:[%s3008_s30 + $0x80] sm:$0xff]  ;;  %v305_v36 = vpack.c.bf16 %v273_v28, %v273_v28 }
  0x13   : > { %v318_v13 = vpack.c.bf16 %v286_v10, %v286_v10  ;;  %v319_v14 = vpack.c.bf16 %v287_v11, %v287_v11  ;;  %v366_v16 = vunpack.c.l.b16 %v302_v6  ;;  %v367_v17 = vunpack.c.l.b16 %v303_v7  ;;  %v281_v32 = vld [vmem:[%s3008_s30 + $0x88] sm:$0xff]  ;;  %v288_v33 = vld [vmem:[%s3008_s30 + $0xc0] sm:$0xff]  ;;  %v2856_v4 = vld [vmem:[%s4037_s3 + $0xb8] sm:$0xff] }
  0x14   : > { %2911 = vmatpush.bf16.msra.mxu1 %v2838_v2  ;;  %2912 = vmatpush.bf16.msra.mxu2 %v2838_v2  ;;  %v374_v18 = vunpack.c.l.b16 %v310_v9  ;;  %v375_v19 = vunpack.c.l.b16 %v311_v12  ;;  %v289_v37 = vld [vmem:[%s3008_s30 + $0xc8] sm:$0xff]  ;;  %v264_v38 = vld [vmem:[%s3008_s30] sm:$0xff]  ;;  %v312_v41 = vpack.c.bf16 %v280_v31, %v280_v31  ;;  %v313_v42 = vpack.c.bf16 %v281_v32, %v281_v32  ;;  %v2864_v5 = vld [vmem:[%s4037_s3 + $0xf8] sm:$0xff] }
  0x15   : > { %2913 = vmatpush.bf16.msra.mxu3 %v2838_v2  ;;  %1505 = vmatpush.bf16.msra.mxu0 %v2838_v2  ;;  %v382_v20 = vunpack.c.l.b16 %v318_v13  ;;  %v383_v21 = vunpack.c.l.b16 %v319_v14  ;;  %v395_v23 = vpack.c.b16 %v367_v17, %v366_v16  ;;  %v265_v39 = vld [vmem:[%s3008_s30 + $0x8] sm:$0xff]  ;;  %v320_v43 = vpack.c.bf16 %v288_v33, %v288_v33  ;;  %v2848_v12 = vld [vmem:[%s4037_s3 + $0x78] sm:$0xff]  ;;  %v274_v16 = vld [vmem:[%s3008_s30 + $0x50] sm:$0xff] }
  0x16   : > { %v399_v24 = vpack.c.b16 %v375_v19, %v374_v18  ;;  %v321_v50 = vpack.c.bf16 %v289_v37, %v289_v37  ;;  %v296_v51 = vpack.c.bf16 %v264_v38, %v264_v38  ;;  %v297_v52 = vpack.c.bf16 %v265_v39, %v265_v39  ;;  %v2872_v13 = vld [vmem:[%s4037_s3 + $0x138] sm:$0xff]  ;;  %v2855_v17 = vld [vmem:[%s4037_s3 + $0xb0] sm:$0xff]  ;;  %v2862_v37 = vld [vmem:[%s4037_s3 + $0xe8] sm:$0xff] }
  0x17   : > { %v403_v25 = vpack.c.b16 %v383_v21, %v382_v20  ;;  %v437_v29 = vshrl.u32 %v395_v23, 16  ;;  %v440_v40 = vshll.u32 %v395_v23, 16  ;;  %v368_v55 = vunpack.c.l.b16 %v304_v35  ;;  %v2863_v18 = vld [vmem:[%s4037_s3 + $0xf0] sm:$0xff]  ;;  %v275_v19 = vld [vmem:[%s3008_s30 + $0x58] sm:$0xff] }
  0x18   : > { %2914 = vmatpush.bf16.msra.mxu1 %v2837_v15  ;;  %2915 = vmatpush.bf16.msra.mxu2 %v2837_v15  ;;  %v465_v30 = vshrl.u32 %v399_v24, 16  ;;  %v468_v47 = vshll.u32 %v399_v24, 16  ;;  %v369_v56 = vunpack.c.l.b16 %v305_v36  ;;  %v376_v57 = vunpack.c.l.b16 %v312_v41  ;;  %v282_v20 = vld [vmem:[%s3008_s30 + $0x90] sm:$0xff]  ;;  %v283_v21 = vld [vmem:[%s3008_s30 + $0x98] sm:$0xff]  ;;  %v2854_v36 = vld [vmem:[%s4037_s3 + $0xa8] sm:$0xff] }
  0x19   : > { %2916 = vmatpush.bf16.msra.mxu3 %v2837_v15  ;;  %1506 = vmatpush.bf16.msra.mxu0 %v2837_v15  ;;  %v493_v34 = vshrl.u32 %v403_v25, 16  ;;  %v3036_v45 = vrot.slane %v437_v29, 7  ;;  %v496_v48 = vshll.u32 %v403_v25, 16  ;;  %v377_v61 = vunpack.c.l.b16 %v313_v42  ;;  %v266_v27 = vld [vmem:[%s3008_s30 + $0x10] sm:$0xff]  ;;  %v267_v28 = vld [vmem:[%s3008_s30 + $0x18] sm:$0xff] }
  0x1a   : > { %v3038_v46 = vrot.slane %v465_v30, 7  ;;  %v384_v62 = vunpack.c.l.b16 %v320_v43  ;;  %v385_v1 = vunpack.c.l.b16 %v321_v50  ;;  %v360_v2 = vunpack.c.l.b16 %v296_v51  ;;  %v2847_v29 = vld [vmem:[%s4037_s3 + $0x70] sm:$0xff] }
  0x1b   : > { %v3040_v49 = vrot.slane %v493_v34, 7  ;;  %v442_v59 = vor.u32 %v440_v40, %v3036_v45  ;;  %v361_v3 = vunpack.c.l.b16 %v297_v52  ;;  %v3070_v8 = vpack.c.b16 %v369_v56, %v368_v55  ;;  %v2871_v32 = vld [vmem:[%s4037_s3 + $0x130] sm:$0xff]  ;;  %v2846_v55 = vld [vmem:[%s4037_s3 + $0x68] sm:$0xff] }
  0x1c   : > { %2917 = vmatpush.bf16.msra.mxu1 %v2836_v22  ;;  %2918 = vmatpush.bf16.msra.mxu2 %v2836_v22  ;;  %v470_v60 = vor.u32 %v468_v47, %v3038_v46  ;;  %v3072_v9 = vpack.c.b16 %v377_v61, %v376_v57  ;;  %v3081_v11 = vsel %vm3051_vm2, 0, %v3042_v54  ;;  %v3089_v14 = vpack.c.b16 %v385_v1, %v384_v62  ;;  %v2870_v56 = vld [vmem:[%s4037_s3 + $0x128] sm:$0xff] }
  0x1d   : > { %2919 = vmatpush.bf16.msra.mxu3 %v2836_v22  ;;  %1507 = vmatpush.bf16.msra.mxu0 %v2836_v22  ;;  %v498_v0 = vor.u32 %v496_v48, %v3040_v49  ;;  %v3064_v6 = vsel %vm3051_vm2, 0, %v442_v59  ;;  %4070 = vst [vmem:[#allocation4_spill] sm:$0xff] %v3081_v11  ;;  %v3091_v15 = vpack.c.b16 %v361_v3, %v360_v2  ;;  %v290_v22 = vld [vmem:[%s3008_s30 + $0xd0] sm:$0xff]  ;;  %v444_v23 = vshrl.u32 %v3070_v8, 16  ;;  %v2861_v59 = vld [vmem:[%s4037_s3 + $0xe0] sm:$0xff] }
  0x1e   : > { %4068 = vst [vmem:[#allocation2_spill] sm:$0xff] %v3064_v6  ;;  %v3068_v7 = vsel %vm3051_vm2, 0, %v470_v60  ;;  %v472_v24 = vshrl.u32 %v3072_v9, 16  ;;  %v306_v25 = vpack.c.bf16 %v274_v16, %v274_v16  ;;  %v500_v30 = vshrl.u32 %v3089_v14, 16  ;;  %v2860_v16 = vld [vmem:[%s4037_s3 + $0xd8] sm:$0xff] }
  0x1f   : > { %4069 = vst [vmem:[#allocation3_spill] sm:$0xff] %v3068_v7  ;;  %v3076_v10 = vsel %vm3051_vm2, 0, %v498_v0  ;;  %v416_v31 = vshrl.u32 %v3091_v15, 16  ;;  %v307_v33 = vpack.c.bf16 %v275_v19, %v275_v19  ;;  %v447_v34 = vshll.u32 %v3070_v8, 16 }
  0x20   : > { %2920 = vmatpush.bf16.msra.mxu1 %v2835_v26  ;;  %2921 = vmatpush.bf16.msra.mxu2 %v2835_v26  ;;  %v475_v35 = vshll.u32 %v3072_v9, 16  ;;  %v314_v38 = vpack.c.bf16 %v282_v20, %v282_v20  ;;  %v315_v39 = vpack.c.bf16 %v283_v21, %v283_v21  ;;  %v322_v40 = vpack.c.bf16 %v290_v22, %v290_v22  ;;  %v2845_v9 = vld [vmem:[%s4037_s3 + $0x60] sm:$0xff] }
  0x21   : > { %2922 = vmatpush.bf16.msra.mxu3 %v2835_v26  ;;  %1508 = vmatpush.bf16.msra.mxu0 %v2835_v26  ;;  %v291_v26 = vld [vmem:[%s3008_s30 + $0xd8] sm:$0xff]  ;;  %v298_v42 = vpack.c.bf16 %v266_v27, %v266_v27  ;;  %v299_v43 = vpack.c.bf16 %v267_v28, %v267_v28  ;;  %v3131_v47 = vrot.slane %v472_v24, 7  ;;  %v503_v48 = vshll.u32 %v3089_v14, 16  ;;  %v2851_v27 = vld [vmem:[%s4037_s3 + $0x90] sm:$0xff] }
  0x22   : > { %v323_v41 = vpack.c.bf16 %v291_v26, %v291_v26  ;;  %v370_v50 = vunpack.c.l.b16 %v306_v25  ;;  %v3134_v51 = vrot.slane %v500_v30, 7  ;;  %v3136_v52 = vrot.slane %v416_v31, 7  ;;  %v2844_v24 = vld [vmem:[%s4037_s3 + $0x58] sm:$0xff]  ;;  %v2859_v28 = vld [vmem:[%s4037_s3 + $0xd0] sm:$0xff] }
  0x23   : > { %v419_v53 = vshll.u32 %v3091_v15, 16  ;;  %v371_v57 = vunpack.c.l.b16 %v307_v33  ;;  %v378_v60 = vunpack.c.l.b16 %v314_v38  ;;  %v379_v61 = vunpack.c.l.b16 %v315_v39  ;;  %v2852_v15 = vld [vmem:[%s4037_s3 + $0x98] sm:$0xff]  ;;  %v2843_v31 = vld [vmem:[%s4037_s3 + $0x50] sm:$0xff]  ;;  %v277_v33 = vld [vmem:[%s3008_s30 + $0x68] sm:$0xff] }
  0x24   : > { %2923 = vmatpush.bf16.msra.mxu1 %v2834_v44  ;;  %2924 = vmatpush.bf16.msra.mxu2 %v2834_v44  ;;  %v386_v62 = vunpack.c.l.b16 %v322_v40  ;;  %v387_v0 = vunpack.c.l.b16 %v323_v41  ;;  %v362_v1 = vunpack.c.l.b16 %v298_v42  ;;  %v363_v2 = vunpack.c.l.b16 %v299_v43  ;;  %v2868_v25 = vld [vmem:[%s4037_s3 + $0x118] sm:$0xff]  ;;  %v293_v39 = vld [vmem:[%s3008_s30 + $0xe8] sm:$0xff]  ;;  %v268_v40 = vld [vmem:[%s3008_s30 + $0x20] sm:$0xff] }
  0x25   : > { %2925 = vmatpush.bf16.msra.mxu3 %v2834_v44  ;;  %1509 = vmatpush.bf16.msra.mxu0 %v2834_v44  ;;  %v3129_v44 = vrot.slane %v444_v23, 7  ;;  %v421_v8 = vor.u32 %v419_v53, %v3136_v52  ;;  %v3163_v14 = vpack.c.b16 %v379_v61, %v378_v60  ;;  %v2867_v41 = vld [vmem:[%s4037_s3 + $0x110] sm:$0xff]  ;;  %v269_v53 = vld [vmem:[%s3008_s30 + $0x28] sm:$0xff]  ;;  %v309_v60 = vpack.c.bf16 %v277_v33, %v277_v33 }
  0x27   : > { %v449_v3 = vor.u32 %v447_v34, %v3129_v44  ;;  %v3189_v22 = vsel %vm3051_vm2, 0, %v421_v8  ;;  %v479_v26 = vshrl.u32 %v3163_v14, 16  ;;  %v284_v34 = vld [vmem:[%s3008_s30 + $0xa0] sm:$0xff]  ;;  %v482_v43 = vshll.u32 %v3163_v14, 16 }
  0x28   : > { %2926 = vmatpush.bf16.msra.mxu1 %v2833_v58  ;;  %2927 = vmatpush.bf16.msra.mxu2 %v2833_v58  ;;  %v316_v61 = vpack.c.bf16 %v284_v34, %v284_v34  ;;  %v2849_v8 = vld [vmem:[%s4037_s3 + $0x80] sm:$0xff] }
  0x29   : > { %2928 = vmatpush.bf16.msra.mxu3 %v2833_v58  ;;  %1510 = vmatpush.bf16.msra.mxu0 %v2833_v58  ;;  %v2853_v58 = vld [vmem:[%s4037_s3 + $0xa0] sm:$0xff]  ;;  %v3177_v19 = vsel %vm3051_vm2, 0, %v449_v3  ;;  %v3227_v42 = vrot.slane %v479_v26, 7  ;;  %v301_v3 = vpack.c.bf16 %v269_v53, %v269_v53 }
  0x2a   : > { %4071 = vst [vmem:[#allocation5_spill] sm:$0xff] %v3177_v19 }
  0x2b   : > { %1531 = vmatmul.bf16.vlgmr.msra.gmra.mxu1 %v3064_v6  ;;  %1551 = vmatmul.bf16.vlgmr.msra.gmra.mxu2 %v3068_v7 }
  0x2c   : > { %1681 = vmatpush.bf16.msrb.mxu2 %v2856_v4  ;;  %1571 = vmatmul.bf16.vlgmr.msra.gmra.mxu3 %v3076_v10  ;;  %v477_v4 = vor.u32 %v475_v35, %v3131_v47  ;;  %v285_v35 = vld [vmem:[%s3008_s30 + $0xa8] sm:$0xff] }
  0x2d   : > { %1770 = vmatpush.bf16.msrb.mxu3 %v2864_v5  ;;  %1511 = vmatmul.bf16.vlgmr.msra.gmra.mxu0 %v3081_v11  ;;  %v505_v5 = vor.u32 %v503_v48, %v3134_v51 }
  0x2e   : > { %1592 = vmatpush.bf16.msrb.mxu1 %v2848_v12  ;;  %1859 = vmatpush.bf16.msrb.mxu0 %v2872_v13  ;;  %v3158_v12 = vpack.c.b16 %v371_v57, %v370_v50  ;;  %v2869_v13 = vld [vmem:[%s4037_s3 + $0x120] sm:$0xff]  ;;  %v3181_v20 = vsel %vm3051_vm2, 0, %v477_v4  ;;  %v2850_v50 = vld [vmem:[%s4037_s3 + $0x88] sm:$0xff] }
  0x2f   : > { %v3185_v21 = vsel %vm3051_vm2, 0, %v505_v5  ;;  %v2842_v4 = vld [vmem:[%s4037_s3 + $0x48] sm:$0xff] }
  0x30   : > { %1682 = vmatpush.bf16.msrb.mxu2 %v2855_v17  ;;  %v3171_v17 = vpack.c.b16 %v387_v0, %v386_v62  ;;  %v451_v23 = vshrl.u32 %v3158_v12, 16  ;;  %v454_v38 = vshll.u32 %v3158_v12, 16  ;;  %v317_v62 = vpack.c.bf16 %v285_v35, %v285_v35  ;;  %v2866_v5 = vld [vmem:[%s4037_s3 + $0x108] sm:$0xff] }
  0x31   : > { %1771 = vmatpush.bf16.msrb.mxu3 %v2863_v18  ;;  %v3173_v18 = vpack.c.b16 %v363_v2, %v362_v1  ;;  %v325_v1 = vpack.c.bf16 %v293_v39, %v293_v39  ;;  %v300_v2 = vpack.c.bf16 %v268_v40, %v268_v40 }
  0x32   : > { %1593 = vmatpush.bf16.msrb.mxu1 %v2847_v29  ;;  %1860 = vmatpush.bf16.msrb.mxu0 %v2871_v32  ;;  %v507_v29 = vshrl.u32 %v3171_v17, 16  ;;  %v276_v32 = vld [vmem:[%s3008_s30 + $0x60] sm:$0xff]  ;;  %v510_v48 = vshll.u32 %v3171_v17, 16  ;;  %v373_v17 = vunpack.c.l.b16 %v309_v60 }
  0x33   : > { %v423_v30 = vshrl.u32 %v3173_v18, 16  ;;  %v364_v26 = vunpack.c.l.b16 %v300_v2 }
  0x34   : > { %1683 = vmatpush.bf16.msrb.mxu2 %v2854_v36  ;;  %v292_v36 = vld [vmem:[%s3008_s30 + $0xe0] sm:$0xff] }
  0x35   : > { %1772 = vmatpush.bf16.msrb.mxu3 %v2862_v37  ;;  %v3219_v37 = vrot.slane %v451_v23, 7  ;;  %v3240_v57 = vrot.slane %v423_v30, 7  ;;  %v324_v0 = vpack.c.bf16 %v292_v36, %v292_v36  ;;  %v381_v23 = vunpack.c.l.b16 %v317_v62 }
  0x36   : > { %1594 = vmatpush.bf16.msrb.mxu1 %v2846_v55  ;;  %1861 = vmatpush.bf16.msrb.mxu0 %v2870_v56  ;;  %v2858_v55 = vld [vmem:[%s4037_s3 + $0xc8] sm:$0xff]  ;;  %v3238_v56 = vrot.slane %v507_v29, 7  ;;  %v2865_v29 = vld [vmem:[%s4037_s3 + $0x100] sm:$0xff] }
  0x37   : > { %v456_v12 = vor.u32 %v454_v38, %v3219_v37 }
  0x38   : > { %1684 = vmatpush.bf16.msrb.mxu2 %v2853_v58  ;;  %v426_v58 = vshll.u32 %v3173_v18, 16  ;;  %v512_v14 = vor.u32 %v510_v48, %v3238_v56  ;;  %v380_v18 = vunpack.c.l.b16 %v316_v61  ;;  %v2880_v48 = vld [vmem:[%s4037_s3 + $0x178] sm:$0xff] }
  0x39   : > { %1773 = vmatpush.bf16.msrb.mxu3 %v2861_v59  ;;  %v308_v59 = vpack.c.bf16 %v276_v32, %v276_v32  ;;  %v3267_v30 = vsel %vm3051_vm2, 0, %v456_v12 }
  0x3a   : > { %1595 = vmatpush.bf16.msrb.mxu1 %v2845_v9  ;;  %1862 = vmatpush.bf16.msrb.mxu0 %v2869_v13  ;;  %v2857_v9 = vld [vmem:[%s4037_s3 + $0xc0] sm:$0xff]  ;;  %v484_v13 = vor.u32 %v482_v43, %v3227_v42  ;;  %4072 = vst [vmem:[#allocation6_spill] sm:$0xff] %v3267_v30  ;;  %v402_v33 = vpack.c.b16 %v381_v23, %v380_v18  ;;  %v3275_v34 = vsel %vm3051_vm2, 0, %v512_v14  ;;  %v2896_v43 = vld [vmem:[%s4037_s3 + $0x1f8] sm:$0xff]  ;;  %v582_v18 = vsel %vm3051_vm2, %v3136_v52, 0 }
  0x3b   : > { %1536 = vmatmul.bf16.gmra.mxu1 %v3177_v19  ;;  %1556 = vmatmul.bf16.gmra.mxu2 %v3181_v20  ;;  %v600_v23 = vshrl.u32 %v3081_v11, 16 }
  0x3c   : > { %1685 = vmatpush.bf16.msrb.mxu2 %v2852_v15  ;;  %1576 = vmatmul.bf16.gmra.mxu3 %v3185_v21  ;;  %v428_v15 = vor.u32 %v426_v58, %v3240_v57  ;;  %v486_v40 = vshrl.u32 %v402_v33, 16  ;;  %v489_v61 = vshll.u32 %v402_v33, 16  ;;  %v840_v33 = vrot.slane %v3081_v11, 1 }
  0x3d   : > { %1774 = vmatpush.bf16.msrb.mxu3 %v2860_v16  ;;  %1516 = vmatmul.bf16.gmra.mxu0 %v3189_v22  ;;  %v372_v16 = vunpack.c.l.b16 %v308_v59 }
  0x3e   : > { %1596 = vmatpush.bf16.msrb.mxu1 %v2844_v24  ;;  %1863 = vmatpush.bf16.msrb.mxu0 %v2868_v25  ;;  %v388_v24 = vunpack.c.l.b16 %v324_v0  ;;  %v389_v25 = vunpack.c.l.b16 %v325_v1  ;;  %v3279_v35 = vsel %vm3051_vm2, 0, %v428_v15  ;;  %v3299_v60 = vrot.slane %v486_v40, 7 }
  0x3f   : > { %v398_v32 = vpack.c.b16 %v373_v17, %v372_v16  ;;  %v602_v15 = vshll.u32 %v3081_v11, 16  ;;  %v581_v16 = vsel %vm3051_vm2, %v3042_v54, 0  ;;  %v614_v17 = vshll.u32 %v3189_v22, 16 }
  0x40   : > { %1686 = vmatpush.bf16.msrb.mxu2 %v2851_v27  ;;  %v365_v27 = vunpack.c.l.b16 %v301_v3  ;;  %v406_v36 = vpack.c.b16 %v389_v25, %v388_v24  ;;  %v607_v25 = vshll.u32 %v581_v16, 16 }
  0x41   : > { %1775 = vmatpush.bf16.msrb.mxu3 %v2859_v28  ;;  %v2841_v28 = vld [vmem:[%s4037_s3 + $0x40] sm:$0xff]  ;;  %v458_v39 = vshrl.u32 %v398_v32, 16  ;;  %v461_v59 = vshll.u32 %v398_v32, 16  ;;  %v604_v24 = vrot.slane %v602_v15, 1 }
  0x42   : > { %1597 = vmatpush.bf16.msrb.mxu1 %v2843_v31  ;;  %1864 = vmatpush.bf16.msrb.mxu0 %v2867_v41  ;;  %v3271_v31 = vsel %vm3051_vm2, 0, %v484_v13  ;;  %v394_v38 = vpack.c.b16 %v365_v27, %v364_v26  ;;  %v2888_v41 = vld [vmem:[%s4037_s3 + $0x1b8] sm:$0xff]  ;;  %v517_v0 = vshll.u32 %v406_v36, 16  ;;  %v612_v26 = vshrl.u32 %v3189_v22, 16 }
  0x43   : > { %v3297_v58 = vrot.slane %v458_v39, 7  ;;  %v616_v27 = vrot.slane %v614_v17, 1  ;;  %v609_v32 = vrot.slane %v607_v25, 1 }
  0x44   : > { %1687 = vmatpush.bf16.msrb.mxu2 %v2850_v50  ;;  %v514_v50 = vshrl.u32 %v406_v36, 16  ;;  %v430_v53 = vshrl.u32 %v394_v38, 16  ;;  %v433_v2 = vshll.u32 %v394_v38, 16  ;;  %v841_v36 = vrot.slane %v581_v16, 1 }
  0x45   : > { %1776 = vmatpush.bf16.msrb.mxu3 %v2858_v55  ;;  %v2904_v55 = vld [vmem:[%s4037_s3 + $0x238] sm:$0xff]  ;;  %v463_v3 = vor.u32 %v461_v59, %v3297_v58  ;;  %v617_v54 = vor.u32 %v616_v27, %v612_v26  ;;  %v624_v59 = vshrl.u32 %v3279_v35, 16 }
  0x46   : > { %1598 = vmatpush.bf16.msrb.mxu1 %v2842_v4  ;;  %1865 = vmatpush.bf16.msrb.mxu0 %v2866_v5  ;;  %v3301_v62 = vrot.slane %v514_v50, 7  ;;  %v3303_v1 = vrot.slane %v430_v53, 7  ;;  %v491_v4 = vor.u32 %v489_v61, %v3299_v60  ;;  %v3344_v52 = vsel %vm839_vm4, %v840_v33, %v841_v36  ;;  %v2903_v53 = vld [vmem:[%s4037_s3 + $0x230] sm:$0xff]  ;;  %v2878_v36 = vld [vmem:[%s4037_s3 + $0x168] sm:$0xff] }
  0x47   : > { %4075 = vst [vmem:[#allocation9_spill] sm:$0xff] %v3344_v52  ;;  %v626_v50 = vshll.u32 %v3279_v35, 16  ;;  %v585_v33 = vsel %vm3051_vm2, %v3036_v45, 0 }
  0x48   : > { %1688 = vmatpush.bf16.msrb.mxu2 %v2849_v8  ;;  %v519_v5 = vor.u32 %v517_v0, %v3301_v62  ;;  %v435_v8 = vor.u32 %v433_v2, %v3303_v1  ;;  %v3315_v12 = vsel %vm3051_vm2, 0, %v491_v4  ;;  %v843_v2 = vrot.slane %v3189_v22, 1 }
  0x49   : > { %1777 = vmatpush.bf16.msrb.mxu3 %v2857_v9  ;;  %v3311_v9 = vsel %vm3051_vm2, 0, %v463_v3  ;;  %v628_v61 = vrot.slane %v626_v50, 1  ;;  %v844_v3 = vrot.slane %v582_v18, 1 }
  0x4a   : > { %1599 = vmatpush.bf16.msrb.mxu1 %v2841_v28  ;;  %1866 = vmatpush.bf16.msrb.mxu0 %v2865_v29  ;;  %4073 = vst [vmem:[#allocation7_spill] sm:$0xff] %v3311_v9  ;;  %v3319_v13 = vsel %vm3051_vm2, 0, %v519_v5  ;;  %v3323_v14 = vsel %vm3051_vm2, 0, %v435_v8  ;;  %v619_v28 = vshll.u32 %v582_v18, 16  ;;  %v605_v29 = vor.u32 %v604_v24, %v600_v23 }
  0x4b   : > { %1541 = vmatmul.bf16.gmra.mxu1 %v3267_v30  ;;  %1561 = vmatmul.bf16.gmra.mxu2 %v3271_v31  ;;  %v629_v4 = vor.u32 %v628_v61, %v624_v59  ;;  %v3369_v8 = vsel %vm839_vm4, %v843_v2, %v844_v3  ;;  %v636_v16 = vshrl.u32 %v3323_v14, 16  ;;  %v846_v23 = vrot.slane %v3279_v35, 1 }
  0x4c   : > { %1581 = vmatmul.bf16.gmra.mxu3 %v3275_v34  ;;  %2037 = vmatpush.bf16.msra.mxu2 %v2888_v41  ;;  %v621_v38 = vrot.slane %v619_v28, 1  ;;  %v3341_v39 = vsel %vm598_vm3, %v605_v29, %v609_v32  ;;  %v2887_v41 = vld [vmem:[%s4037_s3 + $0x1b0] sm:$0xff]  ;;  %v2894_v29 = vld [vmem:[%s4037_s3 + $0x1e8] sm:$0xff]  ;;  %v650_v32 = vshll.u32 %v3064_v6, 16  ;;  %v662_v59 = vshll.u32 %v3177_v19, 16 }
  0x4d   : > { %1521 = vmatmul.bf16.gmra.mxu0 %v3279_v35  ;;  %2126 = vmatpush.bf16.msra.mxu3 %v2896_v43  ;;  %4074 = vst [vmem:[#allocation8_spill] sm:$0xff] %v3341_v39  ;;  %v2895_v43 = vld [vmem:[%s4037_s3 + $0x1f0] sm:$0xff]  ;;  %v586_v61 = vsel %vm3051_vm2, %v3129_v44, 0 }
  0x4e   : > { %1948 = vmatpush.bf16.msra.mxu1 %v2880_v48  ;;  %2215 = vmatpush.bf16.msra.mxu0 %v2904_v55  ;;  %v622_v40 = vsel %vm598_vm3, %v617_v54, %v621_v38  ;;  %v2879_v48 = vld [vmem:[%s4037_s3 + $0x170] sm:$0xff]  ;;  %v583_v55 = vsel %vm3051_vm2, %v3240_v57, 0  ;;  %v638_v57 = vshll.u32 %v3323_v14, 16  ;;  %v648_v54 = vshrl.u32 %v3064_v6, 16 }
  0x4f   : > { %v631_v0 = vshll.u32 %v583_v55, 16  ;;  %v847_v24 = vrot.slane %v583_v55, 1  ;;  %v652_v38 = vrot.slane %v650_v32, 1  ;;  %v664_v2 = vrot.slane %v662_v59, 1 }
  0x50   : > { %2038 = vmatpush.bf16.msra.mxu2 %v2887_v41  ;;  %v640_v17 = vrot.slane %v638_v57, 1  ;;  %v2902_v41 = vld [vmem:[%s4037_s3 + $0x228] sm:$0xff]  ;;  %v667_v3 = vshll.u32 %v586_v61, 16  ;;  %v3430_v57 = vld [vmem:[%s4038_s4] ss:$0 sm:$0xff]  ;;  %v587_v32 = vsel %vm3051_vm2, %v3219_v37, 0 }
  0x51   : > { %2127 = vmatpush.bf16.msra.mxu3 %v2895_v43  ;;  %v633_v5 = vrot.slane %v631_v0, 1  ;;  %v3384_v27 = vsel %vm839_vm4, %v846_v23, %v847_v24  ;;  %v849_v43 = vrot.slane %v3323_v14, 1  ;;  %v653_v45 = vor.u32 %v652_v38, %v648_v54 }
  0x52   : > { %1949 = vmatpush.bf16.msra.mxu1 %v2879_v48  ;;  %2216 = vmatpush.bf16.msra.mxu0 %v2903_v53  ;;  %v641_v25 = vor.u32 %v640_v17, %v636_v16  ;;  %v660_v0 = vshrl.u32 %v3177_v19, 16  ;;  %v669_v16 = vrot.slane %v667_v3, 1  ;;  %v672_v37 = vshrl.u32 %v3267_v30, 16 }
  0x53   : > { %v3372_v15 = vsel %vm598_vm3, %v629_v4, %v633_v5  ;;  %v852_v4 = vrot.slane %v3064_v6, 1  ;;  %v853_v5 = vrot.slane %v585_v33, 1  ;;  %v855_v59 = vrot.slane %v3177_v19, 1 }
  0x55   : > { %2128 = vmatpush.bf16.msra.mxu3 %v2894_v29 }
  0x56   : > { %1950 = vmatpush.bf16.msra.mxu1 %v2878_v36  ;;  %2217 = vmatpush.bf16.msra.mxu0 %v2902_v41 }
  0x5b   : > { %1546 = vmatmul.bf16.gmra.mxu1 %v3311_v9  ;;  %1566 = vmatmul.bf16.gmra.mxu2 %v3315_v12 }
  0x5c   : > { %1586 = vmatmul.bf16.gmra.mxu3 %v3319_v13 }
  0x5d   : > { %1526 = vmatmul.bf16.gmra.mxu0 %v3323_v14 }
  0x6b   : > { %1600 = vmatmul.bf16.vlgmr.msrb.gmra.mxu1 %v3341_v39  ;;  %1689 = vmatmul.bf16.vlgmr.msrb.gmra.mxu2 %v3344_v52 }
  0x6c   : > { %1778 = vmatmul.bf16.vlgmr.msrb.gmra.mxu3 %v3189_v22  ;;  %v584_v22 = vsel %vm3051_vm2, %v3303_v1, 0  ;;  %v2886_v1 = vld [vmem:[%s4037_s3 + $0x1a8] sm:$0xff] }
  0x6d   : > { %1867 = vmatmul.bf16.vlgmr.msrb.gmra.mxu0 %v622_v40  ;;  %v643_v18 = vshll.u32 %v584_v22, 16  ;;  %2039 = vmatpush.bf16.msra.mxu2 %v2886_v1  ;;  %v850_v48 = vrot.slane %v584_v22, 1  ;;  %v665_v22 = vor.u32 %v664_v2, %v660_v0  ;;  %v674_v1 = vshll.u32 %v3267_v30, 16 }
  0x6e   : > { %v856_v0 = vrot.slane %v586_v61, 1 }
  0x6f   : > { %v645_v26 = vrot.slane %v643_v18, 1  ;;  %v3412_v53 = vsel %vm839_vm4, %v849_v43, %v850_v48  ;;  %v3433_v18 = vsel %vm839_vm4, %v852_v4, %v853_v5  ;;  %v3441_v24 = vsel %vm598_vm3, %v665_v22, %v669_v16 }
  0x70   : > { %4077 = vst [vmem:[#allocation11_spill] sm:$0xff] %v3433_v18  ;;  %v676_v48 = vrot.slane %v674_v1, 1 }
  0x71   : > { %v3387_v28 = vsel %vm598_vm3, %v641_v25, %v645_v26  ;;  %4078 = vst [vmem:[#allocation12_spill] sm:$0xff] %v3441_v24  ;;  %v2885_v25 = vld [vmem:[%s4037_s3 + $0x1a0] sm:$0xff] }
  0x72   : > { %v2893_v26 = vld [vmem:[%s4037_s3 + $0x1e0] sm:$0xff]  ;;  %2040 = vmatpush.bf16.msra.mxu2 %v2885_v25  ;;  %v677_v2 = vor.u32 %v676_v48, %v672_v37  ;;  %v3483_v25 = vsel %vm839_vm4, %v855_v59, %v856_v0  ;;  %v684_v0 = vshrl.u32 %v3311_v9, 16 }
  0x73   : > { %2129 = vmatpush.bf16.msra.mxu3 %v2893_v26  ;;  %4081 = vst [vmem:[#allocation15_spill] sm:$0xff] %v3483_v25 }
  0x7b   : > { %1605 = vmatmul.bf16.gmra.mxu1 %v622_v40  ;;  %1694 = vmatmul.bf16.gmra.mxu2 %v3369_v8  ;;  %v655_v40 = vshll.u32 %v585_v33, 16 }
  0x7c   : > { %1783 = vmatmul.bf16.gmra.mxu3 %v3279_v35 }
  0x7d   : > { %1872 = vmatmul.bf16.gmra.mxu0 %v3372_v15  ;;  %v657_v50 = vrot.slane %v655_v40, 1  ;;  %v2877_v40 = vld [vmem:[%s4037_s3 + $0x160] sm:$0xff] }
  0x7e   : > { %1951 = vmatpush.bf16.msra.mxu1 %v2877_v40 }
  0x7f   : > { %v3415_v55 = vsel %vm598_vm3, %v653_v45, %v657_v50  ;;  %v679_v45 = vshll.u32 %v587_v32, 16  ;;  %v2901_v50 = vld [vmem:[%s4037_s3 + $0x220] sm:$0xff] }
  0x80   : > { %4076 = vst [vmem:[#allocation10_spill] sm:$0xff] %v3415_v55  ;;  %2218 = vmatpush.bf16.msra.mxu0 %v2901_v50 }
  0x81   : > { %v681_v3 = vrot.slane %v679_v45, 1 }
  0x83   : > { %v3491_v61 = vsel %vm598_vm3, %v677_v2, %v681_v3 }
  0x84   : > { %4082 = vst [vmem:[#allocation16_spill] sm:$0xff] %v3491_v61 }
  0x8b   : > { %1610 = vmatmul.bf16.gmra.mxu1 %v3372_v15  ;;  %1699 = vmatmul.bf16.gmra.mxu2 %v3384_v27 }
  0x8c   : > { %1788 = vmatmul.bf16.gmra.mxu3 %v3323_v14 }
  0x8d   : > { %1877 = vmatmul.bf16.gmra.mxu0 %v3387_v28 }
  0x9b   : > { %1615 = vmatmul.bf16.gmra.mxu1 %v3387_v28  ;;  %1704 = vmatmul.bf16.gmra.mxu2 %v3412_v53 }
  0x9c   : > { %1793 = vmatmul.bf16.gmra.mxu3 %v3064_v6 }
  0x9d   : > { %1882 = vmatmul.bf16.gmra.mxu0 %v3415_v55 }
  0xa8   : > { %v1532_v17 = vpop.f32.mrf.mxu1 }
  0xa9   : > { %v3436_v44 = vadd.f32 %v3430_v57, %v1532_v17 }
  0xaa   : > { %v3438_v23 = vpop.f32.mrf.mxu0 }
  0xab   : > { %1620 = vmatmul.bf16.gmra.mxu1 %v3415_v55  ;;  %1709 = vmatmul.bf16.gmra.mxu2 %v3433_v18 }
  0xac   : > { %1798 = vmatmul.bf16.gmra.mxu3 %v3177_v19 }
  0xad   : > { %1887 = vmatmul.bf16.gmra.mxu0 %v3441_v24 }
  0xae   : > { %v1552_v29 = vpop.f32.mrf.mxu2 }
  0xaf   : > { %v3458_v33 = vadd.f32 %v3430_v57, %v1552_v29  ;;  %v1572_v36 = vpop.f32.mrf.mxu3  ;;  %v686_v29 = vshll.u32 %v3311_v9, 16 }
  0xb0   : > { %v3461_v54 = vadd.f32 %v3430_v57, %v1572_v36  ;;  %v1534_v38 = vpop.f32.mrf.mxu1 }
  0xb1   : > { %v3467_v41 = vadd.f32 %v3430_v57, %v1534_v38  ;;  %v588_v38 = vsel %vm3051_vm2, %v3297_v58, 0  ;;  %v688_v2 = vrot.slane %v686_v29, 1  ;;  %v859_v58 = vrot.slane %v587_v32, 1 }
  0xb2   : > { %4079 = vst [vmem:[#allocation13_spill] sm:$0xff] %v3461_v54  ;;  %v3469_v43 = vpop.f32.mrf.mxu0  ;;  %v691_v3 = vshll.u32 %v588_v38, 16 }
  0xb6   : > { %v1554_v4 = vpop.f32.mrf.mxu2 }
  0xb7   : > { %v3477_v5 = vadd.f32 %v3430_v57, %v1554_v4  ;;  %v1574_v22 = vpop.f32.mrf.mxu3  ;;  %v858_v4 = vrot.slane %v3267_v30, 1 }
  0xb8   : > { %v3480_v16 = vadd.f32 %v3430_v57, %v1574_v22  ;;  %v1537_v17 = vpop.f32.mrf.mxu1  ;;  %v689_v22 = vor.u32 %v688_v2, %v684_v0  ;;  %v2884_v0 = vld [vmem:[%s4037_s3 + $0x198] sm:$0xff] }
  0xb9   : > { %v3486_v26 = vadd.f32 %v3430_v57, %v1537_v17  ;;  %v693_v17 = vrot.slane %v691_v3, 1  ;;  %v3521_v11 = vsel %vm839_vm4, %v858_v4, %v859_v58  ;;  %v2892_v2 = vld [vmem:[%s4037_s3 + $0x1d8] sm:$0xff]  ;;  %v698_v3 = vshll.u32 %v3068_v7, 16  ;;  %2041 = vmatpush.bf16.msra.mxu2 %v2884_v0 }
  0xba   : > { %4080 = vst [vmem:[#allocation14_spill] sm:$0xff] %v3480_v16  ;;  %v3488_v1 = vpop.f32.mrf.mxu0  ;;  %v589_v58 = vsel %vm3051_vm2, %v3038_v46, 0  ;;  %2130 = vmatpush.bf16.msra.mxu3 %v2892_v2  ;;  %v696_v16 = vshrl.u32 %v3068_v7, 16  ;;  %v2876_v46 = vld [vmem:[%s4037_s3 + $0x158] sm:$0xff]  ;;  %v861_v2 = vrot.slane %v3311_v9, 1 }
  0xbb   : > { %1625 = vmatmul.bf16.gmra.mxu1 %v3441_v24  ;;  %1714 = vmatmul.bf16.gmra.mxu2 %v3483_v25  ;;  %4085 = vst [vmem:[#allocation19_spill] sm:$0xff] %v3521_v11  ;;  %v3529_v32 = vsel %vm598_vm3, %v689_v22, %v693_v17  ;;  %v2900_v0 = vld [vmem:[%s4037_s3 + $0x218] sm:$0xff] }
  0xbc   : > { %1803 = vmatmul.bf16.gmra.mxu3 %v3267_v30  ;;  %4086 = vst [vmem:[#allocation20_spill] sm:$0xff] %v3529_v32  ;;  %1952 = vmatpush.bf16.msra.mxu1 %v2876_v46 }
  0xbd   : > { %1892 = vmatmul.bf16.gmra.mxu0 %v3491_v61 }
  0xbe   : > { %v1557_v36 = vpop.f32.mrf.mxu2  ;;  %2219 = vmatpush.bf16.msra.mxu0 %v2900_v0 }
  0xbf   : > { %v3502_v40 = vadd.f32 %v3430_v57, %v1557_v36  ;;  %v1577_v37 = vpop.f32.mrf.mxu3 }
  0xc0   : > { %v3505_v48 = vadd.f32 %v3430_v57, %v1577_v37  ;;  %v1539_v45 = vpop.f32.mrf.mxu1 }
  0xc1   : > { %v3508_v50 = vadd.f32 %v3430_v57, %v1539_v45 }
  0xc2   : > { %4083 = vst [vmem:[#allocation17_spill] sm:$0xff] %v3505_v48  ;;  %v3510_v59 = vpop.f32.mrf.mxu0 }
  0xc6   : > { %v1559_v36 = vpop.f32.mrf.mxu2 }
  0xc7   : > { %v3515_v52 = vadd.f32 %v3430_v57, %v1559_v36  ;;  %v1579_v37 = vpop.f32.mrf.mxu3 }
  0xc8   : > { %v3518_v39 = vadd.f32 %v3430_v57, %v1579_v37  ;;  %v1542_v45 = vpop.f32.mrf.mxu1 }
  0xc9   : > { %v3524_v29 = vadd.f32 %v3430_v57, %v1542_v45 }
  0xca   : > { %4084 = vst [vmem:[#allocation18_spill] sm:$0xff] %v3518_v39  ;;  %v3526_v48 = vpop.f32.mrf.mxu0 }
  0xcb   : > { %1630 = vmatmul.bf16.gmra.mxu1 %v3491_v61  ;;  %1719 = vmatmul.bf16.gmra.mxu2 %v3521_v11  ;;  %v700_v11 = vrot.slane %v698_v3, 1  ;;  %v703_v61 = vshll.u32 %v589_v58, 16 }
  0xcc   : > { %1808 = vmatmul.bf16.gmra.mxu3 %v3311_v9 }
  0xcd   : > { %1897 = vmatmul.bf16.gmra.mxu0 %v3529_v32 }
  0xce   : > { %v1562_v4 = vpop.f32.mrf.mxu2 }
  0xcf   : > { %v3546_v22 = vadd.f32 %v3430_v57, %v1562_v4  ;;  %v1582_v17 = vpop.f32.mrf.mxu3  ;;  %v862_v4 = vrot.slane %v588_v38, 1 }
  0xd0   : > { %v3549_v36 = vadd.f32 %v3430_v57, %v1582_v17  ;;  %v1544_v37 = vpop.f32.mrf.mxu1  ;;  %v701_v17 = vor.u32 %v700_v11, %v696_v16  ;;  %v710_v16 = vshll.u32 %v3181_v20, 16 }
  0xd1   : > { %v3552_v45 = vadd.f32 %v3430_v57, %v1544_v37  ;;  %v705_v37 = vrot.slane %v703_v61, 1  ;;  %v3571_v24 = vsel %vm839_vm4, %v861_v2, %v862_v4 }
  0xd2   : > { %4087 = vst [vmem:[#allocation21_spill] sm:$0xff] %v3549_v36  ;;  %v3554_v39 = vpop.f32.mrf.mxu0 }
  0xd3   : > { %4090 = vst [vmem:[#allocation24_spill] sm:$0xff] %v3571_v24  ;;  %v3579_v11 = vsel %vm598_vm3, %v701_v17, %v705_v37 }
  0xd4   : > { %4091 = vst [vmem:[#allocation25_spill] sm:$0xff] %v3579_v11 }
  0xd6   : > { %v1564_v36 = vpop.f32.mrf.mxu2 }
  0xd7   : > { %v3565_v30 = vadd.f32 %v3430_v57, %v1564_v36  ;;  %v1584_v3 = vpop.f32.mrf.mxu3 }
  0xd8   : > { %v3568_v54 = vadd.f32 %v3430_v57, %v1584_v3  ;;  %v1547_v25 = vpop.f32.mrf.mxu1  ;;  %v708_v3 = vshrl.u32 %v3181_v20, 16 }
  0xd9   : > { %4088 = vst [vmem:[#allocation22_spill] sm:$0xff] %v3565_v30  ;;  %v3574_v46 = vadd.f32 %v3430_v57, %v1547_v25  ;;  %v590_v25 = vsel %vm3051_vm2, %v3131_v47, 0  ;;  %v865_v47 = vrot.slane %v589_v58, 1 }
  0xda   : > { %4089 = vst [vmem:[#allocation23_spill] sm:$0xff] %v3568_v54  ;;  %v3576_v0 = vpop.f32.mrf.mxu0  ;;  %v712_v54 = vrot.slane %v710_v16, 1 }
  0xdb   : > { %1635 = vmatmul.bf16.gmra.mxu1 %v3529_v32  ;;  %1724 = vmatmul.bf16.gmra.mxu2 %v3571_v24  ;;  %v715_v24 = vshll.u32 %v590_v25, 16  ;;  %v864_v32 = vrot.slane %v3068_v7, 1 }
  0xdc   : > { %1813 = vmatmul.bf16.gmra.mxu3 %v3068_v7  ;;  %v713_v9 = vor.u32 %v712_v54, %v708_v3 }
  0xdd   : > { %1902 = vmatmul.bf16.gmra.mxu0 %v3579_v11  ;;  %v3611_v16 = vsel %vm839_vm4, %v864_v32, %v865_v47  ;;  %v1515_v32 = vadd.f32 %v3430_v57, %v3469_v43  ;;  %v867_v43 = vrot.slane %v3181_v20, 1 }
  0xde   : > { %v1567_v61 = vpop.f32.mrf.mxu2  ;;  %4096 = vst [vmem:[#allocation30_spill] sm:$0xff] %v3611_v16 }
  0xdf   : > { %v3590_v38 = vadd.f32 %v3430_v57, %v1567_v61  ;;  %v1587_v36 = vpop.f32.mrf.mxu3  ;;  %v717_v61 = vrot.slane %v715_v24, 1  ;;  %v591_v24 = vsel %vm3051_vm2, %v3227_v42, 0  ;;  %v2899_v42 = vld [vmem:[%s4037_s3 + $0x210] sm:$0xff] }
  0xe0   : > { %v3593_v2 = vadd.f32 %v3430_v57, %v1587_v36  ;;  %v1549_v4 = vpop.f32.mrf.mxu1  ;;  %v1513_v36 = vadd.f32 %v3430_v57, %v3438_v23  ;;  %v722_v23 = vshll.u32 %v3271_v31, 16  ;;  %2220 = vmatpush.bf16.msra.mxu0 %v2899_v42 }
  0xe1   : > { %4092 = vst [vmem:[#allocation26_spill] sm:$0xff] %v3590_v38  ;;  %v3596_v17 = vadd.f32 %v3430_v57, %v1549_v4  ;;  %v3614_v54 = vsel %vm598_vm3, %v713_v9, %v717_v61  ;;  %v720_v61 = vshrl.u32 %v3271_v31, 16 }
  0xe2   : > { %4093 = vst [vmem:[#allocation27_spill] sm:$0xff] %v3593_v2  ;;  %v3598_v37 = vpop.f32.mrf.mxu0 }
  0xe6   : > { %v1569_v19 = vpop.f32.mrf.mxu2 }
  0xe7   : > { %v3605_v2 = vadd.f32 %v3430_v57, %v1569_v19  ;;  %v1589_v4 = vpop.f32.mrf.mxu3  ;;  %v2883_v19 = vld [vmem:[%s4037_s3 + $0x190] sm:$0xff] }
  0xe8   : > { %v3608_v38 = vadd.f32 %v3430_v57, %v1589_v4  ;;  %v1601_v30 = vpop.f32.mrf.mxu1  ;;  %2042 = vmatpush.bf16.msra.mxu2 %v2883_v19  ;;  %v868_v19 = vrot.slane %v590_v25, 1 }
  0xe9   : > { %4094 = vst [vmem:[#allocation28_spill] sm:$0xff] %v3605_v2  ;;  %v1602_v18 = vadd.f32 %v1601_v30, %v1513_v36  ;;  %v2891_v30 = vld [vmem:[%s4037_s3 + $0x1d0] sm:$0xff] }
  0xea   : > { %4095 = vst [vmem:[#allocation29_spill] sm:$0xff] %v3608_v38  ;;  %v1868_v7 = vpop.f32.mrf.mxu0  ;;  %2131 = vmatpush.bf16.msra.mxu3 %v2891_v30  ;;  %v2875_v2 = vld [vmem:[%s4037_s3 + $0x150] sm:$0xff]  ;;  %v3645_v55 = vsel %vm839_vm4, %v867_v43, %v868_v19 }
  0xeb   : > { %1640 = vmatmul.bf16.gmra.mxu1 %v3579_v11  ;;  %1729 = vmatmul.bf16.gmra.mxu2 %v3611_v16  ;;  %v724_v16 = vrot.slane %v722_v23, 1  ;;  %v727_v11 = vshll.u32 %v591_v24, 16  ;;  %v1518_v23 = vadd.f32 %v3430_v57, %v3488_v1  ;;  %v734_v1 = vshll.u32 %v3315_v12, 16 }
  0xec   : > { %1818 = vmatmul.bf16.gmra.mxu3 %v3181_v20  ;;  %1953 = vmatpush.bf16.msra.mxu1 %v2875_v2 }
  0xed   : > { %1907 = vmatmul.bf16.gmra.mxu0 %v3614_v54  ;;  %v725_v30 = vor.u32 %v724_v16, %v720_v61  ;;  %v3660_v16 = vsel %vm3051_vm2, %v3299_v60, 0  ;;  %v1520_v61 = vadd.f32 %v3430_v57, %v3510_v59  ;;  %v871_v60 = vrot.slane %v591_v24, 1 }
  0xee   : > { %v1690_v9 = vpop.f32.mrf.mxu2  ;;  %v1523_v59 = vadd.f32 %v3430_v57, %v3526_v48  ;;  %v2882_v48 = vld [vmem:[%s4037_s3 + $0x188] sm:$0xff] }
  0xef   : > { %v1691_v58 = vadd.f32 %v1690_v9, %v1602_v18  ;;  %v1779_v3 = vpop.f32.mrf.mxu3  ;;  %v729_v9 = vrot.slane %v727_v11, 1  ;;  %2043 = vmatpush.bf16.msra.mxu2 %v2882_v48 }
  0xf0   : > { %v1603_v47 = vpop.f32.mrf.mxu1 }
  0xf1   : > { %v1780_v36 = vadd.f32 %v1779_v3, %v1691_v58  ;;  %v1604_v4 = vadd.f32 %v1603_v47, %v1515_v32 }
  0xf2   : > { %v1870_v38 = vpop.f32.mrf.mxu0 }
  0xf3   : > { %v3639_v18 = vadd.f32 %v1868_v7, %v1780_v36  ;;  %v3648_v7 = vsel %vm598_vm3, %v725_v30, %v729_v9  ;;  %v736_v9 = vrot.slane %v734_v1, 1 }
  0xf5   : > { %4097 = vst [vmem:[#allocation31_spill] sm:$0xff] %v3639_v18 }
  0xf6   : > { %v1692_v32 = vpop.f32.mrf.mxu2 }
  0xf7   : > { %v1693_v58 = vadd.f32 %v1692_v32, %v1604_v4  ;;  %v1781_v3 = vpop.f32.mrf.mxu3  ;;  %v739_v32 = vshll.u32 %v3660_v16, 16 }
  0xf8   : > { %v1606_v47 = vpop.f32.mrf.mxu1 }
  0xf9   : > { %v1782_v6 = vadd.f32 %v1781_v3, %v1693_v58  ;;  %v1607_v2 = vadd.f32 %v1606_v47, %v1518_v23  ;;  %v870_v58 = vrot.slane %v3271_v31, 1  ;;  %v741_v47 = vrot.slane %v739_v32, 1 }
  0xfa   : > { %v1873_v42 = vpop.f32.mrf.mxu0  ;;  %v744_v32 = vshrl.u32 %v3076_v10, 16 }
  0xfb   : > { %1645 = vmatmul.bf16.gmra.mxu1 %v3614_v54  ;;  %1734 = vmatmul.bf16.gmra.mxu2 %v3645_v55  ;;  %v3652_v11 = vadd.f32 %v1870_v38, %v1782_v6  ;;  %v732_v6 = vshrl.u32 %v3315_v12, 16 }
  0xfc   : > { %1823 = vmatmul.bf16.gmra.mxu3 %v3271_v31 }
  0xfd   : > { %4098 = vst [vmem:[#allocation32_spill] sm:$0xff] %v3652_v11  ;;  %1912 = vmatmul.bf16.gmra.mxu0 %v3648_v7  ;;  %v737_v3 = vor.u32 %v736_v9, %v732_v6  ;;  %v593_v6 = vsel %vm3051_vm2, %v3040_v49, 0  ;;  %v2898_v49 = vld [vmem:[%s4037_s3 + $0x208] sm:$0xff] }
  0xfe   : > { %v1695_v25 = vpop.f32.mrf.mxu2  ;;  %2221 = vmatpush.bf16.msra.mxu0 %v2898_v49 }
  0xff   : > { %v1696_v36 = vadd.f32 %v1695_v25, %v1607_v2  ;;  %v1784_v4 = vpop.f32.mrf.mxu3 }
 0x100   : > { %v1608_v43 = vpop.f32.mrf.mxu1 }
 0x101   : > { %v1785_v38 = vadd.f32 %v1784_v4, %v1696_v36  ;;  %v1609_v19 = vadd.f32 %v1608_v43, %v1520_v61  ;;  %v3672_v61 = vsel %vm839_vm4, %v870_v58, %v871_v60 }
 0x102   : > { %v1875_v30 = vpop.f32.mrf.mxu0 }
 0x103   : > { %v3666_v23 = vadd.f32 %v1873_v42, %v1785_v38  ;;  %v3675_v42 = vsel %vm598_vm3, %v737_v3, %v741_v47  ;;  %v1525_v38 = vadd.f32 %v3430_v57, %v3554_v39 }
 0x106   : > { %v1697_v11 = vpop.f32.mrf.mxu2 }
 0x107   : > { %v1698_v2 = vadd.f32 %v1697_v11, %v1609_v19  ;;  %v1786_v25 = vpop.f32.mrf.mxu3  ;;  %v746_v11 = vshll.u32 %v3076_v10, 16 }
 0x108   : > { %v1611_v18 = vpop.f32.mrf.mxu1 }
 0x109   : > { %v1787_v1 = vadd.f32 %v1786_v25, %v1698_v2  ;;  %v1612_v36 = vadd.f32 %v1611_v18, %v1523_v59  ;;  %v2890_v18 = vld [vmem:[%s4037_s3 + $0x1c8] sm:$0xff]  ;;  %v748_v47 = vrot.slane %v746_v11, 1  ;;  %v751_v59 = vshll.u32 %v593_v6, 16 }
 0x10a   : > { %v1878_v4 = vpop.f32.mrf.mxu0  ;;  %2132 = vmatpush.bf16.msra.mxu3 %v2890_v18  ;;  %v2874_v2 = vld [vmem:[%s4037_s3 + $0x148] sm:$0xff]  ;;  %v873_v25 = vrot.slane %v3315_v12, 1  ;;  %v1528_v11 = vadd.f32 %v3430_v57, %v3576_v0  ;;  %v758_v0 = vshll.u32 %v3185_v21, 16 }
 0x10b   : > { %1650 = vmatmul.bf16.gmra.mxu1 %v3648_v7  ;;  %1739 = vmatmul.bf16.gmra.mxu2 %v3672_v61  ;;  %v3679_v24 = vadd.f32 %v1875_v30, %v1787_v1  ;;  %v874_v1 = vrot.slane %v3660_v16, 1  ;;  %v753_v48 = vrot.slane %v751_v59, 1 }
 0x10c   : > { %1828 = vmatmul.bf16.gmra.mxu3 %v3315_v12  ;;  %1954 = vmatpush.bf16.msra.mxu1 %v2874_v2 }
 0x10d   : > { %1917 = vmatmul.bf16.gmra.mxu0 %v3675_v42 }
 0x10e   : > { %v1700_v43 = vpop.f32.mrf.mxu2 }
 0x10f   : > { %v1701_v19 = vadd.f32 %v1700_v43, %v1612_v36  ;;  %v1789_v30 = vpop.f32.mrf.mxu3  ;;  %v749_v36 = vor.u32 %v748_v47, %v744_v32  ;;  %v1530_v47 = vadd.f32 %v3430_v57, %v3598_v37 }
 0x110   : > { %v1613_v9 = vpop.f32.mrf.mxu1 }
 0x111   : > { %v1790_v58 = vadd.f32 %v1789_v30, %v1701_v19  ;;  %v1614_v60 = vadd.f32 %v1613_v9, %v1525_v38  ;;  %v3709_v30 = vsel %vm839_vm4, %v873_v25, %v874_v1 }
 0x112   : > { %v1880_v3 = vpop.f32.mrf.mxu0 }
 0x113   : > { %v3702_v39 = vadd.f32 %v1878_v4, %v1790_v58  ;;  %v3712_v58 = vsel %vm598_vm3, %v749_v36, %v753_v48 }
 0x115   : > { %4099 = vst [vmem:[#allocation33_spill] sm:$0xff] %v3702_v39 }
 0x116   : > { %v1702_v18 = vpop.f32.mrf.mxu2 }
 0x117   : > { %v1703_v43 = vadd.f32 %v1702_v18, %v1614_v60  ;;  %v1791_v38 = vpop.f32.mrf.mxu3  ;;  %v3724_v60 = vsel %vm3051_vm2, %v3134_v51, 0  ;;  %v760_v18 = vrot.slane %v758_v0, 1  ;;  %v877_v51 = vrot.slane %v593_v6, 1 }
 0x118   : > { %v1616_v19 = vpop.f32.mrf.mxu1 }
 0x119   : > { %v1792_v9 = vadd.f32 %v1791_v38, %v1703_v43  ;;  %v1617_v2 = vadd.f32 %v1616_v19, %v1528_v11  ;;  %v763_v11 = vshll.u32 %v3724_v60, 16  ;;  %v876_v38 = vrot.slane %v3076_v10, 1 }
 0x11a   : > { %v1883_v4 = vpop.f32.mrf.mxu0 }
 0x11b   : > { %1655 = vmatmul.bf16.gmra.mxu1 %v3675_v42  ;;  %1744 = vmatmul.bf16.gmra.mxu2 %v3709_v30  ;;  %v3716_v16 = vadd.f32 %v1880_v3, %v1792_v9  ;;  %v756_v3 = vshrl.u32 %v3185_v21, 16  ;;  %v765_v9 = vrot.slane %v763_v11, 1 }
 0x11c   : > { %1833 = vmatmul.bf16.gmra.mxu3 %v3076_v10 }
 0x11d   : > { %4100 = vst [vmem:[#allocation34_spill] sm:$0xff] %v3716_v16  ;;  %1922 = vmatmul.bf16.gmra.mxu0 %v3712_v58  ;;  %v761_v19 = vor.u32 %v760_v18, %v756_v3  ;;  %v3756_v3 = vsel %vm3051_vm2, %v3238_v56, 0  ;;  %v295_v18 = vld [vmem:[%s3008_s30 + $0xf8] sm:$0xff]  ;;  %v2873_v56 = vld [vmem:[%s4037_s3 + $0x140] sm:$0xff] }
 0x11e   : > { %v1705_v32 = vpop.f32.mrf.mxu2  ;;  %1955 = vmatpush.bf16.msra.mxu1 %v2873_v56 }
 0x11f   : > { %v1706_v59 = vadd.f32 %v1705_v32, %v1617_v2  ;;  %v1794_v49 = vpop.f32.mrf.mxu3  ;;  %v3734_v32 = vsel %vm839_vm4, %v876_v38, %v877_v51  ;;  %v768_v38 = vshrl.u32 %v3275_v34, 16 }
 0x120   : > { %v1618_v25 = vpop.f32.mrf.mxu1  ;;  %4102 = vst [vmem:[#allocation36_spill] sm:$0xff] %v3734_v32 }
 0x121   : > { %v1795_v1 = vadd.f32 %v1794_v49, %v1706_v59  ;;  %v1619_v36 = vadd.f32 %v1618_v25, %v1530_v47  ;;  %v770_v49 = vshll.u32 %v3275_v34, 16 }
 0x122   : > { %v1885_v48 = vpop.f32.mrf.mxu0 }
 0x123   : > { %v3730_v43 = vadd.f32 %v1883_v4, %v1795_v1  ;;  %v3738_v4 = vsel %vm598_vm3, %v761_v19, %v765_v9 }
 0x125   : > { %4101 = vst [vmem:[#allocation35_spill] sm:$0xff] %v3730_v43 }
 0x126   : > { %v1707_v16 = vpop.f32.mrf.mxu2 }
 0x127   : > { %v1708_v57 = vadd.f32 %v1707_v16, %v1619_v36  ;;  %v1796_v37 = vpop.f32.mrf.mxu3  ;;  %v2889_v16 = vld [vmem:[%s4037_s3 + $0x1c0] sm:$0xff] }
 0x128   : > { %v1621_v2 = vpop.f32.mrf.mxu1  ;;  %2133 = vmatpush.bf16.msra.mxu3 %v2889_v16  ;;  %v880_v16 = vrot.slane %v3724_v60, 1 }
 0x129   : > { %v1797_v59 = vadd.f32 %v1796_v37, %v1708_v57  ;;  %v1622_v47 = vadd.f32 %v1621_v2, %v3436_v44  ;;  %v2881_v44 = vld [vmem:[%s4037_s3 + $0x180] sm:$0xff]  ;;  %v772_v57 = vrot.slane %v770_v49, 1  ;;  %v775_v37 = vshll.u32 %v3756_v3, 16 }
 0x12a   : > { %v1888_v0 = vpop.f32.mrf.mxu0  ;;  %2044 = vmatpush.bf16.msra.mxu2 %v2881_v44  ;;  %v2897_v2 = vld [vmem:[%s4037_s3 + $0x200] sm:$0xff] }
 0x12b   : > { %1660 = vmatmul.bf16.gmra.mxu1 %v3712_v58  ;;  %1749 = vmatmul.bf16.gmra.mxu2 %v3734_v32  ;;  %v3742_v6 = vadd.f32 %v1885_v48, %v1797_v59  ;;  %v294_v48 = vld [vmem:[%s3008_s30 + $0xf0] sm:$0xff]  ;;  %v773_v49 = vor.u32 %v772_v57, %v768_v38  ;;  %v782_v38 = vshll.u32 %v3319_v13, 16 }
 0x12c   : > { %1838 = vmatmul.bf16.gmra.mxu3 %v3185_v21  ;;  %v326_v59 = vpack.c.bf16 %v294_v48, %v294_v48  ;;  %2222 = vmatpush.bf16.msra.mxu0 %v2897_v2 }
 0x12d   : > { %4103 = vst [vmem:[#allocation37_spill] sm:$0xff] %v3742_v6  ;;  %1927 = vmatmul.bf16.gmra.mxu0 %v3738_v4 }
 0x12e   : > { %v1710_v25 = vpop.f32.mrf.mxu2 }
 0x12f   : > { %v1711_v1 = vadd.f32 %v1710_v25, %v1622_v47  ;;  %v1799_v36 = vpop.f32.mrf.mxu3  ;;  %v327_v47 = vpack.c.bf16 %v295_v18, %v295_v18  ;;  %v777_v25 = vrot.slane %v775_v37, 1  ;;  %v780_v37 = vshrl.u32 %v3319_v13, 16 }
 0x130   : > { %v1623_v11 = vpop.f32.mrf.mxu1 }
 0x131   : > { %v1800_v51 = vadd.f32 %v1799_v36, %v1711_v1  ;;  %v1624_v19 = vadd.f32 %v1623_v11, %v3467_v41  ;;  %v879_v41 = vrot.slane %v3185_v21, 1  ;;  %v390_v36 = vunpack.c.l.b16 %v326_v59 }
 0x132   : > { %v1890_v9 = vpop.f32.mrf.mxu0  ;;  %v391_v11 = vunpack.c.l.b16 %v327_v47  ;;  %v784_v47 = vrot.slane %v782_v38, 1 }
 0x133   : > { %v3769_v44 = vadd.f32 %v1888_v0, %v1800_v51  ;;  %v3774_v32 = vsel %vm839_vm4, %v879_v41, %v880_v16  ;;  %v3778_v51 = vsel %vm598_vm3, %v773_v49, %v777_v25 }
 0x134   : > { %v407_v56 = vpack.c.b16 %v391_v11, %v390_v36  ;;  %v785_v36 = vor.u32 %v784_v47, %v780_v37 }
 0x136   : > { %v1712_v1 = vpop.f32.mrf.mxu2  ;;  %v524_v49 = vshll.u32 %v407_v56, 16 }
 0x137   : > { %v1713_v6 = vadd.f32 %v1712_v1, %v1624_v19  ;;  %v1801_v43 = vpop.f32.mrf.mxu3  ;;  %v882_v1 = vrot.slane %v3275_v34, 1 }
 0x138   : > { %v1626_v39 = vpop.f32.mrf.mxu1 }
 0x139   : > { %v1802_v48 = vadd.f32 %v1801_v43, %v1713_v6  ;;  %v1627_v18 = vadd.f32 %v1626_v39, %v3486_v26  ;;  %v596_v26 = vsel %vm3051_vm2, %v3301_v62, 0  ;;  %v521_v39 = vshrl.u32 %v407_v56, 16 }
 0x13a   : > { %v1893_v0 = vpop.f32.mrf.mxu0  ;;  %v787_v41 = vshll.u32 %v596_v26, 16  ;;  %v883_v62 = vrot.slane %v3756_v3, 1 }
 0x13b   : > { %1665 = vmatmul.bf16.gmra.mxu1 %v3738_v4  ;;  %1754 = vmatmul.bf16.gmra.mxu2 %v3774_v32  ;;  %v3782_v60 = vadd.f32 %v1890_v9, %v1802_v48  ;;  %v523_v16 = vrot.slane %v521_v39, 7 }
 0x13c   : > { %1843 = vmatmul.bf16.gmra.mxu3 %v3275_v34  ;;  %v789_v11 = vrot.slane %v787_v41, 1 }
 0x13d   : > { %4104 = vst [vmem:[#allocation38_spill] sm:$0xff] %v3782_v60  ;;  %1932 = vmatmul.bf16.gmra.mxu0 %v3778_v51 }
 0x13e   : > { %v1715_v43 = vpop.f32.mrf.mxu2 }
 0x13f   : > { %v1716_v6 = vadd.f32 %v1715_v43, %v1627_v18  ;;  %v1804_v19 = vpop.f32.mrf.mxu3  ;;  %v526_v18 = vor.u32 %v524_v49, %v523_v16 }
 0x140   : > { %v1628_v57 = vpop.f32.mrf.mxu1 }
 0x141   : > { %v1805_v2 = vadd.f32 %v1804_v19, %v1716_v6  ;;  %v1629_v9 = vadd.f32 %v1628_v57, %v3508_v50  ;;  %v3797_v50 = vsel %vm839_vm4, %v882_v1, %v883_v62  ;;  %v3805_v3 = vsel %vm3051_vm2, 0, %v526_v18 }
 0x142   : > { %v1895_v59 = vpop.f32.mrf.mxu0  ;;  %v3816_v57 = vsel %vm3051_vm2, %v523_v16, 0  ;;  %v905_v47 = vshrl.u32 %v3805_v3, 16 }
 0x143   : > { %v3792_v25 = vadd.f32 %v1893_v0, %v1805_v2  ;;  %v3801_v0 = vsel %vm598_vm3, %v785_v36, %v789_v11  ;;  %v912_v62 = vshll.u32 %v3816_v57, 16  ;;  %v885_v11 = vrot.slane %v3319_v13, 1 }
 0x145   : > { %v914_v16 = vrot.slane %v912_v62, 1 }
 0x146   : > { %v1717_v48 = vpop.f32.mrf.mxu2 }
 0x147   : > { %v1718_v43 = vadd.f32 %v1717_v48, %v1629_v9  ;;  %v1806_v60 = vpop.f32.mrf.mxu3  ;;  %v886_v48 = vrot.slane %v596_v26, 1 }
 0x148   : > { %v1631_v6 = vpop.f32.mrf.mxu1 }
 0x149   : > { %v1807_v38 = vadd.f32 %v1806_v60, %v1718_v43  ;;  %v1632_v39 = vadd.f32 %v1631_v6, %v3524_v29  ;;  %v907_v29 = vshll.u32 %v3805_v3, 16 }
 0x14a   : > { %v1898_v56 = vpop.f32.mrf.mxu0 }
 0x14b   : > { %1670 = vmatmul.bf16.gmra.mxu1 %v3778_v51  ;;  %1759 = vmatmul.bf16.gmra.mxu2 %v3797_v50  ;;  %v3809_v19 = vadd.f32 %v1895_v59, %v1807_v38  ;;  %v909_v1 = vrot.slane %v907_v29, 1 }
 0x14c   : > { %1848 = vmatmul.bf16.gmra.mxu3 %v3319_v13 }
 0x14d   : > { %1937 = vmatmul.bf16.gmra.mxu0 %v3801_v0  ;;  %v910_v63 = vor.u32 %v909_v1, %v905_v47 }
 0x14e   : > { %v1720_v60 = vpop.f32.mrf.mxu2 }
 0x14f   : > { %v1721_v37 = vadd.f32 %v1720_v60, %v1632_v39  ;;  %v1809_v2 = vpop.f32.mrf.mxu3  ;;  %v3825_v39 = vsel %vm839_vm4, %v885_v11, %v886_v48 }
 0x150   : > { %v1633_v9 = vpop.f32.mrf.mxu1 }
 0x151   : > { %v1810_v41 = vadd.f32 %v1809_v2, %v1721_v37  ;;  %v1634_v59 = vadd.f32 %v1633_v9, %v3552_v45  ;;  %v3829_v37 = vsel %vm598_vm3, %v910_v63, %v914_v16 }
 0x152   : > { %v1900_v49 = vpop.f32.mrf.mxu0 }
 0x153   : > { %v3821_v36 = vadd.f32 %v1898_v56, %v1810_v41 }
 0x156   : > { %v1722_v18 = vpop.f32.mrf.mxu2 }
 0x157   : > { %v1723_v43 = vadd.f32 %v1722_v18, %v1634_v59  ;;  %v1811_v6 = vpop.f32.mrf.mxu3 }
 0x158   : > { %v1636_v38 = vpop.f32.mrf.mxu1 }
 0x159   : > { %v1812_v60 = vadd.f32 %v1811_v6, %v1723_v43  ;;  %v1637_v45 = vadd.f32 %v1636_v38, %v3574_v46 }
 0x15a   : > { %v1903_v29 = vpop.f32.mrf.mxu0 }
 0x15b   : > { %1675 = vmatmul.bf16.gmra.mxu1 %v3801_v0  ;;  %1764 = vmatmul.bf16.gmra.mxu2 %v3825_v39  ;;  %v3833_v26 = vadd.f32 %v1900_v49, %v1812_v60 }
 0x15c   : > { %1853 = vmatmul.bf16.gmra.mxu3 %v3805_v3 }
 0x15d   : > { %1942 = vmatmul.bf16.gmra.mxu0 %v3829_v37 }
 0x15e   : > { %v1725_v56 = vpop.f32.mrf.mxu2 }
 0x15f   : > { %v1726_v2 = vadd.f32 %v1725_v56, %v1637_v45  ;;  %v1814_v9 = vpop.f32.mrf.mxu3 }
 0x160   : > { %v1638_v47 = vpop.f32.mrf.mxu1 }
 0x161   : > { %v1815_v41 = vadd.f32 %v1814_v9, %v1726_v2  ;;  %v1639_v46 = vadd.f32 %v1638_v47, %v3596_v17 }
 0x162   : > { %v1905_v59 = vpop.f32.mrf.mxu0 }
 0x163   : > { %v3838_v1 = vadd.f32 %v1903_v29, %v1815_v41 }
 0x166   : > { %v1727_v62 = vpop.f32.mrf.mxu2 }
 0x167   : > { %v1728_v11 = vadd.f32 %v1727_v62, %v1639_v46  ;;  %v1816_v48 = vpop.f32.mrf.mxu3 }
 0x168   : > { %v1641_v63 = vpop.f32.mrf.mxu1 }
 0x169   : > { %v1817_v49 = vadd.f32 %v1816_v48, %v1728_v11  ;;  %v1642_v16 = vadd.f32 %v1641_v63, %v3458_v33 }
 0x16a   : > { %v1908_v18 = vpop.f32.mrf.mxu0 }
 0x16b   : > { %1956 = vmatmul.bf16.vlgmr.msra.gmra.mxu1 %v3369_v8  ;;  %2045 = vmatmul.bf16.vlgmr.msra.gmra.mxu2 %v3279_v35  ;;  %v3843_v43 = vadd.f32 %v1905_v59, %v1817_v49 }
 0x16c   : > { %2134 = vmatmul.bf16.vlgmr.msra.gmra.mxu3 %v3372_v15 }
 0x16d   : > { %2223 = vmatmul.bf16.vlgmr.msra.gmra.mxu0 %v3384_v27 }
 0x16e   : > { %v1730_v17 = vpop.f32.mrf.mxu2 }
 0x16f   : > { %v1731_v6 = vadd.f32 %v1730_v17, %v1642_v16  ;;  %v1819_v38 = vpop.f32.mrf.mxu3 }
 0x170   : > { %v1643_v60 = vpop.f32.mrf.mxu1 }
 0x171   : > { %v1820_v45 = vadd.f32 %v1819_v38, %v1731_v6  ;;  %v1644_v29 = vadd.f32 %v1643_v60, %v3477_v5  ;;  %v4105_v38 = vld [vmem:[#allocation2_spill] sm:$0xff] }
 0x172   : > { %v1910_v56 = vpop.f32.mrf.mxu0 }
 0x173   : > { %v3848_v33 = vadd.f32 %v1908_v18, %v1820_v45  ;;  %v4106_v45 = vld [vmem:[#allocation10_spill] sm:$0xff] }
 0x176   : > { %v1732_v2 = vpop.f32.mrf.mxu2 }
 0x177   : > { %v1733_v8 = vadd.f32 %v1732_v2, %v1644_v29  ;;  %v1821_v9 = vpop.f32.mrf.mxu3 }
 0x178   : > { %v1646_v35 = vpop.f32.mrf.mxu1 }
 0x179   : > { %v1822_v47 = vadd.f32 %v1821_v9, %v1733_v8  ;;  %v1647_v41 = vadd.f32 %v1646_v35, %v3502_v40  ;;  %v4108_v35 = vld [vmem:[#allocation22_spill] sm:$0xff] }
 0x17a   : > { %v1913_v15 = vpop.f32.mrf.mxu0 }
 0x17b   : > { %1961 = vmatmul.bf16.gmra.mxu1 %v3384_v27  ;;  %2050 = vmatmul.bf16.gmra.mxu2 %v3323_v14  ;;  %v3853_v46 = vadd.f32 %v1910_v56, %v1822_v47 }
 0x17c   : > { %2139 = vmatmul.bf16.gmra.mxu3 %v3387_v28 }
 0x17d   : > { %2228 = vmatmul.bf16.gmra.mxu0 %v3412_v53 }
 0x17e   : > { %v1735_v5 = vpop.f32.mrf.mxu2 }
 0x17f   : > { %v1736_v59 = vadd.f32 %v1735_v5, %v1647_v41  ;;  %v1824_v62 = vpop.f32.mrf.mxu3 }
 0x180   : > { %v1648_v11 = vpop.f32.mrf.mxu1 }
 0x181   : > { %v1825_v48 = vadd.f32 %v1824_v62, %v1736_v59  ;;  %v1649_v63 = vadd.f32 %v1648_v11, %v3515_v52  ;;  %v4107_v52 = vld [vmem:[#allocation11_spill] sm:$0xff]  ;;  %v4109_v11 = vld [vmem:[#allocation26_spill] sm:$0xff] }
 0x182   : > { %v1915_v49 = vpop.f32.mrf.mxu0 }
 0x183   : > { %v3858_v40 = vadd.f32 %v1913_v15, %v1825_v48 }
 0x186   : > { %v1737_v16 = vpop.f32.mrf.mxu2 }
 0x187   : > { %v1738_v27 = vadd.f32 %v1737_v16, %v1649_v63  ;;  %v1826_v18 = vpop.f32.mrf.mxu3 }
 0x188   : > { %v1651_v14 = vpop.f32.mrf.mxu1 }
 0x189   : > { %v1827_v17 = vadd.f32 %v1826_v18, %v1738_v27  ;;  %v1652_v6 = vadd.f32 %v1651_v14, %v3546_v22  ;;  %v4111_v27 = vld [vmem:[#allocation12_spill] sm:$0xff]  ;;  %v4112_v18 = vld [vmem:[#allocation15_spill] sm:$0xff] }
 0x18a   : > { %v1918_v28 = vpop.f32.mrf.mxu0 }
 0x18b   : > { %1966 = vmatmul.bf16.gmra.mxu1 %v3412_v53  ;;  %2055 = vmatmul.bf16.gmra.mxu2 %v4105_v38  ;;  %v3863_v60 = vadd.f32 %v1915_v49, %v1827_v17  ;;  %v4110_v49 = vld [vmem:[#allocation5_spill] sm:$0xff] }
 0x18c   : > { %2144 = vmatmul.bf16.gmra.mxu3 %v4106_v45  ;;  %v4113_v45 = vld [vmem:[#allocation28_spill] sm:$0xff] }
 0x18d   : > { %2233 = vmatmul.bf16.gmra.mxu0 %v4107_v52 }
 0x18e   : > { %v1740_v29 = vpop.f32.mrf.mxu2 }
 0x18f   : > { %v1741_v56 = vadd.f32 %v1740_v29, %v1652_v6  ;;  %v1829_v2 = vpop.f32.mrf.mxu3 }
 0x190   : > { %v1653_v8 = vpop.f32.mrf.mxu1 }
 0x191   : > { %v1830_v9 = vadd.f32 %v1829_v2, %v1741_v56  ;;  %v1654_v47 = vadd.f32 %v1653_v8, %v4108_v35 }
 0x192   : > { %v1920_v41 = vpop.f32.mrf.mxu0 }
 0x193   : > { %v3868_v22 = vadd.f32 %v1918_v28, %v1830_v9 }
 0x196   : > { %v1742_v15 = vpop.f32.mrf.mxu2 }
 0x197   : > { %v1743_v53 = vadd.f32 %v1742_v15, %v1654_v47  ;;  %v1831_v5 = vpop.f32.mrf.mxu3 }
 0x198   : > { %v1656_v59 = vpop.f32.mrf.mxu1 }
 0x199   : > { %v1832_v62 = vadd.f32 %v1831_v5, %v1743_v53  ;;  %v1657_v48 = vadd.f32 %v1656_v59, %v4109_v11  ;;  %v4115_v5 = vld [vmem:[#allocation6_spill] sm:$0xff]  ;;  %v4117_v11 = vld [vmem:[#allocation19_spill] sm:$0xff] }
 0x19a   : > { %v1923_v63 = vpop.f32.mrf.mxu0 }
 0x19b   : > { %1971 = vmatmul.bf16.gmra.mxu1 %v4107_v52  ;;  %2060 = vmatmul.bf16.gmra.mxu2 %v4110_v49  ;;  %v3873_v16 = vadd.f32 %v1920_v41, %v1832_v62  ;;  %v4114_v41 = vld [vmem:[#allocation13_spill] sm:$0xff]  ;;  %v4116_v62 = vld [vmem:[#allocation16_spill] sm:$0xff] }
 0x19c   : > { %2149 = vmatmul.bf16.gmra.mxu3 %v4111_v27 }
 0x19d   : > { %2238 = vmatmul.bf16.gmra.mxu0 %v4112_v18 }
 0x19e   : > { %v1745_v14 = vpop.f32.mrf.mxu2 }
 0x19f   : > { %v1746_v17 = vadd.f32 %v1745_v14, %v1657_v48  ;;  %v1834_v6 = vpop.f32.mrf.mxu3 }
 0x1a0   : > { %v1658_v28 = vpop.f32.mrf.mxu1 }
 0x1a1   : > { %v1835_v38 = vadd.f32 %v1834_v6, %v1746_v17  ;;  %v1659_v29 = vadd.f32 %v1658_v28, %v4113_v45  ;;  %v4118_v17 = vld [vmem:[#allocation14_spill] sm:$0xff] }
 0x1a2   : > { %v1925_v56 = vpop.f32.mrf.mxu0 }
 0x1a3   : > { %v3878_v2 = vadd.f32 %v1923_v63, %v1835_v38 }
 0x1a6   : > { %v1747_v8 = vpop.f32.mrf.mxu2 }
 0x1a7   : > { %v1748_v52 = vadd.f32 %v1747_v8, %v1659_v29  ;;  %v1836_v9 = vpop.f32.mrf.mxu3 }
 0x1a8   : > { %v1661_v35 = vpop.f32.mrf.mxu1 }
 0x1a9   : > { %v1837_v47 = vadd.f32 %v1836_v9, %v1748_v52  ;;  %v1662_v15 = vadd.f32 %v1661_v35, %v4114_v41  ;;  %v4119_v52 = vld [vmem:[#allocation17_spill] sm:$0xff] }
 0x1aa   : > { %v1928_v53 = vpop.f32.mrf.mxu0 }
 0x1ab   : > { %1976 = vmatmul.bf16.gmra.mxu1 %v4112_v18  ;;  %2065 = vmatmul.bf16.gmra.mxu2 %v4115_v5  ;;  %v3883_v59 = vadd.f32 %v1925_v56, %v1837_v47  ;;  %v4120_v47 = vld [vmem:[#allocation7_spill] sm:$0xff]  ;;  %v4122_v5 = vld [vmem:[#allocation24_spill] sm:$0xff] }
 0x1ac   : > { %2154 = vmatmul.bf16.gmra.mxu3 %v4116_v62 }
 0x1ad   : > { %2243 = vmatmul.bf16.gmra.mxu0 %v4117_v11 }
 0x1ae   : > { %v1750_v48 = vpop.f32.mrf.mxu2 }
 0x1af   : > { %v1751_v63 = vadd.f32 %v1750_v48, %v1662_v15  ;;  %v1839_v49 = vpop.f32.mrf.mxu3  ;;  %v4121_v15 = vld [vmem:[#allocation20_spill] sm:$0xff] }
 0x1b0   : > { %v1663_v27 = vpop.f32.mrf.mxu1 }
 0x1b1   : > { %v1840_v14 = vadd.f32 %v1839_v49, %v1751_v63  ;;  %v1664_v6 = vadd.f32 %v1663_v27, %v4118_v17  ;;  %v4123_v27 = vld [vmem:[#allocation18_spill] sm:$0xff] }
 0x1b2   : > { %v1930_v28 = vpop.f32.mrf.mxu0 }
 0x1b3   : > { %v3888_v38 = vadd.f32 %v1928_v53, %v1840_v14 }
 0x1b6   : > { %v1752_v45 = vpop.f32.mrf.mxu2 }
 0x1b7   : > { %v1753_v18 = vadd.f32 %v1752_v45, %v1664_v6  ;;  %v1841_v29 = vpop.f32.mrf.mxu3 }
 0x1b8   : > { %v1666_v8 = vpop.f32.mrf.mxu1 }
 0x1b9   : > { %v1842_v56 = vadd.f32 %v1841_v29, %v1753_v18  ;;  %v1667_v9 = vadd.f32 %v1666_v8, %v4119_v52  ;;  %v4124_v8 = vld [vmem:[#allocation21_spill] sm:$0xff] }
 0x1ba   : > { %v1933_v35 = vpop.f32.mrf.mxu0 }
 0x1bb   : > { %1981 = vmatmul.bf16.gmra.mxu1 %v4117_v11  ;;  %2070 = vmatmul.bf16.gmra.mxu2 %v4120_v47  ;;  %v3893_v41 = vadd.f32 %v1930_v28, %v1842_v56  ;;  %v4125_v47 = vld [vmem:[#allocation3_spill] sm:$0xff] }
 0x1bc   : > { %2159 = vmatmul.bf16.gmra.mxu3 %v4121_v15  ;;  %v4126_v15 = vld [vmem:[#allocation25_spill] sm:$0xff] }
 0x1bd   : > { %2248 = vmatmul.bf16.gmra.mxu0 %v4122_v5 }
 0x1be   : > { %v1755_v53 = vpop.f32.mrf.mxu2 }
 0x1bf   : > { %v1756_v62 = vadd.f32 %v1755_v53, %v1667_v9  ;;  %v1844_v48 = vpop.f32.mrf.mxu3  ;;  %v4127_v53 = vld [vmem:[#allocation30_spill] sm:$0xff] }
 0x1c0   : > { %v1668_v63 = vpop.f32.mrf.mxu1 }
 0x1c1   : > { %v1845_v49 = vadd.f32 %v1844_v48, %v1756_v62  ;;  %v1669_v14 = vadd.f32 %v1668_v63, %v4123_v27  ;;  %v4128_v27 = vld [vmem:[#allocation23_spill] sm:$0xff] }
 0x1c2   : > { %v1935_v17 = vpop.f32.mrf.mxu0 }
 0x1c3   : > { %v3898_v6 = vadd.f32 %v1933_v35, %v1845_v49 }
 0x1c6   : > { %v1757_v45 = vpop.f32.mrf.mxu2 }
 0x1c7   : > { %v1758_v11 = vadd.f32 %v1757_v45, %v1669_v14  ;;  %v1846_v18 = vpop.f32.mrf.mxu3 }
 0x1c8   : > { %v1671_v29 = vpop.f32.mrf.mxu1 }
 0x1c9   : > { %v1847_v28 = vadd.f32 %v1846_v18, %v1758_v11  ;;  %v1672_v56 = vadd.f32 %v1671_v29, %v4124_v8 }
 0x1ca   : > { %v1938_v52 = vpop.f32.mrf.mxu0 }
 0x1cb   : > { %1986 = vmatmul.bf16.gmra.mxu1 %v4122_v5  ;;  %2075 = vmatmul.bf16.gmra.mxu2 %v4125_v47  ;;  %v3903_v9 = vadd.f32 %v1935_v17, %v1847_v28  ;;  %v4129_v28 = vld [vmem:[#allocation27_spill] sm:$0xff] }
 0x1cc   : > { %2164 = vmatmul.bf16.gmra.mxu3 %v4126_v15 }
 0x1cd   : > { %2253 = vmatmul.bf16.gmra.mxu0 %v4127_v53 }
 0x1ce   : > { %v1760_v35 = vpop.f32.mrf.mxu2 }
 0x1cf   : > { %v1761_v62 = vadd.f32 %v1760_v35, %v1672_v56  ;;  %v1849_v48 = vpop.f32.mrf.mxu3 }
 0x1d0   : > { %v1673_v63 = vpop.f32.mrf.mxu1 }
 0x1d1   : > { %v1850_v49 = vadd.f32 %v1849_v48, %v1761_v62  ;;  %v1674_v14 = vadd.f32 %v1673_v63, %v4128_v27 }
 0x1d2   : > { %v1940_v45 = vpop.f32.mrf.mxu0 }
 0x1d3   : > { %v3908_v11 = vadd.f32 %v1938_v52, %v1850_v49  ;;  %v4130_v49 = vld [vmem:[#allocation29_spill] sm:$0xff] }
 0x1d6   : > { %v1762_v18 = vpop.f32.mrf.mxu2 }
 0x1d7   : > { %v1763_v5 = vadd.f32 %v1762_v18, %v1674_v14  ;;  %v1851_v29 = vpop.f32.mrf.mxu3 }
 0x1d8   : > { %v1676_v8 = vpop.f32.mrf.mxu1 }
 0x1d9   : > { %v1852_v17 = vadd.f32 %v1851_v29, %v1763_v5  ;;  %v1677_v47 = vadd.f32 %v1676_v8, %v4129_v28 }
 0x1da   : > { %v1943_v15 = vpop.f32.mrf.mxu0 }
 0x1db   : > { %1991 = vmatmul.bf16.gmra.mxu1 %v4127_v53  ;;  %2080 = vmatmul.bf16.gmra.mxu2 %v3181_v20  ;;  %v3913_v56 = vadd.f32 %v1940_v45, %v1852_v17  ;;  %v4131_v17 = vld [vmem:[#allocation31_spill] sm:$0xff] }
 0x1dc   : > { %2169 = vmatmul.bf16.gmra.mxu3 %v3614_v54 }
 0x1dd   : > { %2258 = vmatmul.bf16.gmra.mxu0 %v3645_v55 }
 0x1de   : > { %v1765_v52 = vpop.f32.mrf.mxu2 }
 0x1df   : > { %v1766_v35 = vadd.f32 %v1765_v52, %v1677_v47  ;;  %v1854_v62 = vpop.f32.mrf.mxu3 }
 0x1e0   : > { %v1678_v48 = vpop.f32.mrf.mxu1 }
 0x1e1   : > { %v1855_v63 = vadd.f32 %v1854_v62, %v1766_v35  ;;  %v1679_v27 = vadd.f32 %v1678_v48, %v4130_v49 }
 0x1e2   : > { %v1945_v14 = vpop.f32.mrf.mxu0 }
 0x1e3   : > { %v3918_v18 = vadd.f32 %v1943_v15, %v1855_v63 }
 0x1e6   : > { %v1767_v5 = vpop.f32.mrf.mxu2 }
 0x1e7   : > { %v1768_v53 = vadd.f32 %v1767_v5, %v1679_v27  ;;  %v1856_v29 = vpop.f32.mrf.mxu3 }
 0x1e8   : > { %v1957_v20 = vpop.f32.mrf.mxu1 }
 0x1e9   : > { %v1857_v45 = vadd.f32 %v1856_v29, %v1768_v53  ;;  %v1958_v28 = vadd.f32 %v1957_v20, %v4131_v17 }
 0x1ea   : > { %v2224_v8 = vpop.f32.mrf.mxu0 }
 0x1eb   : > { %1996 = vmatmul.bf16.gmra.mxu1 %v3645_v55  ;;  %2085 = vmatmul.bf16.gmra.mxu2 %v3271_v31  ;;  %v3922_v54 = vadd.f32 %v1945_v14, %v1857_v45  ;;  %v4132_v55 = vld [vmem:[#allocation32_spill] sm:$0xff] }
 0x1ec   : > { %2174 = vmatmul.bf16.gmra.mxu3 %v3648_v7 }
 0x1ed   : > { %2263 = vmatmul.bf16.gmra.mxu0 %v3672_v61 }
 0x1ee   : > { %v2046_v47 = vpop.f32.mrf.mxu2 }
 0x1ef   : > { %v2047_v15 = vadd.f32 %v2046_v47, %v1958_v28  ;;  %v2135_v52 = vpop.f32.mrf.mxu3 }
 0x1f0   : > { %v1959_v35 = vpop.f32.mrf.mxu1 }
 0x1f1   : > { %v2136_v62 = vadd.f32 %v2135_v52, %v2047_v15  ;;  %v1960_v7 = vadd.f32 %v1959_v35, %v4132_v55 }
 0x1f2   : > { %v2226_v48 = vpop.f32.mrf.mxu0 }
 0x1f3   : > { %v2225_v31 = vadd.f32 %v2224_v8, %v2136_v62 }
 0x1f5   : > { %2304 = vst [vmem:[%s3932_s16] sm:$0xff] %v2225_v31  ;;  %v2373_v20 = vmul.f32 %v2225_v31, %v2225_v31 }
 0x1f6   : > { %v2048_v63 = vpop.f32.mrf.mxu2 }
 0x1f7   : > { %v2049_v49 = vadd.f32 %v2048_v63, %v1960_v7  ;;  %v2137_v27 = vpop.f32.mrf.mxu3 }
 0x1f8   : > { %v1962_v14 = vpop.f32.mrf.mxu1 }
 0x1f9   : > { %v2138_v5 = vadd.f32 %v2137_v27, %v2049_v49  ;;  %v1963_v17 = vadd.f32 %v1962_v14, %v3666_v23 }
 0x1fa   : > { %v2229_v53 = vpop.f32.mrf.mxu0 }
 0x1fb   : > { %v2227_v29 = vadd.f32 %v2226_v48, %v2138_v5  ;;  %2001 = vmatmul.bf16.gmra.mxu1 %v3672_v61  ;;  %2090 = vmatmul.bf16.gmra.mxu2 %v3315_v12 }
 0x1fc   : > { %2179 = vmatmul.bf16.gmra.mxu3 %v3675_v42 }
 0x1fd   : > { %2268 = vmatmul.bf16.gmra.mxu0 %v3709_v30  ;;  %2305 = vst [vmem:[%s3932_s16 + $0x8] sm:$0xff] %v2227_v29  ;;  %v2336_v45 = vadd.f32 %v2227_v29, %v2225_v31  ;;  %v2374_v8 = vmul.f32 %v2227_v29, %v2227_v29 }
 0x1fe   : > { %v2051_v28 = vpop.f32.mrf.mxu2 }
 0x1ff   : > { %v2405_v47 = vadd.f32 %v2374_v8, %v2373_v20  ;;  %v2052_v15 = vadd.f32 %v2051_v28, %v1963_v17  ;;  %v2140_v52 = vpop.f32.mrf.mxu3  ;;  %v4134_v20 = vld [vmem:[#allocation33_spill] sm:$0xff] }
 0x200   : > { %v1964_v35 = vpop.f32.mrf.mxu1 }
 0x201   : > { %v2141_v62 = vadd.f32 %v2140_v52, %v2052_v15  ;;  %v1965_v55 = vadd.f32 %v1964_v35, %v3679_v24 }
 0x202   : > { %v2231_v61 = vpop.f32.mrf.mxu0 }
 0x203   : > { %v2230_v48 = vadd.f32 %v2229_v53, %v2141_v62  ;;  %v4133_v53 = vld [vmem:[#allocation36_spill] sm:$0xff] }
 0x205   : > { %2306 = vst [vmem:[%s3932_s16 + $0x10] sm:$0xff] %v2230_v48  ;;  %v2337_v12 = vadd.f32 %v2336_v45, %v2230_v48  ;;  %v2375_v42 = vmul.f32 %v2230_v48, %v2230_v48 }
 0x206   : > { %v2053_v7 = vpop.f32.mrf.mxu2 }
 0x207   : > { %v2406_v63 = vadd.f32 %v2405_v47, %v2375_v42  ;;  %v2054_v31 = vadd.f32 %v2053_v7, %v1965_v55  ;;  %v2142_v49 = vpop.f32.mrf.mxu3 }
 0x208   : > { %v1967_v27 = vpop.f32.mrf.mxu1 }
 0x209   : > { %v2143_v23 = vadd.f32 %v2142_v49, %v2054_v31  ;;  %v1968_v45 = vadd.f32 %v1967_v27, %v4134_v20 }
 0x20a   : > { %v2234_v14 = vpop.f32.mrf.mxu0 }
 0x20b   : > { %v2232_v5 = vadd.f32 %v2231_v61, %v2143_v23  ;;  %2006 = vmatmul.bf16.gmra.mxu1 %v3709_v30  ;;  %2095 = vmatmul.bf16.gmra.mxu2 %v3076_v10 }
 0x20c   : > { %2184 = vmatmul.bf16.gmra.mxu3 %v3712_v58  ;;  %v4135_v58 = vld [vmem:[#allocation34_spill] sm:$0xff] }
 0x20d   : > { %2273 = vmatmul.bf16.gmra.mxu0 %v4133_v53  ;;  %2307 = vst [vmem:[%s3932_s16 + $0x18] sm:$0xff] %v2232_v5  ;;  %v2338_v29 = vadd.f32 %v2337_v12, %v2232_v5  ;;  %v2376_v24 = vmul.f32 %v2232_v5, %v2232_v5 }
 0x20e   : > { %v2056_v8 = vpop.f32.mrf.mxu2 }
 0x20f   : > { %v2407_v17 = vadd.f32 %v2406_v63, %v2376_v24  ;;  %v2057_v28 = vadd.f32 %v2056_v8, %v1968_v45  ;;  %v2145_v47 = vpop.f32.mrf.mxu3 }
 0x210   : > { %v1969_v15 = vpop.f32.mrf.mxu1 }
 0x211   : > { %v2146_v52 = vadd.f32 %v2145_v47, %v2057_v28  ;;  %v1970_v61 = vadd.f32 %v1969_v15, %v4135_v58 }
 0x212   : > { %v2236_v35 = vpop.f32.mrf.mxu0 }
 0x213   : > { %v2235_v30 = vadd.f32 %v2234_v14, %v2146_v52  ;;  %v4136_v14 = vld [vmem:[#allocation35_spill] sm:$0xff] }
 0x215   : > { %2308 = vst [vmem:[%s3932_s16 + $0x20] sm:$0xff] %v2235_v30  ;;  %v2339_v10 = vadd.f32 %v2338_v29, %v2235_v30  ;;  %v2377_v62 = vmul.f32 %v2235_v30, %v2235_v30 }
 0x216   : > { %v2058_v48 = vpop.f32.mrf.mxu2 }
 0x217   : > { %v2408_v42 = vadd.f32 %v2407_v17, %v2377_v62  ;;  %v2059_v12 = vadd.f32 %v2058_v48, %v1970_v61  ;;  %v2147_v55 = vpop.f32.mrf.mxu3 }
 0x218   : > { %v1972_v7 = vpop.f32.mrf.mxu1 }
 0x219   : > { %v2148_v31 = vadd.f32 %v2147_v55, %v2059_v12  ;;  %v1973_v5 = vadd.f32 %v1972_v7, %v4136_v14 }
 0x21a   : > { %v2239_v49 = vpop.f32.mrf.mxu0 }
 0x21b   : > { %v2237_v63 = vadd.f32 %v2236_v35, %v2148_v31  ;;  %2011 = vmatmul.bf16.gmra.mxu1 %v4133_v53  ;;  %2100 = vmatmul.bf16.gmra.mxu2 %v3185_v21 }
 0x21c   : > { %2189 = vmatmul.bf16.gmra.mxu3 %v3738_v4  ;;  %v4137_v4 = vld [vmem:[#allocation37_spill] sm:$0xff] }
 0x21d   : > { %2278 = vmatmul.bf16.gmra.mxu0 %v3774_v32  ;;  %2309 = vst [vmem:[%s3932_s16 + $0x28] sm:$0xff] %v2237_v63  ;;  %v2340_v27 = vadd.f32 %v2339_v10, %v2237_v63  ;;  %v2378_v23 = vmul.f32 %v2237_v63, %v2237_v63 }
 0x21e   : > { %v2061_v29 = vpop.f32.mrf.mxu2 }
 0x21f   : > { %v2409_v24 = vadd.f32 %v2408_v42, %v2378_v23  ;;  %v2062_v20 = vadd.f32 %v2061_v29, %v1973_v5  ;;  %v2150_v45 = vpop.f32.mrf.mxu3 }
 0x220   : > { %v1974_v8 = vpop.f32.mrf.mxu1 }
 0x221   : > { %v2151_v17 = vadd.f32 %v2150_v45, %v2062_v20  ;;  %v1975_v15 = vadd.f32 %v1974_v8, %v4137_v4 }
 0x222   : > { %v2241_v28 = vpop.f32.mrf.mxu0 }
 0x223   : > { %v2240_v53 = vadd.f32 %v2239_v49, %v2151_v17 }
 0x225   : > { %2310 = vst [vmem:[%s3932_s16 + $0x30] sm:$0xff] %v2240_v53  ;;  %v2341_v21 = vadd.f32 %v2340_v27, %v2240_v53  ;;  %v2379_v47 = vmul.f32 %v2240_v53, %v2240_v53 }
 0x226   : > { %v2063_v52 = vpop.f32.mrf.mxu2 }
 0x227   : > { %v2410_v35 = vadd.f32 %v2409_v24, %v2379_v47  ;;  %v2064_v30 = vadd.f32 %v2063_v52, %v1975_v15  ;;  %v2152_v10 = vpop.f32.mrf.mxu3 }
 0x228   : > { %v1977_v62 = vpop.f32.mrf.mxu1 }
 0x229   : > { %v2153_v58 = vadd.f32 %v2152_v10, %v2064_v30  ;;  %v1978_v55 = vadd.f32 %v1977_v62, %v3769_v44 }
 0x22a   : > { %v2244_v61 = vpop.f32.mrf.mxu0 }
 0x22b   : > { %v2242_v48 = vadd.f32 %v2241_v28, %v2153_v58  ;;  %2016 = vmatmul.bf16.gmra.mxu1 %v3774_v32  ;;  %2105 = vmatmul.bf16.gmra.mxu2 %v3275_v34 }
 0x22c   : > { %2194 = vmatmul.bf16.gmra.mxu3 %v3778_v51  ;;  %v4138_v51 = vld [vmem:[#allocation38_spill] sm:$0xff] }
 0x22d   : > { %2283 = vmatmul.bf16.gmra.mxu0 %v3797_v50  ;;  %2311 = vst [vmem:[%s3932_s16 + $0x38] sm:$0xff] %v2242_v48  ;;  %v2342_v42 = vadd.f32 %v2341_v21, %v2242_v48  ;;  %v2380_v12 = vmul.f32 %v2242_v48, %v2242_v48 }
 0x22e   : > { %v2066_v7 = vpop.f32.mrf.mxu2 }
 0x22f   : > { %v2411_v31 = vadd.f32 %v2410_v35, %v2380_v12  ;;  %v2067_v49 = vadd.f32 %v2066_v7, %v1978_v55  ;;  %v2155_v63 = vpop.f32.mrf.mxu3 }
 0x230   : > { %v1979_v27 = vpop.f32.mrf.mxu1 }
 0x231   : > { %v2156_v23 = vadd.f32 %v2155_v63, %v2067_v49  ;;  %v1980_v29 = vadd.f32 %v1979_v27, %v4138_v51 }
 0x232   : > { %v2246_v14 = vpop.f32.mrf.mxu0 }
 0x233   : > { %v2245_v32 = vadd.f32 %v2244_v61, %v2156_v23 }
 0x235   : > { %2312 = vst [vmem:[%s3932_s16 + $0x40] sm:$0xff] %v2245_v32  ;;  %v2343_v34 = vadd.f32 %v2342_v42, %v2245_v32  ;;  %v2381_v5 = vmul.f32 %v2245_v32, %v2245_v32  ;;  %v920_v42 = vrot.slane %v3816_v57, 1 }
 0x236   : > { %v2068_v24 = vpop.f32.mrf.mxu2 }
 0x237   : > { %v2412_v20 = vadd.f32 %v2411_v31, %v2381_v5  ;;  %v2069_v45 = vadd.f32 %v2068_v24, %v1980_v29  ;;  %v2157_v8 = vpop.f32.mrf.mxu3 }
 0x238   : > { %v1982_v17 = vpop.f32.mrf.mxu1 }
 0x239   : > { %v2158_v44 = vadd.f32 %v2157_v8, %v2069_v45  ;;  %v1983_v4 = vadd.f32 %v1982_v17, %v3792_v25 }
 0x23a   : > { %v2249_v28 = vpop.f32.mrf.mxu0 }
 0x23b   : > { %v2247_v53 = vadd.f32 %v2246_v14, %v2158_v44  ;;  %2021 = vmatmul.bf16.gmra.mxu1 %v3797_v50  ;;  %2110 = vmatmul.bf16.gmra.mxu2 %v3319_v13  ;;  %v919_v13 = vrot.slane %v3805_v3, 1 }
 0x23c   : > { %2199 = vmatmul.bf16.gmra.mxu3 %v3801_v0 }
 0x23d   : > { %2288 = vmatmul.bf16.gmra.mxu0 %v3825_v39  ;;  %2313 = vst [vmem:[%s3932_s16 + $0x48] sm:$0xff] %v2247_v53  ;;  %v2344_v21 = vadd.f32 %v2343_v34, %v2247_v53  ;;  %v2382_v47 = vmul.f32 %v2247_v53, %v2247_v53  ;;  %v921_v27 = vsel %vm839_vm4, %v919_v13, %v920_v42 }
 0x23e   : > { %v2071_v15 = vpop.f32.mrf.mxu2 }
 0x23f   : > { %v2413_v52 = vadd.f32 %v2412_v20, %v2382_v47  ;;  %v2072_v35 = vadd.f32 %v2071_v15, %v1983_v4  ;;  %v2160_v30 = vpop.f32.mrf.mxu3  ;;  %v4139_v4 = vld [vmem:[#allocation4_spill] sm:$0xff] }
 0x240   : > { %v1984_v10 = vpop.f32.mrf.mxu1  ;;  %v4140_v15 = vld [vmem:[#allocation8_spill] sm:$0xff] }
 0x241   : > { %v2161_v62 = vadd.f32 %v2160_v30, %v2072_v35  ;;  %v1985_v48 = vadd.f32 %v1984_v10, %v3809_v19 }
 0x242   : > { %v2251_v58 = vpop.f32.mrf.mxu0 }
 0x243   : > { %v2250_v50 = vadd.f32 %v2249_v28, %v2161_v62 }
 0x245   : > { %2314 = vst [vmem:[%s3932_s16 + $0x50] sm:$0xff] %v2250_v50  ;;  %v2345_v61 = vadd.f32 %v2344_v21, %v2250_v50  ;;  %v2383_v0 = vmul.f32 %v2250_v50, %v2250_v50 }
 0x246   : > { %v2073_v12 = vpop.f32.mrf.mxu2 }
 0x247   : > { %v2414_v25 = vadd.f32 %v2413_v52, %v2383_v0  ;;  %v2074_v55 = vadd.f32 %v2073_v12, %v1985_v48  ;;  %v2162_v7 = vpop.f32.mrf.mxu3  ;;  %v4141_v52 = vld [vmem:[#allocation9_spill] sm:$0xff] }
 0x248   : > { %v1987_v31 = vpop.f32.mrf.mxu1 }
 0x249   : > { %v2163_v49 = vadd.f32 %v2162_v7, %v2074_v55  ;;  %v1988_v14 = vadd.f32 %v1987_v31, %v3821_v36 }
 0x24a   : > { %v2254_v63 = vpop.f32.mrf.mxu0 }
 0x24b   : > { %v2252_v23 = vadd.f32 %v2251_v58, %v2163_v49  ;;  %2026 = vmatmul.bf16.gmra.mxu1 %v3825_v39  ;;  %2115 = vmatmul.bf16.gmra.mxu2 %v3805_v3 }
 0x24c   : > { %2204 = vmatmul.bf16.gmra.mxu3 %v3829_v37 }
 0x24d   : > { %2293 = vmatmul.bf16.gmra.mxu0 %v921_v27  ;;  %2315 = vst [vmem:[%s3932_s16 + $0x58] sm:$0xff] %v2252_v23  ;;  %v2346_v19 = vadd.f32 %v2345_v61, %v2252_v23  ;;  %v2384_v57 = vmul.f32 %v2252_v23, %v2252_v23 }
 0x24e   : > { %v2076_v32 = vpop.f32.mrf.mxu2 }
 0x24f   : > { %v2415_v34 = vadd.f32 %v2414_v25, %v2384_v57  ;;  %v2077_v5 = vadd.f32 %v2076_v32, %v1988_v14  ;;  %v2165_v51 = vpop.f32.mrf.mxu3 }
 0x250   : > { %v1989_v29 = vpop.f32.mrf.mxu1 }
 0x251   : > { %v2166_v24 = vadd.f32 %v2165_v51, %v2077_v5  ;;  %v1990_v37 = vadd.f32 %v1989_v29, %v3833_v26 }
 0x252   : > { %v2256_v20 = vpop.f32.mrf.mxu0 }
 0x253   : > { %v2255_v45 = vadd.f32 %v2254_v63, %v2166_v24 }
 0x255   : > { %2316 = vst [vmem:[%s3932_s16 + $0x60] sm:$0xff] %v2255_v45  ;;  %v2347_v39 = vadd.f32 %v2346_v19, %v2255_v45  ;;  %v2385_v3 = vmul.f32 %v2255_v45, %v2255_v45 }
 0x256   : > { %v2078_v8 = vpop.f32.mrf.mxu2 }
 0x257   : > { %v2416_v17 = vadd.f32 %v2415_v34, %v2385_v3  ;;  %v2079_v44 = vadd.f32 %v2078_v8, %v1990_v37  ;;  %v2167_v28 = vpop.f32.mrf.mxu3 }
 0x258   : > { %v1992_v53 = vpop.f32.mrf.mxu1 }
 0x259   : > { %v2168_v36 = vadd.f32 %v2167_v28, %v2079_v44  ;;  %v1993_v26 = vadd.f32 %v1992_v53, %v3838_v1 }
 0x25a   : > { %v2259_v21 = vpop.f32.mrf.mxu0 }
 0x25b   : > { %v2257_v47 = vadd.f32 %v2256_v20, %v2168_v36  ;;  %2031 = vmatmul.bf16.gmra.mxu1 %v921_v27  ;;  %2120 = vmatmul.bf16.gmra.mxu2 %v4139_v4 }
 0x25c   : > { %2209 = vmatmul.bf16.gmra.mxu3 %v4140_v15 }
 0x25d   : > { %2298 = vmatmul.bf16.gmra.mxu0 %v4141_v52  ;;  %2317 = vst [vmem:[%s3932_s16 + $0x68] sm:$0xff] %v2257_v47  ;;  %v2348_v35 = vadd.f32 %v2347_v39, %v2257_v47  ;;  %v2386_v30 = vmul.f32 %v2257_v47, %v2257_v47 }
 0x25e   : > { %v2081_v10 = vpop.f32.mrf.mxu2 }
 0x25f   : > { %v2417_v62 = vadd.f32 %v2416_v17, %v2386_v30  ;;  %v2082_v58 = vadd.f32 %v2081_v10, %v1993_v26  ;;  %v2170_v50 = vpop.f32.mrf.mxu3 }
 0x260   : > { %v1994_v13 = vpop.f32.mrf.mxu1 }
 0x261   : > { %v2171_v61 = vadd.f32 %v2170_v50, %v2082_v58  ;;  %v1995_v25 = vadd.f32 %v1994_v13, %v3843_v43 }
 0x262   : > { %v2261_v0 = vpop.f32.mrf.mxu0 }
 0x263   : > { %v2260_v48 = vadd.f32 %v2259_v21, %v2171_v61 }
 0x265   : > { %2318 = vst [vmem:[%s3932_s16 + $0x70] sm:$0xff] %v2260_v48  ;;  %v2349_v42 = vadd.f32 %v2348_v35, %v2260_v48  ;;  %v2387_v12 = vmul.f32 %v2260_v48, %v2260_v48 }
 0x266   : > { %v2083_v55 = vpop.f32.mrf.mxu2 }
 0x267   : > { %v2418_v7 = vadd.f32 %v2417_v62, %v2387_v12  ;;  %v2084_v31 = vadd.f32 %v2083_v55, %v1995_v25  ;;  %v2172_v49 = vpop.f32.mrf.mxu3 }
 0x268   : > { %v1997_v63 = vpop.f32.mrf.mxu1 }
 0x269   : > { %v2173_v1 = vadd.f32 %v2172_v49, %v2084_v31  ;;  %v1998_v14 = vadd.f32 %v1997_v63, %v3848_v33 }
 0x26a   : > { %v2264_v27 = vpop.f32.mrf.mxu0 }
 0x26b   : > { %v2262_v23 = vadd.f32 %v2261_v0, %v2173_v1 }
 0x26d   : > { %2319 = vst [vmem:[%s3932_s16 + $0x78] sm:$0xff] %v2262_v23  ;;  %v2350_v19 = vadd.f32 %v2349_v42, %v2262_v23  ;;  %v2388_v57 = vmul.f32 %v2262_v23, %v2262_v23 }
 0x26e   : > { %v2086_v32 = vpop.f32.mrf.mxu2 }
 0x26f   : > { %v2419_v34 = vadd.f32 %v2418_v7, %v2388_v57  ;;  %v2087_v5 = vadd.f32 %v2086_v32, %v1998_v14  ;;  %v2175_v51 = vpop.f32.mrf.mxu3 }
 0x270   : > { %v1999_v29 = vpop.f32.mrf.mxu1 }
 0x271   : > { %v2176_v43 = vadd.f32 %v2175_v51, %v2087_v5  ;;  %v2000_v3 = vadd.f32 %v1999_v29, %v3853_v46 }
 0x272   : > { %v2266_v24 = vpop.f32.mrf.mxu0 }
 0x273   : > { %v2265_v20 = vadd.f32 %v2264_v27, %v2176_v43 }
 0x275   : > { %2320 = vst [vmem:[%s3932_s16 + $0x80] sm:$0xff] %v2265_v20  ;;  %v2351_v45 = vadd.f32 %v2350_v19, %v2265_v20  ;;  %v2389_v39 = vmul.f32 %v2265_v20, %v2265_v20 }
 0x276   : > { %v2088_v37 = vpop.f32.mrf.mxu2 }
 0x277   : > { %v2420_v8 = vadd.f32 %v2419_v34, %v2389_v39  ;;  %v2089_v17 = vadd.f32 %v2088_v37, %v2000_v3  ;;  %v2177_v44 = vpop.f32.mrf.mxu3 }
 0x278   : > { %v2002_v28 = vpop.f32.mrf.mxu1 }
 0x279   : > { %v2178_v33 = vadd.f32 %v2177_v44, %v2089_v17  ;;  %v2003_v4 = vadd.f32 %v2002_v28, %v3858_v40 }
 0x27a   : > { %v2269_v53 = vpop.f32.mrf.mxu0 }
 0x27b   : > { %v2267_v36 = vadd.f32 %v2266_v24, %v2178_v33 }
 0x27d   : > { %2321 = vst [vmem:[%s3932_s16 + $0x88] sm:$0xff] %v2267_v36  ;;  %v2352_v21 = vadd.f32 %v2351_v45, %v2267_v36  ;;  %v2390_v47 = vmul.f32 %v2267_v36, %v2267_v36 }
 0x27e   : > { %v2091_v15 = vpop.f32.mrf.mxu2 }
 0x27f   : > { %v2421_v52 = vadd.f32 %v2420_v8, %v2390_v47  ;;  %v2092_v35 = vadd.f32 %v2091_v15, %v2003_v4  ;;  %v2180_v30 = vpop.f32.mrf.mxu3 }
 0x280   : > { %v2004_v26 = vpop.f32.mrf.mxu1 }
 0x281   : > { %v2181_v46 = vadd.f32 %v2180_v30, %v2092_v35  ;;  %v2005_v13 = vadd.f32 %v2004_v26, %v3863_v60 }
 0x282   : > { %v2271_v10 = vpop.f32.mrf.mxu0 }
 0x283   : > { %v2270_v62 = vadd.f32 %v2269_v53, %v2181_v46 }
 0x285   : > { %2322 = vst [vmem:[%s3932_s16 + $0x90] sm:$0xff] %v2270_v62  ;;  %v2353_v58 = vadd.f32 %v2352_v21, %v2270_v62  ;;  %v2391_v50 = vmul.f32 %v2270_v62, %v2270_v62 }
 0x286   : > { %v2093_v61 = vpop.f32.mrf.mxu2 }
 0x287   : > { %v2422_v0 = vadd.f32 %v2421_v52, %v2391_v50  ;;  %v2094_v48 = vadd.f32 %v2093_v61, %v2005_v13  ;;  %v2182_v42 = vpop.f32.mrf.mxu3 }
 0x288   : > { %v2007_v12 = vpop.f32.mrf.mxu1 }
 0x289   : > { %v2183_v40 = vadd.f32 %v2182_v42, %v2094_v48  ;;  %v2008_v49 = vadd.f32 %v2007_v12, %v3868_v22 }
 0x28a   : > { %v2274_v25 = vpop.f32.mrf.mxu0 }
 0x28b   : > { %v2272_v55 = vadd.f32 %v2271_v10, %v2183_v40 }
 0x28d   : > { %2323 = vst [vmem:[%s3932_s16 + $0x98] sm:$0xff] %v2272_v55  ;;  %v2354_v7 = vadd.f32 %v2353_v58, %v2272_v55  ;;  %v2392_v31 = vmul.f32 %v2272_v55, %v2272_v55 }
 0x28e   : > { %v2096_v63 = vpop.f32.mrf.mxu2 }
 0x28f   : > { %v2423_v1 = vadd.f32 %v2422_v0, %v2392_v31  ;;  %v2097_v27 = vadd.f32 %v2096_v63, %v2008_v49  ;;  %v2185_v23 = vpop.f32.mrf.mxu3 }
 0x290   : > { %v2009_v19 = vpop.f32.mrf.mxu1 }
 0x291   : > { %v2186_v60 = vadd.f32 %v2185_v23, %v2097_v27  ;;  %v2010_v5 = vadd.f32 %v2009_v19, %v3873_v16 }
 0x292   : > { %v2276_v57 = vpop.f32.mrf.mxu0 }
 0x293   : > { %v2275_v14 = vadd.f32 %v2274_v25, %v2186_v60 }
 0x295   : > { %2324 = vst [vmem:[%s3932_s16 + $0xa0] sm:$0xff] %v2275_v14  ;;  %v2355_v32 = vadd.f32 %v2354_v7, %v2275_v14  ;;  %v2393_v34 = vmul.f32 %v2275_v14, %v2275_v14 }
 0x296   : > { %v2098_v51 = vpop.f32.mrf.mxu2 }
 0x297   : > { %v2424_v29 = vadd.f32 %v2423_v1, %v2393_v34  ;;  %v2099_v43 = vadd.f32 %v2098_v51, %v2010_v5  ;;  %v2187_v24 = vpop.f32.mrf.mxu3 }
 0x298   : > { %v2012_v20 = vpop.f32.mrf.mxu1 }
 0x299   : > { %v2188_v22 = vadd.f32 %v2187_v24, %v2099_v43  ;;  %v2013_v8 = vadd.f32 %v2012_v20, %v3878_v2 }
 0x29a   : > { %v2279_v45 = vpop.f32.mrf.mxu0 }
 0x29b   : > { %v2277_v39 = vadd.f32 %v2276_v57, %v2188_v22 }
 0x29d   : > { %2325 = vst [vmem:[%s3932_s16 + $0xa8] sm:$0xff] %v2277_v39  ;;  %v2356_v3 = vadd.f32 %v2355_v32, %v2277_v39  ;;  %v2394_v37 = vmul.f32 %v2277_v39, %v2277_v39 }
 0x29e   : > { %v2101_v17 = vpop.f32.mrf.mxu2 }
 0x29f   : > { %v2425_v44 = vadd.f32 %v2424_v29, %v2394_v37  ;;  %v2102_v28 = vadd.f32 %v2101_v17, %v2013_v8  ;;  %v2190_v33 = vpop.f32.mrf.mxu3 }
 0x2a0   : > { %v2014_v53 = vpop.f32.mrf.mxu1 }
 0x2a1   : > { %v2191_v16 = vadd.f32 %v2190_v33, %v2102_v28  ;;  %v2015_v15 = vadd.f32 %v2014_v53, %v3883_v59 }
 0x2a2   : > { %v2281_v36 = vpop.f32.mrf.mxu0 }
 0x2a3   : > { %v2280_v21 = vadd.f32 %v2279_v45, %v2191_v16 }
 0x2a5   : > { %2326 = vst [vmem:[%s3932_s16 + $0xb0] sm:$0xff] %v2280_v21  ;;  %v2357_v47 = vadd.f32 %v2356_v3, %v2280_v21  ;;  %v2395_v4 = vmul.f32 %v2280_v21, %v2280_v21 }
 0x2a6   : > { %v2103_v52 = vpop.f32.mrf.mxu2 }
 0x2a7   : > { %v2426_v35 = vadd.f32 %v2425_v44, %v2395_v4  ;;  %v2104_v30 = vadd.f32 %v2103_v52, %v2015_v15  ;;  %v2192_v26 = vpop.f32.mrf.mxu3 }
 0x2a8   : > { %v2017_v46 = vpop.f32.mrf.mxu1 }
 0x2a9   : > { %v2193_v2 = vadd.f32 %v2192_v26, %v2104_v30  ;;  %v2018_v13 = vadd.f32 %v2017_v46, %v3888_v38 }
 0x2aa   : > { %v2284_v10 = vpop.f32.mrf.mxu0 }
 0x2ab   : > { %v2282_v62 = vadd.f32 %v2281_v36, %v2193_v2 }
 0x2ad   : > { %2327 = vst [vmem:[%s3932_s16 + $0xb8] sm:$0xff] %v2282_v62  ;;  %v2358_v58 = vadd.f32 %v2357_v47, %v2282_v62  ;;  %v2396_v50 = vmul.f32 %v2282_v62, %v2282_v62 }
 0x2ae   : > { %v2106_v61 = vpop.f32.mrf.mxu2 }
 0x2af   : > { %v2427_v0 = vadd.f32 %v2426_v35, %v2396_v50  ;;  %v2107_v48 = vadd.f32 %v2106_v61, %v2018_v13  ;;  %v2195_v42 = vpop.f32.mrf.mxu3 }
 0x2b0   : > { %v2019_v12 = vpop.f32.mrf.mxu1 }
 0x2b1   : > { %v2196_v59 = vadd.f32 %v2195_v42, %v2107_v48  ;;  %v2020_v31 = vadd.f32 %v2019_v12, %v3893_v41 }
 0x2b2   : > { %v2286_v40 = vpop.f32.mrf.mxu0 }
 0x2b3   : > { %v2285_v25 = vadd.f32 %v2284_v10, %v2196_v59 }
 0x2b5   : > { %2328 = vst [vmem:[%s3932_s16 + $0xc0] sm:$0xff] %v2285_v25  ;;  %v2359_v55 = vadd.f32 %v2358_v58, %v2285_v25  ;;  %v2397_v7 = vmul.f32 %v2285_v25, %v2285_v25 }
 0x2b6   : > { %v2108_v49 = vpop.f32.mrf.mxu2 }
 0x2b7   : > { %v2428_v63 = vadd.f32 %v2427_v0, %v2397_v7  ;;  %v2109_v1 = vadd.f32 %v2108_v49, %v2020_v31  ;;  %v2197_v27 = vpop.f32.mrf.mxu3 }
 0x2b8   : > { %v2022_v23 = vpop.f32.mrf.mxu1 }
 0x2b9   : > { %v2198_v38 = vadd.f32 %v2197_v27, %v2109_v1  ;;  %v2023_v32 = vadd.f32 %v2022_v23, %v3898_v6 }
 0x2ba   : > { %v2289_v19 = vpop.f32.mrf.mxu0 }
 0x2bb   : > { %v2287_v60 = vadd.f32 %v2286_v40, %v2198_v38 }
 0x2bd   : > { %2329 = vst [vmem:[%s3932_s16 + $0xc8] sm:$0xff] %v2287_v60  ;;  %v2360_v57 = vadd.f32 %v2359_v55, %v2287_v60  ;;  %v2398_v14 = vmul.f32 %v2287_v60, %v2287_v60 }
 0x2be   : > { %v2111_v34 = vpop.f32.mrf.mxu2 }
 0x2bf   : > { %v2429_v5 = vadd.f32 %v2428_v63, %v2398_v14  ;;  %v2112_v51 = vadd.f32 %v2111_v34, %v2023_v32  ;;  %v2200_v29 = vpop.f32.mrf.mxu3 }
 0x2c0   : > { %v2024_v43 = vpop.f32.mrf.mxu1 }
 0x2c1   : > { %v2201_v41 = vadd.f32 %v2200_v29, %v2112_v51  ;;  %v2025_v39 = vadd.f32 %v2024_v43, %v3903_v9 }
 0x2c2   : > { %v2291_v24 = vpop.f32.mrf.mxu0 }
 0x2c3   : > { %v2290_v20 = vadd.f32 %v2289_v19, %v2201_v41 }
 0x2c5   : > { %2330 = vst [vmem:[%s3932_s16 + $0xd0] sm:$0xff] %v2290_v20  ;;  %v2361_v22 = vadd.f32 %v2360_v57, %v2290_v20  ;;  %v2399_v45 = vmul.f32 %v2290_v20, %v2290_v20 }
 0x2c6   : > { %v2113_v3 = vpop.f32.mrf.mxu2 }
 0x2c7   : > { %v2430_v37 = vadd.f32 %v2429_v5, %v2399_v45  ;;  %v2114_v8 = vadd.f32 %v2113_v3, %v2025_v39  ;;  %v2202_v17 = vpop.f32.mrf.mxu3 }
 0x2c8   : > { %v2027_v6 = vpop.f32.mrf.mxu1 }
 0x2c9   : > { %v2203_v44 = vadd.f32 %v2202_v17, %v2114_v8  ;;  %v2028_v36 = vadd.f32 %v2027_v6, %v3908_v11 }
 0x2ca   : > { %v2294_v33 = vpop.f32.mrf.mxu0 }
 0x2cb   : > { %v2292_v28 = vadd.f32 %v2291_v24, %v2203_v44 }
 0x2cd   : > { %2331 = vst [vmem:[%s3932_s16 + $0xd8] sm:$0xff] %v2292_v28  ;;  %v2362_v53 = vadd.f32 %v2361_v22, %v2292_v28  ;;  %v2400_v16 = vmul.f32 %v2292_v28, %v2292_v28 }
 0x2ce   : > { %v2116_v21 = vpop.f32.mrf.mxu2 }
 0x2cf   : > { %v2431_v47 = vadd.f32 %v2430_v37, %v2400_v16  ;;  %v2117_v4 = vadd.f32 %v2116_v21, %v2028_v36  ;;  %v2205_v15 = vpop.f32.mrf.mxu3 }
 0x2d0   : > { %v2029_v9 = vpop.f32.mrf.mxu1 }
 0x2d1   : > { %v2206_v52 = vadd.f32 %v2205_v15, %v2117_v4  ;;  %v2030_v46 = vadd.f32 %v2029_v9, %v3913_v56 }
 0x2d2   : > { %v2296_v2 = vpop.f32.mrf.mxu0 }
 0x2d3   : > { %v2295_v35 = vadd.f32 %v2294_v33, %v2206_v52 }
 0x2d5   : > { %2332 = vst [vmem:[%s3932_s16 + $0xe0] sm:$0xff] %v2295_v35  ;;  %v2363_v30 = vadd.f32 %v2362_v53, %v2295_v35  ;;  %v2401_v26 = vmul.f32 %v2295_v35, %v2295_v35 }
 0x2d6   : > { %v2118_v10 = vpop.f32.mrf.mxu2 }
 0x2d7   : > { %v2432_v62 = vadd.f32 %v2431_v47, %v2401_v26  ;;  %v2119_v58 = vadd.f32 %v2118_v10, %v2030_v46  ;;  %v2207_v50 = vpop.f32.mrf.mxu3 }
 0x2d8   : > { %v2032_v11 = vpop.f32.mrf.mxu1 }
 0x2d9   : > { %v2208_v13 = vadd.f32 %v2207_v50, %v2119_v58  ;;  %v2033_v42 = vadd.f32 %v2032_v11, %v3918_v18 }
 0x2da   : > { %v2299_v56 = vpop.f32.mrf.mxu0 }
 0x2db   : > { %v2297_v61 = vadd.f32 %v2296_v2, %v2208_v13 }
 0x2dd   : > { %2333 = vst [vmem:[%s3932_s16 + $0xe8] sm:$0xff] %v2297_v61  ;;  %v2364_v0 = vadd.f32 %v2363_v30, %v2297_v61  ;;  %v2402_v48 = vmul.f32 %v2297_v61, %v2297_v61 }
 0x2de   : > { %v2121_v12 = vpop.f32.mrf.mxu2 }
 0x2df   : > { %v2433_v59 = vadd.f32 %v2432_v62, %v2402_v48  ;;  %v2122_v40 = vadd.f32 %v2121_v12, %v2033_v42  ;;  %v2210_v25 = vpop.f32.mrf.mxu3 }
 0x2e0   : > { %v2034_v7 = vpop.f32.mrf.mxu1 }
 0x2e1   : > { %v2211_v55 = vadd.f32 %v2210_v25, %v2122_v40  ;;  %v2035_v1 = vadd.f32 %v2034_v7, %v3922_v54 }
 0x2e2   : > { %v2301_v18 = vpop.f32.mrf.mxu0 }
 0x2e3   : > { %v2300_v31 = vadd.f32 %v2299_v56, %v2211_v55 }
 0x2e5   : > { %2334 = vst [vmem:[%s3932_s16 + $0xf0] sm:$0xff] %v2300_v31  ;;  %v2365_v49 = vadd.f32 %v2364_v0, %v2300_v31  ;;  %v2403_v63 = vmul.f32 %v2300_v31, %v2300_v31 }
 0x2e6   : > { %v2123_v27 = vpop.f32.mrf.mxu2 }
 0x2e7   : > { %v2434_v23 = vadd.f32 %v2433_v59, %v2403_v63  ;;  %v2124_v38 = vadd.f32 %v2123_v27, %v2035_v1  ;;  %v2212_v19 = vpop.f32.mrf.mxu3 }
 0x2e9   : > { %v2213_v60 = vadd.f32 %v2212_v19, %v2124_v38 }
 0x2eb   : > { %v2302_v57 = vadd.f32 %v2301_v18, %v2213_v60 }
 0x2ed   : > { %2335 = vst [vmem:[%s3932_s16 + $0xf8] sm:$0xff] %v2302_v57  ;;  %v2366_v14 = vadd.f32 %v2365_v49, %v2302_v57  ;;  %v2404_v32 = vmul.f32 %v2302_v57, %v2302_v57 }
 0x2ef   : > { %v2367_v34 = vrot.slane %v2366_v14, 4  ;;  %v2435_v5 = vadd.f32 %v2434_v23, %v2404_v32 }
 0x2f1   : > { %v2368_v51 = vadd.f32 %v2367_v34, %v2366_v14  ;;  %v2436_v29 = vrot.slane %v2435_v5, 4 }
 0x2f3   : > { %v2369_v43 = vrot.slane %v2368_v51, 2  ;;  %v2437_v41 = vadd.f32 %v2436_v29, %v2435_v5 }
 0x2f5   : > { %v2370_v24 = vadd.f32 %v2369_v43, %v2368_v51  ;;  %v2438_v20 = vrot.slane %v2437_v41, 2 }
 0x2f7   : > { %v2371_v54 = vrot.slane %v2370_v24, 1  ;;  %v2439_v22 = vadd.f32 %v2438_v20, %v2437_v41 }
 0x2f9   : > { %v2440_v45 = vrot.slane %v2439_v22, 1  ;;  %v2372_v39 = vadd.f32 %v2371_v54, %v2370_v24 }
 0x2fb   : > { %v2441_v3 = vadd.f32 %v2440_v45, %v2439_v22 }
 0x2fd   : > { %v2443_v37 = vsel %vm561_vm0, %v2372_v39, %v2441_v3 }
 0x2fe   : > { %2444 = vst [vmem:[%s262_s19] sm:$0x3] %v2443_v37 }
 0x2ff PF: > { %s17_s21 = sadd.s32 1, %s2945_s21  }
 0x300   : > { %p14_p4 = scmp.ge.s32.totalorder %s17_s21, 4  }
 0x302   :  { %16 = sbr.rel (!%p14_p4) target bundleno = 1 (0x1), region = 82 }

</bundles_post_ra>
